<compile_context>
chip_gen: v7x
topology: tpu7x:2x2x1
jax: 0.10.0
libtpu: 0.0.40
codegen_flags: <defaults>
</compile_context>

<pallas_src>
import jax
import jax.numpy as jnp
from jax.experimental import pallas as pl
from jax.experimental.pallas import tpu as pltpu

# ------------------------- model / problem sizes ---------------------------
B = 2            # batch
V = 50           # vocab
E = 32           # embedding dim
H = 128          # hidden dim (lane-aligned)
SRC_LEN = 8
ANS_LEN = 4
TGT_LEN = 9      # tgt[:-1] -> 8 decoder steps
NEG_INF = -1e9


# --------------------------- fused forward kernel ---------------------------
def _fused_forward_kernel(enc_x_ref, tgt_x_ref, src_len_ref, ans_len_ref,
                          enc_w_ih_ref, enc_w_hh_ref, enc_b_ref,
                          dec_w_ih_ref, dec_w_hh_ref, dec_b_ref,
                          w_c_ctx_ref, w_c_h_ref,
                          out_ref, attn_ref, dec_state_ref):
    f32 = jnp.float32
    hi = jax.lax.Precision.HIGHEST

    tb, h_dim = out_ref.shape                 # T*B, H
    b_dim = dec_state_ref.shape[0]            # B
    s_dim = attn_ref.shape[1]                 # S
    t_steps = tb // b_dim                     # T
    two_b = 2 * b_dim

    # ------------- encoder: src & ans streams co-batched along batch -------------
    # hoisted input projection: one [S*2B, E] @ [E, H] matmul for all steps
    enc_xp = (jnp.dot(enc_x_ref[...], enc_w_ih_ref[...],
                      preferred_element_type=f32) + enc_b_ref[...])   # [S*2B, H]
    enc_w_hh = enc_w_hh_ref[...]

    h = jnp.zeros((two_b, h_dim), f32)
    src_states = []
    ans_states = []
    for t in range(s_dim):                    # unrolled; only h @ W_hh is serial
        h = jnp.tanh(enc_xp[t * two_b:(t + 1) * two_b, :]
                     + jnp.dot(h, enc_w_hh, preferred_element_type=f32))
        src_states.append(h[:b_dim, :])
        ans_states.append(h[b_dim:, :])

    mem_bsh = jnp.stack(src_states, axis=1)   # [B, S, H] memory bank (stays in VMEM)
    ans_bsh = jnp.stack(ans_states, axis=1)   # [B, S, H] (cols >= true ans len unused)

    # length-dependent final states & attention mask, built in-kernel
    iota_s = jax.lax.broadcasted_iota(jnp.int32, (b_dim, s_dim), 1)   # [B, S]
    src_len = src_len_ref[...]                # [B, 1] int32
    ans_len = ans_len_ref[...]                # [B, 1] int32
    onehot_src = (iota_s == (src_len - 1)).astype(f32)                # [B, S]
    onehot_ans = (iota_s == (ans_len - 1)).astype(f32)                # [B, S]
    # exact one-hot selection (== length-indexed gather of the last hidden state)
    enc_final = jnp.sum(onehot_src[:, :, None] * mem_bsh, axis=1)     # [B, H]
    ans_final = jnp.sum(onehot_ans[:, :, None] * ans_bsh, axis=1)     # [B, H]
    mask = jnp.where(iota_s < src_len, f32(0.0), f32(NEG_INF))        # [B, S]

    # ------------------------------- decoder -------------------------------
    dec_xp = (jnp.dot(tgt_x_ref[...], dec_w_ih_ref[...],
                      preferred_element_type=f32) + dec_b_ref[...])   # [T*B, H]
    dec_w_hh = dec_w_hh_ref[...]

    h = enc_final
    hs, ctxs, attns = [], [], []
    for t in range(t_steps):
        h = jnp.tanh(dec_xp[t * b_dim:(t + 1) * b_dim, :]
                     + jnp.dot(h, dec_w_hh, preferred_element_type=f32))
        # "use answer as query in decoder attention"
        q = (h + ans_final)[:, None, :]                               # [B, 1, H]
        scores = jnp.einsum('bqh,bsh->bqs', q, mem_bsh,
                            preferred_element_type=f32,
                            precision=hi)[:, 0, :] + mask             # [B, S]
        scores = scores - jnp.max(scores, axis=-1, keepdims=True)
        e = jnp.exp(scores)
        attn = e / jnp.sum(e, axis=-1, keepdims=True)                 # [B, S]
        ctx = jnp.einsum('bqs,bsh->bqh', attn[:, None, :], mem_bsh,
                         preferred_element_type=f32,
                         precision=hi)[:, 0, :]                       # [B, H]
        hs.append(h)
        ctxs.append(ctx)
        attns.append(attn)

    # deferred output projection: two well-filled [T*B, H] @ [H, H] matmuls
    h_all = jnp.concatenate(hs, axis=0)                               # [T*B, H]
    ctx_all = jnp.concatenate(ctxs, axis=0)                           # [T*B, H]
    out_all = jnp.tanh(
        jnp.dot(ctx_all, w_c_ctx_ref[...], preferred_element_type=f32)
        + jnp.dot(h_all, w_c_h_ref[...], preferred_element_type=f32))

    # bulk stores (one slab each instead of T tiny per-step writes)
    out_ref[...] = out_all                                            # [T*B, H]
    attn_ref[...] = jnp.concatenate(attns, axis=0)                    # [T*B, S]
    dec_state_ref[...] = h                                            # [B, H]


# --------------------------- QueryModel.forward ----------------------------
def query_model_forward(params, src, src_lengths, ans, ans_lengths, tgt):
    """Mirrors QueryModel.forward: returns (decoder_outputs, attns, dec_state)."""
    tgt = tgt[:-1]                                                    # drop last token
    t_steps = tgt.shape[0]

    # TODO(synk): token-id embedding lookup (gather) stays in XLA glue.
    src_emb = params["emb_src"][src]                                  # [S, B, E]
    ans_emb = params["emb_src"][ans]                                  # [A, B, E]
    tgt_emb = params["emb_tgt"][tgt]                                  # [T, B, E]

    # co-batch src / ans streams along the batch axis (ans zero-padded to S steps;
    # padded steps never influence ans_final since ans_lengths <= ANS_LEN).
    ans_pad = jnp.zeros((SRC_LEN, B, E), jnp.float32).at[:ANS_LEN].set(ans_emb)
    enc_x = jnp.concatenate([src_emb, ans_pad], axis=1).reshape(SRC_LEN * 2 * B, E)
    tgt_x = tgt_emb.reshape(t_steps * B, E)
    src_len2 = src_lengths.astype(jnp.int32).reshape(B, 1)
    ans_len2 = ans_lengths.astype(jnp.int32).reshape(B, 1)

    vmem = pl.BlockSpec(memory_space=pltpu.MemorySpace.VMEM)
    out_flat, attn_flat, dec_state = pl.pallas_call(
        _fused_forward_kernel,
        out_shape=(
            jax.ShapeDtypeStruct((t_steps * B, H), jnp.float32),      # decoder outputs
            jax.ShapeDtypeStruct((t_steps * B, SRC_LEN), jnp.float32),  # attn dists
            jax.ShapeDtypeStruct((B, H), jnp.float32),                # final dec state
        ),
        in_specs=[vmem] * 12,
        out_specs=(vmem, vmem, vmem),
    )(enc_x, tgt_x, src_len2, ans_len2,
      params["enc_w_ih"], params["enc_w_hh"], params["enc_b"],
      params["dec_w_ih"], params["dec_w_hh"], params["dec_b"],
      params["w_c_ctx"], params["w_c_h"])

    dec_out = out_flat.reshape(t_steps, B, H)
    attns = attn_flat.reshape(t_steps, B, SRC_LEN)
    return dec_out, attns, dec_state


# --------------------------- pure-JAX reference -----------------------------
def reference_forward(params, src, src_lengths, ans, ans_lengths, tgt):
    tgt = tgt[:-1]
    src_emb = params["emb_src"][src]
    ans_emb = params["emb_src"][ans]
    tgt_emb = params["emb_tgt"][tgt]

    def enc_step(h, x):
        h = jnp.tanh(x @ params["enc_w_ih"] + h @ params["enc_w_hh"] + params["enc_b"])
        return h, h

    h0 = jnp.zeros((B, H), jnp.float32)
    _, memory_bank = jax.lax.scan(enc_step, h0, src_emb)
    _, ans_bank = jax.lax.scan(enc_step, h0, ans_emb)
    enc_final = memory_bank[src_lengths - 1, jnp.arange(B)]
    ans_final = ans_bank[ans_lengths - 1, jnp.arange(B)]
    mem = jnp.transpose(memory_bank, (1, 0, 2))
    mask = jnp.where(jnp.arange(SRC_LEN)[None, :] < src_lengths[:, None],
                     0.0, NEG_INF).astype(jnp.float32)

    def dec_step(h, x):
        h = jnp.tanh(x @ params["dec_w_ih"] + h @ params["dec_w_hh"] + params["dec_b"])
        q = h + ans_final
        scores = jnp.sum(q[:, None, :] * mem, axis=-1) + mask
        scores = scores - jnp.max(scores, axis=-1, keepdims=True)
        e = jnp.exp(scores)
        attn = e / jnp.sum(e, axis=-1, keepdims=True)
        ctx = jnp.sum(attn[:, :, None] * mem, axis=1)
        out = jnp.tanh(ctx @ params["w_c_ctx"] + h @ params["w_c_h"])
        return h, (out, attn)

    h_final, (outs, attns) = jax.lax.scan(dec_step, enc_final, tgt_emb)
    return outs, attns, h_final


# ---------------------------------- main ------------------------------------
if __name__ == "__main__":
    # deterministic parameters
    pkey = jax.random.PRNGKey(42)
    keys = jax.random.split(pkey, 10)
    params = {
        "emb_src":  0.1 * jax.random.normal(keys[0], (V, E), jnp.float32),
        "emb_tgt":  0.1 * jax.random.normal(keys[1], (V, E), jnp.float32),
        "enc_w_ih": 0.1 * jax.random.normal(keys[2], (E, H), jnp.float32),
        "enc_w_hh": 0.1 * jax.random.normal(keys[3], (H, H), jnp.float32),
        "enc_b":    0.1 * jax.random.normal(keys[4], (1, H), jnp.float32),
        "dec_w_ih": 0.1 * jax.random.normal(keys[5], (E, H), jnp.float32),
        "dec_w_hh": 0.1 * jax.random.normal(keys[6], (H, H), jnp.float32),
        "dec_b":    0.1 * jax.random.normal(keys[7], (1, H), jnp.float32),
        "w_c_ctx":  0.1 * jax.random.normal(keys[8], (H, H), jnp.float32),
        "w_c_h":    0.1 * jax.random.normal(keys[9], (H, H), jnp.float32),
    }

    # deterministic inputs (time-major token ids)
    ikey = jax.random.PRNGKey(0)
    k1, k2, k3 = jax.random.split(ikey, 3)
    src = jax.random.randint(k1, (SRC_LEN, B), 0, V)
    ans = jax.random.randint(k2, (ANS_LEN, B), 0, V)
    tgt = jax.random.randint(k3, (TGT_LEN, B), 0, V)
    src_lengths = jnp.array([SRC_LEN, SRC_LEN - 2], dtype=jnp.int32)
    ans_lengths = jnp.array([ANS_LEN, ANS_LEN - 1], dtype=jnp.int32)

    fwd = jax.jit(query_model_forward)
    dec_out, attns, dec_state = fwd(params, src, src_lengths, ans, ans_lengths, tgt)
    jax.block_until_ready((dec_out, attns, dec_state))

    ref_out, ref_attns, ref_state = reference_forward(
        params, src, src_lengths, ans, ans_lengths, tgt)

    assert dec_out.shape == (TGT_LEN - 1, B, H)
    assert attns.shape == (TGT_LEN - 1, B, SRC_LEN)
    assert dec_state.shape == (B, H)
    assert jnp.allclose(dec_out, ref_out, atol=2e-4, rtol=2e-4)
    assert jnp.allclose(attns, ref_attns, atol=2e-4, rtol=2e-4)
    assert jnp.allclose(dec_state, ref_state, atol=2e-4, rtol=2e-4)

    print("KERNEL_OK")
</pallas_src>

<mosaic_0001>
module attributes {stable_mosaic.version = 11 : i64} {
  func.func @_fused_forward_kernel(%arg0: memref<32x32xf32, #tpu.memory_space<vmem>>, %arg1: memref<16x32xf32, #tpu.memory_space<vmem>>, %arg2: memref<2x1xi32, #tpu.memory_space<vmem>>, %arg3: memref<2x1xi32, #tpu.memory_space<vmem>>, %arg4: memref<32x128xf32, #tpu.memory_space<vmem>>, %arg5: memref<128x128xf32, #tpu.memory_space<vmem>>, %arg6: memref<1x128xf32, #tpu.memory_space<vmem>>, %arg7: memref<32x128xf32, #tpu.memory_space<vmem>>, %arg8: memref<128x128xf32, #tpu.memory_space<vmem>>, %arg9: memref<1x128xf32, #tpu.memory_space<vmem>>, %arg10: memref<128x128xf32, #tpu.memory_space<vmem>>, %arg11: memref<128x128xf32, #tpu.memory_space<vmem>>, %arg12: memref<16x128xf32, #tpu.memory_space<vmem>>, %arg13: memref<16x8xf32, #tpu.memory_space<vmem>>, %arg14: memref<2x128xf32, #tpu.memory_space<vmem>>) attributes {dimension_semantics = [], scalar_prefetch = 0 : i64, scratch_operands = 0 : i64, tpu.core_type = #tpu.core_type<tc>} {
    %c0 = arith.constant 0 : index
    %c0_0 = arith.constant 0 : index
    %0 = vector.load %arg0[%c0, %c0_0] : memref<32x32xf32, #tpu.memory_space<vmem>>, vector<32x32xf32>
    %c0_1 = arith.constant 0 : index
    %c0_2 = arith.constant 0 : index
    %1 = vector.load %arg4[%c0_1, %c0_2] : memref<32x128xf32, #tpu.memory_space<vmem>>, vector<32x128xf32>
    %cst = arith.constant dense<0.000000e+00> : vector<32x128xf32>
    %2 = tpu.matmul %0, %1, %cst {dimension_numbers = #tpu.dot_dimension_numbers<[1], [0], [0], [1], [0, 0, 1, 1], [], []>} : vector<32x32xf32>, vector<32x128xf32>, vector<32x128xf32> -> vector<32x128xf32>
    %c0_3 = arith.constant 0 : index
    %c0_4 = arith.constant 0 : index
    %3 = vector.load %arg6[%c0_3, %c0_4] : memref<1x128xf32, #tpu.memory_space<vmem>>, vector<1x128xf32>
    %4 = vector.broadcast %3 : vector<1x128xf32> to vector<32x128xf32>
    %5 = arith.addf %2, %4 : vector<32x128xf32>
    %c0_5 = arith.constant 0 : index
    %c0_6 = arith.constant 0 : index
    %6 = vector.load %arg5[%c0_5, %c0_6] : memref<128x128xf32, #tpu.memory_space<vmem>>, vector<128x128xf32>
    %cst_7 = arith.constant 0.000000e+00 : f32
    %7 = vector.broadcast %cst_7 : f32 to vector<4x128xf32>
    %8 = vector.extract_strided_slice %5 {offsets = [0, 0], sizes = [4, 128], strides = [1, 1]} : vector<32x128xf32> to vector<4x128xf32>
    %cst_8 = arith.constant dense<0.000000e+00> : vector<4x128xf32>
    %9 = tpu.matmul %7, %6, %cst_8 {dimension_numbers = #tpu.dot_dimension_numbers<[1], [0], [0], [1], [0, 0, 1, 1], [], []>} : vector<4x128xf32>, vector<128x128xf32>, vector<4x128xf32> -> vector<4x128xf32>
    %10 = arith.addf %8, %9 : vector<4x128xf32>
    %11 = math.tanh %10 : vector<4x128xf32>
    %12 = vector.extract_strided_slice %11 {offsets = [0, 0], sizes = [2, 128], strides = [1, 1]} : vector<4x128xf32> to vector<2x128xf32>
    %13 = vector.extract_strided_slice %11 {offsets = [2, 0], sizes = [2, 128], strides = [1, 1]} : vector<4x128xf32> to vector<2x128xf32>
    %14 = vector.extract_strided_slice %5 {offsets = [4, 0], sizes = [4, 128], strides = [1, 1]} : vector<32x128xf32> to vector<4x128xf32>
    %cst_9 = arith.constant dense<0.000000e+00> : vector<4x128xf32>
    %15 = tpu.matmul %11, %6, %cst_9 {dimension_numbers = #tpu.dot_dimension_numbers<[1], [0], [0], [1], [0, 0, 1, 1], [], []>} : vector<4x128xf32>, vector<128x128xf32>, vector<4x128xf32> -> vector<4x128xf32>
    %16 = arith.addf %14, %15 : vector<4x128xf32>
    %17 = math.tanh %16 : vector<4x128xf32>
    %18 = vector.extract_strided_slice %17 {offsets = [0, 0], sizes = [2, 128], strides = [1, 1]} : vector<4x128xf32> to vector<2x128xf32>
    %19 = vector.extract_strided_slice %17 {offsets = [2, 0], sizes = [2, 128], strides = [1, 1]} : vector<4x128xf32> to vector<2x128xf32>
    %20 = vector.extract_strided_slice %5 {offsets = [8, 0], sizes = [4, 128], strides = [1, 1]} : vector<32x128xf32> to vector<4x128xf32>
    %cst_10 = arith.constant dense<0.000000e+00> : vector<4x128xf32>
    %21 = tpu.matmul %17, %6, %cst_10 {dimension_numbers = #tpu.dot_dimension_numbers<[1], [0], [0], [1], [0, 0, 1, 1], [], []>} : vector<4x128xf32>, vector<128x128xf32>, vector<4x128xf32> -> vector<4x128xf32>
    %22 = arith.addf %20, %21 : vector<4x128xf32>
    %23 = math.tanh %22 : vector<4x128xf32>
    %24 = vector.extract_strided_slice %23 {offsets = [0, 0], sizes = [2, 128], strides = [1, 1]} : vector<4x128xf32> to vector<2x128xf32>
    %25 = vector.extract_strided_slice %23 {offsets = [2, 0], sizes = [2, 128], strides = [1, 1]} : vector<4x128xf32> to vector<2x128xf32>
    %26 = vector.extract_strided_slice %5 {offsets = [12, 0], sizes = [4, 128], strides = [1, 1]} : vector<32x128xf32> to vector<4x128xf32>
    %cst_11 = arith.constant dense<0.000000e+00> : vector<4x128xf32>
    %27 = tpu.matmul %23, %6, %cst_11 {dimension_numbers = #tpu.dot_dimension_numbers<[1], [0], [0], [1], [0, 0, 1, 1], [], []>} : vector<4x128xf32>, vector<128x128xf32>, vector<4x128xf32> -> vector<4x128xf32>
    %28 = arith.addf %26, %27 : vector<4x128xf32>
    %29 = math.tanh %28 : vector<4x128xf32>
    %30 = vector.extract_strided_slice %29 {offsets = [0, 0], sizes = [2, 128], strides = [1, 1]} : vector<4x128xf32> to vector<2x128xf32>
    %31 = vector.extract_strided_slice %29 {offsets = [2, 0], sizes = [2, 128], strides = [1, 1]} : vector<4x128xf32> to vector<2x128xf32>
    %32 = vector.extract_strided_slice %5 {offsets = [16, 0], sizes = [4, 128], strides = [1, 1]} : vector<32x128xf32> to vector<4x128xf32>
    %cst_12 = arith.constant dense<0.000000e+00> : vector<4x128xf32>
    %33 = tpu.matmul %29, %6, %cst_12 {dimension_numbers = #tpu.dot_dimension_numbers<[1], [0], [0], [1], [0, 0, 1, 1], [], []>} : vector<4x128xf32>, vector<128x128xf32>, vector<4x128xf32> -> vector<4x128xf32>
    %34 = arith.addf %32, %33 : vector<4x128xf32>
    %35 = math.tanh %34 : vector<4x128xf32>
    %36 = vector.extract_strided_slice %35 {offsets = [0, 0], sizes = [2, 128], strides = [1, 1]} : vector<4x128xf32> to vector<2x128xf32>
    %37 = vector.extract_strided_slice %35 {offsets = [2, 0], sizes = [2, 128], strides = [1, 1]} : vector<4x128xf32> to vector<2x128xf32>
    %38 = vector.extract_strided_slice %5 {offsets = [20, 0], sizes = [4, 128], strides = [1, 1]} : vector<32x128xf32> to vector<4x128xf32>
    %cst_13 = arith.constant dense<0.000000e+00> : vector<4x128xf32>
    %39 = tpu.matmul %35, %6, %cst_13 {dimension_numbers = #tpu.dot_dimension_numbers<[1], [0], [0], [1], [0, 0, 1, 1], [], []>} : vector<4x128xf32>, vector<128x128xf32>, vector<4x128xf32> -> vector<4x128xf32>
    %40 = arith.addf %38, %39 : vector<4x128xf32>
    %41 = math.tanh %40 : vector<4x128xf32>
    %42 = vector.extract_strided_slice %41 {offsets = [0, 0], sizes = [2, 128], strides = [1, 1]} : vector<4x128xf32> to vector<2x128xf32>
    %43 = vector.extract_strided_slice %41 {offsets = [2, 0], sizes = [2, 128], strides = [1, 1]} : vector<4x128xf32> to vector<2x128xf32>
    %44 = vector.extract_strided_slice %5 {offsets = [24, 0], sizes = [4, 128], strides = [1, 1]} : vector<32x128xf32> to vector<4x128xf32>
    %cst_14 = arith.constant dense<0.000000e+00> : vector<4x128xf32>
    %45 = tpu.matmul %41, %6, %cst_14 {dimension_numbers = #tpu.dot_dimension_numbers<[1], [0], [0], [1], [0, 0, 1, 1], [], []>} : vector<4x128xf32>, vector<128x128xf32>, vector<4x128xf32> -> vector<4x128xf32>
    %46 = arith.addf %44, %45 : vector<4x128xf32>
    %47 = math.tanh %46 : vector<4x128xf32>
    %48 = vector.extract_strided_slice %47 {offsets = [0, 0], sizes = [2, 128], strides = [1, 1]} : vector<4x128xf32> to vector<2x128xf32>
    %49 = vector.extract_strided_slice %47 {offsets = [2, 0], sizes = [2, 128], strides = [1, 1]} : vector<4x128xf32> to vector<2x128xf32>
    %50 = vector.extract_strided_slice %5 {offsets = [28, 0], sizes = [4, 128], strides = [1, 1]} : vector<32x128xf32> to vector<4x128xf32>
    %cst_15 = arith.constant dense<0.000000e+00> : vector<4x128xf32>
    %51 = tpu.matmul %47, %6, %cst_15 {dimension_numbers = #tpu.dot_dimension_numbers<[1], [0], [0], [1], [0, 0, 1, 1], [], []>} : vector<4x128xf32>, vector<128x128xf32>, vector<4x128xf32> -> vector<4x128xf32>
    %52 = arith.addf %50, %51 : vector<4x128xf32>
    %53 = math.tanh %52 : vector<4x128xf32>
    %54 = vector.extract_strided_slice %53 {offsets = [0, 0], sizes = [2, 128], strides = [1, 1]} : vector<4x128xf32> to vector<2x128xf32>
    %55 = vector.extract_strided_slice %53 {offsets = [2, 0], sizes = [2, 128], strides = [1, 1]} : vector<4x128xf32> to vector<2x128xf32>
    %56 = vector.shape_cast %12 : vector<2x128xf32> to vector<2x1x128xf32>
    %57 = vector.shape_cast %18 : vector<2x128xf32> to vector<2x1x128xf32>
    %58 = vector.shape_cast %24 : vector<2x128xf32> to vector<2x1x128xf32>
    %59 = vector.shape_cast %30 : vector<2x128xf32> to vector<2x1x128xf32>
    %60 = vector.shape_cast %36 : vector<2x128xf32> to vector<2x1x128xf32>
    %61 = vector.shape_cast %42 : vector<2x128xf32> to vector<2x1x128xf32>
    %62 = vector.shape_cast %48 : vector<2x128xf32> to vector<2x1x128xf32>
    %63 = vector.shape_cast %54 : vector<2x128xf32> to vector<2x1x128xf32>
    %64 = tpu.concatenate %56, %57, %58, %59, %60, %61, %62, %63 in 1 : vector<2x1x128xf32>, vector<2x1x128xf32>, vector<2x1x128xf32>, vector<2x1x128xf32>, vector<2x1x128xf32>, vector<2x1x128xf32>, vector<2x1x128xf32>, vector<2x1x128xf32> -> vector<2x8x128xf32>
    %65 = vector.shape_cast %13 : vector<2x128xf32> to vector<2x1x128xf32>
    %66 = vector.shape_cast %19 : vector<2x128xf32> to vector<2x1x128xf32>
    %67 = vector.shape_cast %25 : vector<2x128xf32> to vector<2x1x128xf32>
    %68 = vector.shape_cast %31 : vector<2x128xf32> to vector<2x1x128xf32>
    %69 = vector.shape_cast %37 : vector<2x128xf32> to vector<2x1x128xf32>
    %70 = vector.shape_cast %43 : vector<2x128xf32> to vector<2x1x128xf32>
    %71 = vector.shape_cast %49 : vector<2x128xf32> to vector<2x1x128xf32>
    %72 = vector.shape_cast %55 : vector<2x128xf32> to vector<2x1x128xf32>
    %73 = tpu.concatenate %65, %66, %67, %68, %69, %70, %71, %72 in 1 : vector<2x1x128xf32>, vector<2x1x128xf32>, vector<2x1x128xf32>, vector<2x1x128xf32>, vector<2x1x128xf32>, vector<2x1x128xf32>, vector<2x1x128xf32>, vector<2x1x128xf32> -> vector<2x8x128xf32>
    %74 = tpu.iota {dimensions = array<i32: 1>} : vector<2x8xi32>
    %c0_16 = arith.constant 0 : index
    %c0_17 = arith.constant 0 : index
    %75 = vector.load %arg2[%c0_16, %c0_17] : memref<2x1xi32, #tpu.memory_space<vmem>>, vector<2x1xi32>
    %c0_18 = arith.constant 0 : index
    %c0_19 = arith.constant 0 : index
    %76 = vector.load %arg3[%c0_18, %c0_19] : memref<2x1xi32, #tpu.memory_space<vmem>>, vector<2x1xi32>
    %c1_i32 = arith.constant 1 : i32
    %77 = vector.broadcast %c1_i32 : i32 to vector<2x1xi32>
    %78 = arith.subi %75, %77 : vector<2x1xi32>
    %79 = vector.broadcast %78 : vector<2x1xi32> to vector<2x8xi32>
    %80 = arith.cmpi eq, %74, %79 : vector<2x8xi32>
    %81 = arith.extui %80 : vector<2x8xi1> to vector<2x8xi32>
    %82 = arith.sitofp %81 : vector<2x8xi32> to vector<2x8xf32>
    %c1_i32_20 = arith.constant 1 : i32
    %83 = vector.broadcast %c1_i32_20 : i32 to vector<2x1xi32>
    %84 = arith.subi %76, %83 : vector<2x1xi32>
    %85 = vector.broadcast %84 : vector<2x1xi32> to vector<2x8xi32>
    %86 = arith.cmpi eq, %74, %85 : vector<2x8xi32>
    %87 = arith.extui %86 : vector<2x8xi1> to vector<2x8xi32>
    %88 = arith.sitofp %87 : vector<2x8xi32> to vector<2x8xf32>
    %89 = vector.shape_cast %82 : vector<2x8xf32> to vector<2x8x1xf32>
    %90 = vector.broadcast %89 : vector<2x8x1xf32> to vector<2x8x128xf32>
    %91 = arith.mulf %90, %64 : vector<2x8x128xf32>
    %cst_21 = arith.constant dense<0.000000e+00> : vector<2x128xf32>
    %92 = vector.multi_reduction <add>, %91, %cst_21 [1] : vector<2x8x128xf32> to vector<2x128xf32>
    %93 = vector.shape_cast %88 : vector<2x8xf32> to vector<2x8x1xf32>
    %94 = vector.broadcast %93 : vector<2x8x1xf32> to vector<2x8x128xf32>
    %95 = arith.mulf %94, %73 : vector<2x8x128xf32>
    %cst_22 = arith.constant dense<0.000000e+00> : vector<2x128xf32>
    %96 = vector.multi_reduction <add>, %95, %cst_22 [1] : vector<2x8x128xf32> to vector<2x128xf32>
    %97 = vector.broadcast %75 : vector<2x1xi32> to vector<2x8xi32>
    %98 = arith.cmpi slt, %74, %97 : vector<2x8xi32>
    %cst_23 = arith.constant 0.000000e+00 : f32
    %cst_24 = arith.constant -1.000000e+09 : f32
    %99 = vector.broadcast %cst_23 : f32 to vector<2x8xf32>
    %100 = vector.broadcast %cst_24 : f32 to vector<2x8xf32>
    %101 = arith.select %98, %99, %100 : vector<2x8xi1>, vector<2x8xf32>
    %c0_25 = arith.constant 0 : index
    %c0_26 = arith.constant 0 : index
    %102 = vector.load %arg1[%c0_25, %c0_26] : memref<16x32xf32, #tpu.memory_space<vmem>>, vector<16x32xf32>
    %c0_27 = arith.constant 0 : index
    %c0_28 = arith.constant 0 : index
    %103 = vector.load %arg7[%c0_27, %c0_28] : memref<32x128xf32, #tpu.memory_space<vmem>>, vector<32x128xf32>
    %cst_29 = arith.constant dense<0.000000e+00> : vector<16x128xf32>
    %104 = tpu.matmul %102, %103, %cst_29 {dimension_numbers = #tpu.dot_dimension_numbers<[1], [0], [0], [1], [0, 0, 1, 1], [], []>} : vector<16x32xf32>, vector<32x128xf32>, vector<16x128xf32> -> vector<16x128xf32>
    %c0_30 = arith.constant 0 : index
    %c0_31 = arith.constant 0 : index
    %105 = vector.load %arg9[%c0_30, %c0_31] : memref<1x128xf32, #tpu.memory_space<vmem>>, vector<1x128xf32>
    %106 = vector.broadcast %105 : vector<1x128xf32> to vector<16x128xf32>
    %107 = arith.addf %104, %106 : vector<16x128xf32>
    %c0_32 = arith.constant 0 : index
    %c0_33 = arith.constant 0 : index
    %108 = vector.load %arg8[%c0_32, %c0_33] : memref<128x128xf32, #tpu.memory_space<vmem>>, vector<128x128xf32>
    %109 = vector.extract_strided_slice %107 {offsets = [0, 0], sizes = [2, 128], strides = [1, 1]} : vector<16x128xf32> to vector<2x128xf32>
    %cst_34 = arith.constant dense<0.000000e+00> : vector<2x128xf32>
    %110 = tpu.matmul %92, %108, %cst_34 {dimension_numbers = #tpu.dot_dimension_numbers<[1], [0], [0], [1], [0, 0, 1, 1], [], []>} : vector<2x128xf32>, vector<128x128xf32>, vector<2x128xf32> -> vector<2x128xf32>
    %111 = arith.addf %109, %110 : vector<2x128xf32>
    %112 = math.tanh %111 : vector<2x128xf32>
    %113 = arith.addf %112, %96 : vector<2x128xf32>
    %114 = vector.shape_cast %113 : vector<2x128xf32> to vector<2x1x128xf32>
    "tpu.trace_start"() <{level = 10 : i32, message = "bqh,bsh->bqs"}> : () -> ()
    %cst_35 = arith.constant dense<0.000000e+00> : vector<2x1x8xf32>
    %115 = tpu.matmul %114, %64, %cst_35 {dimension_numbers = #tpu.dot_dimension_numbers<[2], [2], [1], [1], [0, 0, 0, 1, 1, 1], [0], [0]>, precision = #tpu.contract_precision<fp32>} : vector<2x1x128xf32>, vector<2x8x128xf32>, vector<2x1x8xf32> -> vector<2x1x8xf32>
    "tpu.trace_stop"() : () -> ()
    %116 = vector.shape_cast %115 : vector<2x1x8xf32> to vector<2x8xf32>
    %117 = arith.addf %116, %101 : vector<2x8xf32>
    %cst_36 = arith.constant dense<0xFF800000> : vector<2xf32>
    %118 = vector.multi_reduction <maximumf>, %117, %cst_36 [1] : vector<2x8xf32> to vector<2xf32>
    %119 = vector.shape_cast %118 : vector<2xf32> to vector<2x1xf32>
    %120 = vector.broadcast %119 : vector<2x1xf32> to vector<2x8xf32>
    %121 = arith.subf %117, %120 : vector<2x8xf32>
    %122 = math.exp %121 : vector<2x8xf32>
    %cst_37 = arith.constant dense<0.000000e+00> : vector<2xf32>
    %123 = vector.multi_reduction <add>, %122, %cst_37 [1] : vector<2x8xf32> to vector<2xf32>
    %124 = vector.shape_cast %123 : vector<2xf32> to vector<2x1xf32>
    %125 = vector.broadcast %124 : vector<2x1xf32> to vector<2x8xf32>
    %126 = arith.divf %122, %125 : vector<2x8xf32>
    %127 = vector.shape_cast %126 : vector<2x8xf32> to vector<2x1x8xf32>
    "tpu.trace_start"() <{level = 10 : i32, message = "bqs,bsh->bqh"}> : () -> ()
    %cst_38 = arith.constant dense<0.000000e+00> : vector<2x1x128xf32>
    %128 = tpu.matmul %127, %64, %cst_38 {dimension_numbers = #tpu.dot_dimension_numbers<[2], [1], [1], [2], [0, 0, 0, 1, 1, 2], [0], [0]>, precision = #tpu.contract_precision<fp32>} : vector<2x1x8xf32>, vector<2x8x128xf32>, vector<2x1x128xf32> -> vector<2x1x128xf32>
    "tpu.trace_stop"() : () -> ()
    %129 = vector.shape_cast %128 : vector<2x1x128xf32> to vector<2x128xf32>
    %130 = vector.extract_strided_slice %107 {offsets = [2, 0], sizes = [2, 128], strides = [1, 1]} : vector<16x128xf32> to vector<2x128xf32>
    %cst_39 = arith.constant dense<0.000000e+00> : vector<2x128xf32>
    %131 = tpu.matmul %112, %108, %cst_39 {dimension_numbers = #tpu.dot_dimension_numbers<[1], [0], [0], [1], [0, 0, 1, 1], [], []>} : vector<2x128xf32>, vector<128x128xf32>, vector<2x128xf32> -> vector<2x128xf32>
    %132 = arith.addf %130, %131 : vector<2x128xf32>
    %133 = math.tanh %132 : vector<2x128xf32>
    %134 = arith.addf %133, %96 : vector<2x128xf32>
    %135 = vector.shape_cast %134 : vector<2x128xf32> to vector<2x1x128xf32>
    "tpu.trace_start"() <{level = 10 : i32, message = "bqh,bsh->bqs"}> : () -> ()
    %cst_40 = arith.constant dense<0.000000e+00> : vector<2x1x8xf32>
    %136 = tpu.matmul %135, %64, %cst_40 {dimension_numbers = #tpu.dot_dimension_numbers<[2], [2], [1], [1], [0, 0, 0, 1, 1, 1], [0], [0]>, precision = #tpu.contract_precision<fp32>} : vector<2x1x128xf32>, vector<2x8x128xf32>, vector<2x1x8xf32> -> vector<2x1x8xf32>
    "tpu.trace_stop"() : () -> ()
    %137 = vector.shape_cast %136 : vector<2x1x8xf32> to vector<2x8xf32>
    %138 = arith.addf %137, %101 : vector<2x8xf32>
    %cst_41 = arith.constant dense<0xFF800000> : vector<2xf32>
    %139 = vector.multi_reduction <maximumf>, %138, %cst_41 [1] : vector<2x8xf32> to vector<2xf32>
    %140 = vector.shape_cast %139 : vector<2xf32> to vector<2x1xf32>
    %141 = vector.broadcast %140 : vector<2x1xf32> to vector<2x8xf32>
    %142 = arith.subf %138, %141 : vector<2x8xf32>
    %143 = math.exp %142 : vector<2x8xf32>
    %cst_42 = arith.constant dense<0.000000e+00> : vector<2xf32>
    %144 = vector.multi_reduction <add>, %143, %cst_42 [1] : vector<2x8xf32> to vector<2xf32>
    %145 = vector.shape_cast %144 : vector<2xf32> to vector<2x1xf32>
    %146 = vector.broadcast %145 : vector<2x1xf32> to vector<2x8xf32>
    %147 = arith.divf %143, %146 : vector<2x8xf32>
    %148 = vector.shape_cast %147 : vector<2x8xf32> to vector<2x1x8xf32>
    "tpu.trace_start"() <{level = 10 : i32, message = "bqs,bsh->bqh"}> : () -> ()
    %cst_43 = arith.constant dense<0.000000e+00> : vector<2x1x128xf32>
    %149 = tpu.matmul %148, %64, %cst_43 {dimension_numbers = #tpu.dot_dimension_numbers<[2], [1], [1], [2], [0, 0, 0, 1, 1, 2], [0], [0]>, precision = #tpu.contract_precision<fp32>} : vector<2x1x8xf32>, vector<2x8x128xf32>, vector<2x1x128xf32> -> vector<2x1x128xf32>
    "tpu.trace_stop"() : () -> ()
    %150 = vector.shape_cast %149 : vector<2x1x128xf32> to vector<2x128xf32>
    %151 = vector.extract_strided_slice %107 {offsets = [4, 0], sizes = [2, 128], strides = [1, 1]} : vector<16x128xf32> to vector<2x128xf32>
    %cst_44 = arith.constant dense<0.000000e+00> : vector<2x128xf32>
    %152 = tpu.matmul %133, %108, %cst_44 {dimension_numbers = #tpu.dot_dimension_numbers<[1], [0], [0], [1], [0, 0, 1, 1], [], []>} : vector<2x128xf32>, vector<128x128xf32>, vector<2x128xf32> -> vector<2x128xf32>
    %153 = arith.addf %151, %152 : vector<2x128xf32>
    %154 = math.tanh %153 : vector<2x128xf32>
    %155 = arith.addf %154, %96 : vector<2x128xf32>
    %156 = vector.shape_cast %155 : vector<2x128xf32> to vector<2x1x128xf32>
    "tpu.trace_start"() <{level = 10 : i32, message = "bqh,bsh->bqs"}> : () -> ()
    %cst_45 = arith.constant dense<0.000000e+00> : vector<2x1x8xf32>
    %157 = tpu.matmul %156, %64, %cst_45 {dimension_numbers = #tpu.dot_dimension_numbers<[2], [2], [1], [1], [0, 0, 0, 1, 1, 1], [0], [0]>, precision = #tpu.contract_precision<fp32>} : vector<2x1x128xf32>, vector<2x8x128xf32>, vector<2x1x8xf32> -> vector<2x1x8xf32>
    "tpu.trace_stop"() : () -> ()
    %158 = vector.shape_cast %157 : vector<2x1x8xf32> to vector<2x8xf32>
    %159 = arith.addf %158, %101 : vector<2x8xf32>
    %cst_46 = arith.constant dense<0xFF800000> : vector<2xf32>
    %160 = vector.multi_reduction <maximumf>, %159, %cst_46 [1] : vector<2x8xf32> to vector<2xf32>
    %161 = vector.shape_cast %160 : vector<2xf32> to vector<2x1xf32>
    %162 = vector.broadcast %161 : vector<2x1xf32> to vector<2x8xf32>
    %163 = arith.subf %159, %162 : vector<2x8xf32>
    %164 = math.exp %163 : vector<2x8xf32>
    %cst_47 = arith.constant dense<0.000000e+00> : vector<2xf32>
    %165 = vector.multi_reduction <add>, %164, %cst_47 [1] : vector<2x8xf32> to vector<2xf32>
    %166 = vector.shape_cast %165 : vector<2xf32> to vector<2x1xf32>
    %167 = vector.broadcast %166 : vector<2x1xf32> to vector<2x8xf32>
    %168 = arith.divf %164, %167 : vector<2x8xf32>
    %169 = vector.shape_cast %168 : vector<2x8xf32> to vector<2x1x8xf32>
    "tpu.trace_start"() <{level = 10 : i32, message = "bqs,bsh->bqh"}> : () -> ()
    %cst_48 = arith.constant dense<0.000000e+00> : vector<2x1x128xf32>
    %170 = tpu.matmul %169, %64, %cst_48 {dimension_numbers = #tpu.dot_dimension_numbers<[2], [1], [1], [2], [0, 0, 0, 1, 1, 2], [0], [0]>, precision = #tpu.contract_precision<fp32>} : vector<2x1x8xf32>, vector<2x8x128xf32>, vector<2x1x128xf32> -> vector<2x1x128xf32>
    "tpu.trace_stop"() : () -> ()
    %171 = vector.shape_cast %170 : vector<2x1x128xf32> to vector<2x128xf32>
    %172 = vector.extract_strided_slice %107 {offsets = [6, 0], sizes = [2, 128], strides = [1, 1]} : vector<16x128xf32> to vector<2x128xf32>
    %cst_49 = arith.constant dense<0.000000e+00> : vector<2x128xf32>
    %173 = tpu.matmul %154, %108, %cst_49 {dimension_numbers = #tpu.dot_dimension_numbers<[1], [0], [0], [1], [0, 0, 1, 1], [], []>} : vector<2x128xf32>, vector<128x128xf32>, vector<2x128xf32> -> vector<2x128xf32>
    %174 = arith.addf %172, %173 : vector<2x128xf32>
    %175 = math.tanh %174 : vector<2x128xf32>
    %176 = arith.addf %175, %96 : vector<2x128xf32>
    %177 = vector.shape_cast %176 : vector<2x128xf32> to vector<2x1x128xf32>
    "tpu.trace_start"() <{level = 10 : i32, message = "bqh,bsh->bqs"}> : () -> ()
    %cst_50 = arith.constant dense<0.000000e+00> : vector<2x1x8xf32>
    %178 = tpu.matmul %177, %64, %cst_50 {dimension_numbers = #tpu.dot_dimension_numbers<[2], [2], [1], [1], [0, 0, 0, 1, 1, 1], [0], [0]>, precision = #tpu.contract_precision<fp32>} : vector<2x1x128xf32>, vector<2x8x128xf32>, vector<2x1x8xf32> -> vector<2x1x8xf32>
    "tpu.trace_stop"() : () -> ()
    %179 = vector.shape_cast %178 : vector<2x1x8xf32> to vector<2x8xf32>
    %180 = arith.addf %179, %101 : vector<2x8xf32>
    %cst_51 = arith.constant dense<0xFF800000> : vector<2xf32>
    %181 = vector.multi_reduction <maximumf>, %180, %cst_51 [1] : vector<2x8xf32> to vector<2xf32>
    %182 = vector.shape_cast %181 : vector<2xf32> to vector<2x1xf32>
    %183 = vector.broadcast %182 : vector<2x1xf32> to vector<2x8xf32>
    %184 = arith.subf %180, %183 : vector<2x8xf32>
    %185 = math.exp %184 : vector<2x8xf32>
    %cst_52 = arith.constant dense<0.000000e+00> : vector<2xf32>
    %186 = vector.multi_reduction <add>, %185, %cst_52 [1] : vector<2x8xf32> to vector<2xf32>
    %187 = vector.shape_cast %186 : vector<2xf32> to vector<2x1xf32>
    %188 = vector.broadcast %187 : vector<2x1xf32> to vector<2x8xf32>
    %189 = arith.divf %185, %188 : vector<2x8xf32>
    %190 = vector.shape_cast %189 : vector<2x8xf32> to vector<2x1x8xf32>
    "tpu.trace_start"() <{level = 10 : i32, message = "bqs,bsh->bqh"}> : () -> ()
    %cst_53 = arith.constant dense<0.000000e+00> : vector<2x1x128xf32>
    %191 = tpu.matmul %190, %64, %cst_53 {dimension_numbers = #tpu.dot_dimension_numbers<[2], [1], [1], [2], [0, 0, 0, 1, 1, 2], [0], [0]>, precision = #tpu.contract_precision<fp32>} : vector<2x1x8xf32>, vector<2x8x128xf32>, vector<2x1x128xf32> -> vector<2x1x128xf32>
    "tpu.trace_stop"() : () -> ()
    %192 = vector.shape_cast %191 : vector<2x1x128xf32> to vector<2x128xf32>
    %193 = vector.extract_strided_slice %107 {offsets = [8, 0], sizes = [2, 128], strides = [1, 1]} : vector<16x128xf32> to vector<2x128xf32>
    %cst_54 = arith.constant dense<0.000000e+00> : vector<2x128xf32>
    %194 = tpu.matmul %175, %108, %cst_54 {dimension_numbers = #tpu.dot_dimension_numbers<[1], [0], [0], [1], [0, 0, 1, 1], [], []>} : vector<2x128xf32>, vector<128x128xf32>, vector<2x128xf32> -> vector<2x128xf32>
    %195 = arith.addf %193, %194 : vector<2x128xf32>
    %196 = math.tanh %195 : vector<2x128xf32>
    %197 = arith.addf %196, %96 : vector<2x128xf32>
    %198 = vector.shape_cast %197 : vector<2x128xf32> to vector<2x1x128xf32>
    "tpu.trace_start"() <{level = 10 : i32, message = "bqh,bsh->bqs"}> : () -> ()
    %cst_55 = arith.constant dense<0.000000e+00> : vector<2x1x8xf32>
    %199 = tpu.matmul %198, %64, %cst_55 {dimension_numbers = #tpu.dot_dimension_numbers<[2], [2], [1], [1], [0, 0, 0, 1, 1, 1], [0], [0]>, precision = #tpu.contract_precision<fp32>} : vector<2x1x128xf32>, vector<2x8x128xf32>, vector<2x1x8xf32> -> vector<2x1x8xf32>
    "tpu.trace_stop"() : () -> ()
    %200 = vector.shape_cast %199 : vector<2x1x8xf32> to vector<2x8xf32>
    %201 = arith.addf %200, %101 : vector<2x8xf32>
    %cst_56 = arith.constant dense<0xFF800000> : vector<2xf32>
    %202 = vector.multi_reduction <maximumf>, %201, %cst_56 [1] : vector<2x8xf32> to vector<2xf32>
    %203 = vector.shape_cast %202 : vector<2xf32> to vector<2x1xf32>
    %204 = vector.broadcast %203 : vector<2x1xf32> to vector<2x8xf32>
    %205 = arith.subf %201, %204 : vector<2x8xf32>
    %206 = math.exp %205 : vector<2x8xf32>
    %cst_57 = arith.constant dense<0.000000e+00> : vector<2xf32>
    %207 = vector.multi_reduction <add>, %206, %cst_57 [1] : vector<2x8xf32> to vector<2xf32>
    %208 = vector.shape_cast %207 : vector<2xf32> to vector<2x1xf32>
    %209 = vector.broadcast %208 : vector<2x1xf32> to vector<2x8xf32>
    %210 = arith.divf %206, %209 : vector<2x8xf32>
    %211 = vector.shape_cast %210 : vector<2x8xf32> to vector<2x1x8xf32>
    "tpu.trace_start"() <{level = 10 : i32, message = "bqs,bsh->bqh"}> : () -> ()
    %cst_58 = arith.constant dense<0.000000e+00> : vector<2x1x128xf32>
    %212 = tpu.matmul %211, %64, %cst_58 {dimension_numbers = #tpu.dot_dimension_numbers<[2], [1], [1], [2], [0, 0, 0, 1, 1, 2], [0], [0]>, precision = #tpu.contract_precision<fp32>} : vector<2x1x8xf32>, vector<2x8x128xf32>, vector<2x1x128xf32> -> vector<2x1x128xf32>
    "tpu.trace_stop"() : () -> ()
    %213 = vector.shape_cast %212 : vector<2x1x128xf32> to vector<2x128xf32>
    %214 = vector.extract_strided_slice %107 {offsets = [10, 0], sizes = [2, 128], strides = [1, 1]} : vector<16x128xf32> to vector<2x128xf32>
    %cst_59 = arith.constant dense<0.000000e+00> : vector<2x128xf32>
    %215 = tpu.matmul %196, %108, %cst_59 {dimension_numbers = #tpu.dot_dimension_numbers<[1], [0], [0], [1], [0, 0, 1, 1], [], []>} : vector<2x128xf32>, vector<128x128xf32>, vector<2x128xf32> -> vector<2x128xf32>
    %216 = arith.addf %214, %215 : vector<2x128xf32>
    %217 = math.tanh %216 : vector<2x128xf32>
    %218 = arith.addf %217, %96 : vector<2x128xf32>
    %219 = vector.shape_cast %218 : vector<2x128xf32> to vector<2x1x128xf32>
    "tpu.trace_start"() <{level = 10 : i32, message = "bqh,bsh->bqs"}> : () -> ()
    %cst_60 = arith.constant dense<0.000000e+00> : vector<2x1x8xf32>
    %220 = tpu.matmul %219, %64, %cst_60 {dimension_numbers = #tpu.dot_dimension_numbers<[2], [2], [1], [1], [0, 0, 0, 1, 1, 1], [0], [0]>, precision = #tpu.contract_precision<fp32>} : vector<2x1x128xf32>, vector<2x8x128xf32>, vector<2x1x8xf32> -> vector<2x1x8xf32>
    "tpu.trace_stop"() : () -> ()
    %221 = vector.shape_cast %220 : vector<2x1x8xf32> to vector<2x8xf32>
    %222 = arith.addf %221, %101 : vector<2x8xf32>
    %cst_61 = arith.constant dense<0xFF800000> : vector<2xf32>
    %223 = vector.multi_reduction <maximumf>, %222, %cst_61 [1] : vector<2x8xf32> to vector<2xf32>
    %224 = vector.shape_cast %223 : vector<2xf32> to vector<2x1xf32>
    %225 = vector.broadcast %224 : vector<2x1xf32> to vector<2x8xf32>
    %226 = arith.subf %222, %225 : vector<2x8xf32>
    %227 = math.exp %226 : vector<2x8xf32>
    %cst_62 = arith.constant dense<0.000000e+00> : vector<2xf32>
    %228 = vector.multi_reduction <add>, %227, %cst_62 [1] : vector<2x8xf32> to vector<2xf32>
    %229 = vector.shape_cast %228 : vector<2xf32> to vector<2x1xf32>
    %230 = vector.broadcast %229 : vector<2x1xf32> to vector<2x8xf32>
    %231 = arith.divf %227, %230 : vector<2x8xf32>
    %232 = vector.shape_cast %231 : vector<2x8xf32> to vector<2x1x8xf32>
    "tpu.trace_start"() <{level = 10 : i32, message = "bqs,bsh->bqh"}> : () -> ()
    %cst_63 = arith.constant dense<0.000000e+00> : vector<2x1x128xf32>
    %233 = tpu.matmul %232, %64, %cst_63 {dimension_numbers = #tpu.dot_dimension_numbers<[2], [1], [1], [2], [0, 0, 0, 1, 1, 2], [0], [0]>, precision = #tpu.contract_precision<fp32>} : vector<2x1x8xf32>, vector<2x8x128xf32>, vector<2x1x128xf32> -> vector<2x1x128xf32>
    "tpu.trace_stop"() : () -> ()
    %234 = vector.shape_cast %233 : vector<2x1x128xf32> to vector<2x128xf32>
    %235 = vector.extract_strided_slice %107 {offsets = [12, 0], sizes = [2, 128], strides = [1, 1]} : vector<16x128xf32> to vector<2x128xf32>
    %cst_64 = arith.constant dense<0.000000e+00> : vector<2x128xf32>
    %236 = tpu.matmul %217, %108, %cst_64 {dimension_numbers = #tpu.dot_dimension_numbers<[1], [0], [0], [1], [0, 0, 1, 1], [], []>} : vector<2x128xf32>, vector<128x128xf32>, vector<2x128xf32> -> vector<2x128xf32>
    %237 = arith.addf %235, %236 : vector<2x128xf32>
    %238 = math.tanh %237 : vector<2x128xf32>
    %239 = arith.addf %238, %96 : vector<2x128xf32>
    %240 = vector.shape_cast %239 : vector<2x128xf32> to vector<2x1x128xf32>
    "tpu.trace_start"() <{level = 10 : i32, message = "bqh,bsh->bqs"}> : () -> ()
    %cst_65 = arith.constant dense<0.000000e+00> : vector<2x1x8xf32>
    %241 = tpu.matmul %240, %64, %cst_65 {dimension_numbers = #tpu.dot_dimension_numbers<[2], [2], [1], [1], [0, 0, 0, 1, 1, 1], [0], [0]>, precision = #tpu.contract_precision<fp32>} : vector<2x1x128xf32>, vector<2x8x128xf32>, vector<2x1x8xf32> -> vector<2x1x8xf32>
    "tpu.trace_stop"() : () -> ()
    %242 = vector.shape_cast %241 : vector<2x1x8xf32> to vector<2x8xf32>
    %243 = arith.addf %242, %101 : vector<2x8xf32>
    %cst_66 = arith.constant dense<0xFF800000> : vector<2xf32>
    %244 = vector.multi_reduction <maximumf>, %243, %cst_66 [1] : vector<2x8xf32> to vector<2xf32>
    %245 = vector.shape_cast %244 : vector<2xf32> to vector<2x1xf32>
    %246 = vector.broadcast %245 : vector<2x1xf32> to vector<2x8xf32>
    %247 = arith.subf %243, %246 : vector<2x8xf32>
    %248 = math.exp %247 : vector<2x8xf32>
    %cst_67 = arith.constant dense<0.000000e+00> : vector<2xf32>
    %249 = vector.multi_reduction <add>, %248, %cst_67 [1] : vector<2x8xf32> to vector<2xf32>
    %250 = vector.shape_cast %249 : vector<2xf32> to vector<2x1xf32>
    %251 = vector.broadcast %250 : vector<2x1xf32> to vector<2x8xf32>
    %252 = arith.divf %248, %251 : vector<2x8xf32>
    %253 = vector.shape_cast %252 : vector<2x8xf32> to vector<2x1x8xf32>
    "tpu.trace_start"() <{level = 10 : i32, message = "bqs,bsh->bqh"}> : () -> ()
    %cst_68 = arith.constant dense<0.000000e+00> : vector<2x1x128xf32>
    %254 = tpu.matmul %253, %64, %cst_68 {dimension_numbers = #tpu.dot_dimension_numbers<[2], [1], [1], [2], [0, 0, 0, 1, 1, 2], [0], [0]>, precision = #tpu.contract_precision<fp32>} : vector<2x1x8xf32>, vector<2x8x128xf32>, vector<2x1x128xf32> -> vector<2x1x128xf32>
    "tpu.trace_stop"() : () -> ()
    %255 = vector.shape_cast %254 : vector<2x1x128xf32> to vector<2x128xf32>
    %256 = vector.extract_strided_slice %107 {offsets = [14, 0], sizes = [2, 128], strides = [1, 1]} : vector<16x128xf32> to vector<2x128xf32>
    %cst_69 = arith.constant dense<0.000000e+00> : vector<2x128xf32>
    %257 = tpu.matmul %238, %108, %cst_69 {dimension_numbers = #tpu.dot_dimension_numbers<[1], [0], [0], [1], [0, 0, 1, 1], [], []>} : vector<2x128xf32>, vector<128x128xf32>, vector<2x128xf32> -> vector<2x128xf32>
    %258 = arith.addf %256, %257 : vector<2x128xf32>
    %259 = math.tanh %258 : vector<2x128xf32>
    %260 = arith.addf %259, %96 : vector<2x128xf32>
    %261 = vector.shape_cast %260 : vector<2x128xf32> to vector<2x1x128xf32>
    "tpu.trace_start"() <{level = 10 : i32, message = "bqh,bsh->bqs"}> : () -> ()
    %cst_70 = arith.constant dense<0.000000e+00> : vector<2x1x8xf32>
    %262 = tpu.matmul %261, %64, %cst_70 {dimension_numbers = #tpu.dot_dimension_numbers<[2], [2], [1], [1], [0, 0, 0, 1, 1, 1], [0], [0]>, precision = #tpu.contract_precision<fp32>} : vector<2x1x128xf32>, vector<2x8x128xf32>, vector<2x1x8xf32> -> vector<2x1x8xf32>
    "tpu.trace_stop"() : () -> ()
    %263 = vector.shape_cast %262 : vector<2x1x8xf32> to vector<2x8xf32>
    %264 = arith.addf %263, %101 : vector<2x8xf32>
    %cst_71 = arith.constant dense<0xFF800000> : vector<2xf32>
    %265 = vector.multi_reduction <maximumf>, %264, %cst_71 [1] : vector<2x8xf32> to vector<2xf32>
    %266 = vector.shape_cast %265 : vector<2xf32> to vector<2x1xf32>
    %267 = vector.broadcast %266 : vector<2x1xf32> to vector<2x8xf32>
    %268 = arith.subf %264, %267 : vector<2x8xf32>
    %269 = math.exp %268 : vector<2x8xf32>
    %cst_72 = arith.constant dense<0.000000e+00> : vector<2xf32>
    %270 = vector.multi_reduction <add>, %269, %cst_72 [1] : vector<2x8xf32> to vector<2xf32>
    %271 = vector.shape_cast %270 : vector<2xf32> to vector<2x1xf32>
    %272 = vector.broadcast %271 : vector<2x1xf32> to vector<2x8xf32>
    %273 = arith.divf %269, %272 : vector<2x8xf32>
    %274 = vector.shape_cast %273 : vector<2x8xf32> to vector<2x1x8xf32>
    "tpu.trace_start"() <{level = 10 : i32, message = "bqs,bsh->bqh"}> : () -> ()
    %cst_73 = arith.constant dense<0.000000e+00> : vector<2x1x128xf32>
    %275 = tpu.matmul %274, %64, %cst_73 {dimension_numbers = #tpu.dot_dimension_numbers<[2], [1], [1], [2], [0, 0, 0, 1, 1, 2], [0], [0]>, precision = #tpu.contract_precision<fp32>} : vector<2x1x8xf32>, vector<2x8x128xf32>, vector<2x1x128xf32> -> vector<2x1x128xf32>
    "tpu.trace_stop"() : () -> ()
    %276 = vector.shape_cast %275 : vector<2x1x128xf32> to vector<2x128xf32>
    %277 = tpu.concatenate %112, %133, %154, %175, %196, %217, %238, %259 in 0 : vector<2x128xf32>, vector<2x128xf32>, vector<2x128xf32>, vector<2x128xf32>, vector<2x128xf32>, vector<2x128xf32>, vector<2x128xf32>, vector<2x128xf32> -> vector<16x128xf32>
    %278 = tpu.concatenate %129, %150, %171, %192, %213, %234, %255, %276 in 0 : vector<2x128xf32>, vector<2x128xf32>, vector<2x128xf32>, vector<2x128xf32>, vector<2x128xf32>, vector<2x128xf32>, vector<2x128xf32>, vector<2x128xf32> -> vector<16x128xf32>
    %c0_74 = arith.constant 0 : index
    %c0_75 = arith.constant 0 : index
    %279 = vector.load %arg10[%c0_74, %c0_75] : memref<128x128xf32, #tpu.memory_space<vmem>>, vector<128x128xf32>
    %cst_76 = arith.constant dense<0.000000e+00> : vector<16x128xf32>
    %280 = tpu.matmul %278, %279, %cst_76 {dimension_numbers = #tpu.dot_dimension_numbers<[1], [0], [0], [1], [0, 0, 1, 1], [], []>} : vector<16x128xf32>, vector<128x128xf32>, vector<16x128xf32> -> vector<16x128xf32>
    %c0_77 = arith.constant 0 : index
    %c0_78 = arith.constant 0 : index
    %281 = vector.load %arg11[%c0_77, %c0_78] : memref<128x128xf32, #tpu.memory_space<vmem>>, vector<128x128xf32>
    %cst_79 = arith.constant dense<0.000000e+00> : vector<16x128xf32>
    %282 = tpu.matmul %277, %281, %cst_79 {dimension_numbers = #tpu.dot_dimension_numbers<[1], [0], [0], [1], [0, 0, 1, 1], [], []>} : vector<16x128xf32>, vector<128x128xf32>, vector<16x128xf32> -> vector<16x128xf32>
    %283 = arith.addf %280, %282 : vector<16x128xf32>
    %284 = math.tanh %283 : vector<16x128xf32>
    %c0_80 = arith.constant 0 : index
    %c0_81 = arith.constant 0 : index
    %285 = vector.load %arg12[%c0_80, %c0_81] : memref<16x128xf32, #tpu.memory_space<vmem>>, vector<16x128xf32>
    tpu.vector_store %arg12[%c0_80, %c0_81], %284 {strides = array<i32>} : memref<16x128xf32, #tpu.memory_space<vmem>>, vector<16x128xf32>,
    %286 = tpu.concatenate %126, %147, %168, %189, %210, %231, %252, %273 in 0 : vector<2x8xf32>, vector<2x8xf32>, vector<2x8xf32>, vector<2x8xf32>, vector<2x8xf32>, vector<2x8xf32>, vector<2x8xf32>, vector<2x8xf32> -> vector<16x8xf32>
    %c0_82 = arith.constant 0 : index
    %c0_83 = arith.constant 0 : index
    %287 = vector.load %arg13[%c0_82, %c0_83] : memref<16x8xf32, #tpu.memory_space<vmem>>, vector<16x8xf32>
    tpu.vector_store %arg13[%c0_82, %c0_83], %286 {strides = array<i32>} : memref<16x8xf32, #tpu.memory_space<vmem>>, vector<16x8xf32>,
    %c0_84 = arith.constant 0 : index
    %c0_85 = arith.constant 0 : index
    %288 = vector.load %arg14[%c0_84, %c0_85] : memref<2x128xf32, #tpu.memory_space<vmem>>, vector<2x128xf32>
    tpu.vector_store %arg14[%c0_84, %c0_85], %259 {strides = array<i32>} : memref<2x128xf32, #tpu.memory_space<vmem>>, vector<2x128xf32>,
    return
  }
}

</mosaic_0001>

<bundles_post_ra>
// kernel: query_model_forward.1
= control target key start
LH: loop header
LB: loop body
LE: loop exit
PB: predicated region body
PF: predicated region fallthrough
CT: control target
= control target key end

     0   :  { %20 = vsyncpa [#allocation3], 0  ;;  %v20272_v3 = vmov 0.0|0.0   ;;  %vm20273_vm0 = vmmov 0   ;;  %v20274_v6 = vmov 0.0   ;;  %vm61_vm1 = vcmask 261120   ;;  %s22145_s0 = inlined_call_operand.vmem [shape: f32[32,32], index: 0, kind: input, shape index: {}]   ;;  %s22146_s1 = inlined_call_operand.vmem [shape: f32[16,32], index: 1, kind: input, shape index: {}]   ;;  %s22147_s2 = inlined_call_operand.vmem [shape: s32[2,1], index: 2, kind: input, shape index: {}]   ;;  %s22148_s3 = inlined_call_operand.vmem [shape: s32[2,1], index: 3, kind: input, shape index: {}]   ;;  %s22149_s4 = inlined_call_operand.vmem [shape: f32[32,128], index: 4, kind: input, shape index: {}]   ;;  %s22150_s5 = inlined_call_operand.vmem [shape: f32[128,128], index: 5, kind: input, shape index: {}]   ;;  %s22151_s6 = inlined_call_operand.vmem [shape: f32[1,128], index: 6, kind: input, shape index: {}]   ;;  %s22152_s7 = inlined_call_operand.vmem [shape: f32[32,128], index: 7, kind: input, shape index: {}]   ;;  %s22153_s8 = inlined_call_operand.vmem [shape: f32[128,128], index: 8, kind: input, shape index: {}]   ;;  %s22154_s9 = inlined_call_operand.vmem [shape: f32[1,128], index: 9, kind: input, shape index: {}]   ;;  %s22155_s10 = inlined_call_operand.vmem [shape: f32[128,128], index: 10, kind: input, shape index: {}]   ;;  %s22156_s11 = inlined_call_operand.vmem [shape: f32[128,128], index: 11, kind: input, shape index: {}]   ;;  %s22157_s12 = inlined_call_operand.hbm [shape: f32[16,128], index: 12, kind: output, shape index: {0}]   ;;  %s22158_s13 = inlined_call_operand.hbm [shape: f32[16,8], index: 13, kind: output, shape index: {1}]   ;;  %s22159_s14 = inlined_call_operand.hbm [shape: f32[2,128], index: 14, kind: output, shape index: {2}]  }
   0x1   :  { %v159_v0 = vld [vmem:[%s22150_s5] sm:$0xff]  ;;  %v160_v1 = vld [vmem:[%s22150_s5 + $0x8] sm:$0xff]  ;;  %v161_v2 = vld [vmem:[%s22150_s5 + $0x10] sm:$0xff]  ;;  %19471 = vmatprep.subr.bf16.mxu1 %v20272_v3  ;;  %17894 = vmatprep.mubr.msk.f32.mxu1 %vm20273_vm0, %v20274_v6 }
   0x2   :  { %v20368_v4 = vpack.c.bf16 %v160_v1, %v159_v0  ;;  %v162_v5 = vld [vmem:[%s22150_s5 + $0x18] sm:$0xff]  ;;  %v50_v8 = vld [vmem:[%s22149_s4] sm:$0xff]  ;;  %v51_v9 = vld [vmem:[%s22149_s4 + $0x8] sm:$0xff] }
   0x3   :  { %v20376_v7 = vpack.c.bf16 %v162_v5, %v161_v2  ;;  %v163_v10 = vld [vmem:[%s22150_s5 + $0x20] sm:$0xff]  ;;  %v164_v11 = vld [vmem:[%s22150_s5 + $0x28] sm:$0xff]  ;;  %v19463_v12 = vpack.c.bf16 %v51_v9, %v50_v8  ;;  %v52_v13 = vld [vmem:[%s22149_s4 + $0x10] sm:$0xff] }
   0x4   :  { %19473 = vmatpush3.bf16.msra.mxu1 %v20368_v4  ;;  %v53_v14 = vld [vmem:[%s22149_s4 + $0x18] sm:$0xff]  ;;  %v46_v16 = vld [vmem:[%s22145_s0] sm:$0xff]  ;;  %v20401_v17 = vpack.c.bf16 %v164_v11, %v163_v10 }
   0x5   :  { %19474 = vmatprep.subr.bf16.mxu1 %v20272_v3  ;;  %19464 = vmatprep.subr.bf16.mxu0 %v19463_v12  ;;  %v19467_v15 = vpack.c.bf16 %v53_v14, %v52_v13 }
   0x6   :  { %19466 = vmatpush3.bf16.msra.mxu0 %v19463_v12 }
   0x8   :  { %19476 = vmatpush3.bf16.msra.mxu1 %v20376_v7 }
   0x9   :  { %21 = vsyncpa [#allocation5], 0  ;;  %19477 = vmatprep.subr.bf16.mxu1 %v20272_v3  ;;  %v165_v18 = vld [vmem:[%s22150_s5 + $0x30] sm:$0xff]  ;;  %v166_v19 = vld [vmem:[%s22150_s5 + $0x38] sm:$0xff]  ;;  %19468 = vmatprep.subr.bf16.mxu0 %v19467_v15  ;;  %v20275_v45 = vmov 1966171168   ;;  %v776_v47 = vlaneseq }
   0xa   :  { %17856 = vmatprep.mubr.msk.f32.mxu0 %vm61_vm1, %v46_v16  ;;  %v20412_v20 = vpack.c.bf16 %v166_v19, %v165_v18  ;;  %19470 = vmatpush3.bf16.msra.mxu0 %v19467_v15  ;;  %v47_v21 = vld [vmem:[%s22145_s0 + $0x8] sm:$0xff]  ;;  %v167_v22 = vld [vmem:[%s22150_s5 + $0x40] sm:$0xff]  ;;  %v169_v25 = vld [vmem:[%s22150_s5 + $0x50] sm:$0xff]  ;;  %v774_v46 = vunpack.c.l.s4 %v20275_v45  ;;  %vm1029_vm2 = vcmask 1040384   ;;  %vm1032_vm3 = vcmask 1041408   ;;  %s20278_s20 = smov [#allocation4]  }
   0xb   :  { %v168_v23 = vld [vmem:[%s22150_s5 + $0x48] sm:$0xff]  ;;  %19543 = vmatprep.subr.bf16.mxu0 %v20272_v3  ;;  %v170_v26 = vld [vmem:[%s22150_s5 + $0x58] sm:$0xff]  ;;  %v171_v28 = vld [vmem:[%s22150_s5 + $0x60] sm:$0xff]  ;;  %v20524_v50 = vshrl.u32 %v776_v47, 7  ;;  %vm1035_vm4 = vcmask 1042432   ;;  %vm1038_vm5 = vcmask 1043456  }
   0xc   :  { %19479 = vmatpush3.bf16.msra.mxu1 %v20401_v17  ;;  %v20427_v24 = vpack.c.bf16 %v168_v23, %v167_v22  ;;  %v20439_v27 = vpack.c.bf16 %v170_v26, %v169_v25  ;;  %v172_v29 = vld [vmem:[%s22150_s5 + $0x68] sm:$0xff]  ;;  %v173_v31 = vld [vmem:[%s22150_s5 + $0x70] sm:$0xff]  ;;  %v174_v32 = vld [vmem:[%s22150_s5 + $0x78] sm:$0xff]  ;;  %v775_v49 = vunpack.c.0.s8 %v774_v46  ;;  %vm1041_vm7 = vcmask 1044480   ;;  %s17102_s4 = sshll.u32 %s20278_s20, 4  ;;  %s17103_s4 = int_to_ptr.vmem [resolvable:$true] %s17102_s4 }
   0xd   :  { %19480 = vmatprep.subr.bf16.mxu1 %v20272_v3  ;;  %17857 = vmatmul.mubr.msk.f32.vlgmr.msra.gmra.mrb[0].mxu0 %vm61_vm1, %v47_v21  ;;  %v20451_v30 = vpack.c.bf16 %v172_v29, %v171_v28  ;;  %v20463_v33 = vpack.c.bf16 %v174_v32, %v173_v31  ;;  %v20502_v36 = vld [vmem:[%s22151_s6] ss:$0 sm:$0xff]  ;;  %v20540_v63 = vsub.s32 0, %v20524_v50  ;;  %v48_v12 = vld [vmem:[%s22145_s0 + $0x10] sm:$0xff]  ;;  %v49_v13 = vld [vmem:[%s22145_s0 + $0x18] sm:$0xff]  ;;  %vm1044_vm9 = vcmask 1045504   ;;  %p20207_p1 = scmp.lt.s32.totalorder %s17103_s4, %s17103_s4 }
   0xe   :  { %19545 = vmatpush3.bf16.msra.mxu0 %v20368_v4  ;;  %v20527_v51 = vsub.s32 %v775_v49, %v20524_v50  ;;  %17859 = vmatprep.mubr.msk.f32.mxu0 %vm61_vm1, %v48_v12  ;;  %v20276_v12 = vmov 0   ;;  %vm1047_vm10 = vcmask 1046528   ;;  %vm1343_vm11 = vcmask 1041409  }
   0xf   :  { %19546 = vmatprep.subr.bf16.mxu0 %v20272_v3  ;;  %20100 = vset.pattern.permute.xlu0 %v20276_v12  ;;  %vm3355_vm12 = vcmask 1043459   ;;  %vm5290_vm13 = vcmask 1045509   ;;  %vm7224_vm14 = vcmask 1047559  }
  0x10   :  { %19482 = vmatpush3.bf16.msra.mxu1 %v20412_v20  ;;  %20101 = vset.pattern.permute.xlu1 %v20276_v12 }
  0x11   :  { %19483 = vmatprep.subr.bf16.mxu1 %v20272_v3  ;;  %17860 = vmatmul.mubr.msk.f32.gmra.mrb[2].mxu0 %vm61_vm1, %v49_v13 }
  0x12   :  { %19548 = vmatpush3.bf16.msra.mxu0 %v20376_v7  ;;  %17999 = vmatprep.mubr.msk.f32.mxu0 %vm20273_vm0, %v20274_v6 }
  0x13   :  { %19549 = vmatprep.subr.bf16.mxu0 %v20272_v3 }
  0x14   :  { %19485 = vmatpush3.bf16.msra.mxu1 %v20427_v24 }
  0x15   :  { %19486 = vmatprep.subr.bf16.mxu1 %v20272_v3 }
  0x16   :  { %19551 = vmatpush3.bf16.msra.mxu0 %v20401_v17 }
  0x17   :  { %19552 = vmatprep.subr.bf16.mxu0 %v20272_v3 }
  0x18   :  { %19488 = vmatpush3.bf16.msra.mxu1 %v20439_v27 }
  0x19   :  { %19489 = vmatprep.subr.bf16.mxu1 %v20272_v3 }
  0x1a   :  { %19554 = vmatpush3.bf16.msra.mxu0 %v20412_v20 }
  0x1b   :  { %19555 = vmatprep.subr.bf16.mxu0 %v20272_v3 }
  0x1c   :  { %19491 = vmatpush3.bf16.msra.mxu1 %v20451_v30 }
  0x1d   :  { %19492 = vmatprep.subr.bf16.mxu1 %v20272_v3 }
  0x1e   :  { %19557 = vmatpush3.bf16.msra.mxu0 %v20427_v24 }
  0x1f   :  { %19558 = vmatprep.subr.bf16.mxu0 %v20272_v3 }
  0x20   :  { %19494 = vmatpush3.bf16.msra.mxu1 %v20463_v33 }
  0x21   :  { %19495 = vmatprep.subr.bf16.mxu1 %v20272_v3 }
  0x22   :  { %19560 = vmatpush3.bf16.msra.mxu0 %v20439_v27 }
  0x23   :  { %17895 = vmatmul.mubr.f32.vlgmr.msra.gmra.mrb[0].mxu1 %v20274_v6  ;;  %19561 = vmatprep.subr.bf16.mxu0 %v20272_v3 }
  0x24   :  { %19497 = vmatpush3.bf16.msra.mxu1 %v20368_v4  ;;  %17929 = vmatprep.mubr.msk.f32.mxu1 %vm20273_vm0, %v20274_v6 }
  0x25   :  { %19498 = vmatprep.subr.bf16.mxu1 %v20272_v3 }
  0x26   :  { %19563 = vmatpush3.bf16.msra.mxu0 %v20451_v30 }
  0x27   :  { %19564 = vmatprep.subr.bf16.mxu0 %v20272_v3 }
  0x28   :  { %19500 = vmatpush3.bf16.msra.mxu1 %v20376_v7 }
  0x29   :  { %19501 = vmatprep.subr.bf16.mxu1 %v20272_v3 }
  0x2a   :  { %19566 = vmatpush3.bf16.msra.mxu0 %v20463_v33 }
  0x2b   :  { %19591 = vmatprep.subr.bf16.mxu0 %v20272_v3 }
  0x2c   :  { %19503 = vmatpush3.bf16.msra.mxu1 %v20401_v17 }
  0x2d   :  { %19504 = vmatprep.subr.bf16.mxu1 %v20272_v3 }
  0x30   :  { %19506 = vmatpush3.bf16.msra.mxu1 %v20412_v20 }
  0x31   :  { %19507 = vmatprep.subr.bf16.mxu1 %v20272_v3 }
  0x34   :  { %19509 = vmatpush3.bf16.msra.mxu1 %v20427_v24 }
  0x35   :  { %19510 = vmatprep.subr.bf16.mxu1 %v20272_v3 }
  0x38   :  { %19512 = vmatpush3.bf16.msra.mxu1 %v20439_v27 }
  0x39   :  { %19513 = vmatprep.subr.bf16.mxu1 %v20272_v3 }
  0x3c   :  { %19515 = vmatpush3.bf16.msra.mxu1 %v20451_v30 }
  0x3d   :  { %19516 = vmatprep.subr.bf16.mxu1 %v20272_v3 }
  0x40   :  { %19518 = vmatpush3.bf16.msra.mxu1 %v20463_v33 }
  0x41   :  { %19519 = vmatprep.subr.bf16.mxu1 %v20272_v3 }
  0xe0   :  { %v20497_v34 = vpop.f32.mrb[0].mxu0 }
  0xe1   :  { %v140_v35 = vpop.f32.mrb[1].mxu0  ;;  %v146_v14 = vadd.f32 %v20497_v34, %v20502_v36 }
  0xe2   :  { %v141_v37 = vadd.f32 %v20502_v36, %v140_v35 }
  0xf6   :  { %v241_v38 = vpop.f32.mrb[0].mxu1 }
  0xf7   :  { %v245_v39 = vadd.f32 %v241_v38, %v141_v37  ;;  %v17896_v40 = vpop.f32.mrb[1].mxu1 }
  0xf9   :  { %20102 = vtanh.f32 %v245_v39 }
 0x103   :  { %v20103_v41 = vpop.eup %20102 }
 0x104   :  { %17930 = vmatmul.mubr.f32.vlgmr.msra.gmra.mrb[2].mxu1 %v20103_v41  ;;  %v779_v52 = vrot.slane %v20103_v41, %v20527_v51 }
 0x105   :  { %19521 = vmatpush3.bf16.msra.mxu1 %v20368_v4  ;;  %17964 = vmatprep.mubr.msk.f32.mxu1 %vm20273_vm0, %v20274_v6 }
 0x106   :  { %19522 = vmatprep.subr.bf16.mxu1 %v20272_v3  ;;  %v780_v56 = vcombine.high %v779_v52, %v779_v52  ;;  %v787_v58 = vrot.slane %v779_v52, %v20527_v51 }
 0x108   :  { %v794_v61 = vrot.slane %v780_v56, %v20527_v51  ;;  %v1050_v1 = vcombine.high %v787_v58, %v787_v58 }
 0x109   :  { %19524 = vmatpush3.bf16.msra.mxu1 %v20376_v7 }
 0x10a   :  { %19525 = vmatprep.subr.bf16.mxu1 %v20272_v3  ;;  %v1051_v8 = vcombine.high %v794_v61, %v794_v61 }
 0x10d   :  { %19527 = vmatpush3.bf16.msra.mxu1 %v20401_v17 }
 0x10e   :  { %19528 = vmatprep.subr.bf16.mxu1 %v20272_v3 }
 0x111   :  { %19530 = vmatpush3.bf16.msra.mxu1 %v20412_v20 }
 0x112   :  { %19531 = vmatprep.subr.bf16.mxu1 %v20272_v3 }
 0x115   :  { %19533 = vmatpush3.bf16.msra.mxu1 %v20427_v24 }
 0x116   :  { %19534 = vmatprep.subr.bf16.mxu1 %v20272_v3 }
 0x119   :  { %19536 = vmatpush3.bf16.msra.mxu1 %v20439_v27 }
 0x11a   :  { %19537 = vmatprep.subr.bf16.mxu1 %v20272_v3 }
 0x11d   :  { %19539 = vmatpush3.bf16.msra.mxu1 %v20451_v30 }
 0x11e   :  { %19540 = vmatprep.subr.bf16.mxu1 %v20272_v3 }
 0x121   :  { %19542 = vmatpush3.bf16.msra.mxu1 %v20463_v33 }
 0x122   :  { %19567 = vmatprep.subr.bf16.mxu1 %v20272_v3 }
 0x1d7   :  { %v313_v42 = vpop.f32.mrb[2].mxu1 }
 0x1d8   :  { %v318_v43 = vrot.slane %v313_v42, 4  ;;  %v17931_v44 = vpop.f32.mrb[3].mxu1 }
 0x1d9   :  { %v20605_v44 = vpop.f32.mrb[2].mxu0 }
 0x1da   :  { %v320_v48 = vadd.f32 %v318_v43, %v141_v37  ;;  %v150_v45 = vpop.f32.mrb[3].mxu0 }
 0x1dc   :  { %20104 = vtanh.f32 %v320_v48 }
 0x1e6   :  { %v20105_v53 = vpop.eup %20104 }
 0x1e7   :  { %v797_v54 = vcombine.high %v20105_v53, %v20105_v53  ;;  %v323_v55 = vrot.slane %v20105_v53, 4 }
 0x1e9   :  { %v804_v57 = vrot.slane %v797_v54, %v20527_v51  ;;  %17965 = vmatmul.mubr.f32.vlgmr.msra.gmra.mrb[4].mxu1 %v323_v55 }
 0x1ea   :  { %19569 = vmatpush3.bf16.msra.mxu1 %v20368_v4  ;;  %18034 = vmatprep.mubr.msk.f32.mxu1 %vm20273_vm0, %v20274_v6 }
 0x1eb   :  { %v805_v59 = vcombine.high %v804_v57, %v804_v57  ;;  %v812_v60 = vrot.slane %v804_v57, %v20527_v51  ;;  %19570 = vmatprep.subr.bf16.mxu1 %v20272_v3 }
 0x1ed   :  { %v819_v62 = vrot.slane %v805_v59, %v20527_v51  ;;  %v1054_v0 = vcombine.high %v812_v60, %v812_v60  ;;  %v962_v22 = vrot.slane %v812_v60, %v20540_v63 }
 0x1ee   :  { %19572 = vmatpush3.bf16.msra.mxu1 %v20376_v7 }
 0x1ef   :  { %v1071_v2 = vrot.slane %v1054_v0, %v20540_v63  ;;  %19573 = vmatprep.subr.bf16.mxu1 %v20272_v3  ;;  %v1055_v5 = vcombine.high %v819_v62, %v819_v62  ;;  %v966_v26 = vrot.slane %v819_v62, %v20540_v63  ;;  %v1030_v32 = vsel %vm1029_vm2, %v787_v58, %v962_v22 }
 0x1f1   :  { %v1138_v9 = vsel %vm1029_vm2, %v1050_v1, %v1071_v2  ;;  %v1075_v10 = vrot.slane %v1055_v5, %v20540_v63  ;;  %v1031_v39 = vsel %vm1029_vm2, %v794_v61, %v966_v26 }
 0x1f2   :  { %19575 = vmatpush3.bf16.msra.mxu1 %v20401_v17 }
 0x1f3   :  { %19576 = vmatprep.subr.bf16.mxu1 %v20272_v3  ;;  %v1139_v11 = vsel %vm1029_vm2, %v1051_v8, %v1075_v10  ;;  %vm2381_vm2 = vcmask 64512  }
 0x1f6   :  { %19578 = vmatpush3.bf16.msra.mxu1 %v20412_v20 }
 0x1f7   :  { %19579 = vmatprep.subr.bf16.mxu1 %v20272_v3 }
 0x1fa   :  { %19581 = vmatpush3.bf16.msra.mxu1 %v20427_v24 }
 0x1fb   :  { %19582 = vmatprep.subr.bf16.mxu1 %v20272_v3 }
 0x1fe   :  { %19584 = vmatpush3.bf16.msra.mxu1 %v20439_v27 }
 0x1ff   :  { %19585 = vmatprep.subr.bf16.mxu1 %v20272_v3 }
 0x202   :  { %19587 = vmatpush3.bf16.msra.mxu1 %v20451_v30 }
 0x203   :  { %19588 = vmatprep.subr.bf16.mxu1 %v20272_v3 }
 0x206   :  { %19590 = vmatpush3.bf16.msra.mxu1 %v20463_v33 }
 0x207   :  { %19615 = vmatprep.subr.bf16.mxu1 %v20272_v3 }
 0x2bc   :  { %v391_v15 = vpop.f32.mrb[4].mxu1 }
 0x2bd   :  { %v395_v16 = vadd.f32 %v391_v15, %v146_v14  ;;  %v17966_v18 = vpop.f32.mrb[5].mxu1 }
 0x2bf   :  { %20106 = vtanh.f32 %v395_v16 }
 0x2c9   :  { %v20107_v19 = vpop.eup %20106 }
 0x2ca   :  { %v827_v21 = vrot.slane %v20107_v19, %v20527_v51  ;;  %18000 = vmatmul.mubr.f32.vlgmr.msra.gmra.mrb[4].mxu0 %v20107_v19 }
 0x2cb   :  { %19593 = vmatpush3.bf16.msra.mxu0 %v20368_v4  ;;  %18069 = vmatprep.mubr.msk.f32.mxu0 %vm20273_vm0, %v20274_v6 }
 0x2cc   :  { %v828_v23 = vcombine.high %v827_v21, %v827_v21  ;;  %v835_v25 = vrot.slane %v827_v21, %v20527_v51  ;;  %19594 = vmatprep.subr.bf16.mxu0 %v20272_v3 }
 0x2ce   :  { %v842_v28 = vrot.slane %v828_v23, %v20527_v51  ;;  %v972_v29 = vrot.slane %v835_v25, %v20540_v63  ;;  %v1056_v31 = vcombine.high %v835_v25, %v835_v25 }
 0x2cf   :  { %19596 = vmatpush3.bf16.msra.mxu0 %v20376_v7 }
 0x2d0   :  { %v976_v34 = vrot.slane %v842_v28, %v20540_v63  ;;  %v1033_v35 = vsel %vm1032_vm3, %v1030_v32, %v972_v29  ;;  %v1057_v37 = vcombine.high %v842_v28, %v842_v28  ;;  %v1081_v38 = vrot.slane %v1056_v31, %v20540_v63  ;;  %19597 = vmatprep.subr.bf16.mxu0 %v20272_v3 }
 0x2d2   :  { %v1034_v40 = vsel %vm1032_vm3, %v1031_v39, %v976_v34  ;;  %v1140_v41 = vsel %vm1032_vm3, %v1138_v9, %v1081_v38  ;;  %v1085_v42 = vrot.slane %v1057_v37, %v20540_v63 }
 0x2d3   :  { %19599 = vmatpush3.bf16.msra.mxu0 %v20401_v17 }
 0x2d4   :  { %19600 = vmatprep.subr.bf16.mxu0 %v20272_v3  ;;  %v1141_v43 = vsel %vm1032_vm3, %v1139_v11, %v1085_v42  ;;  %v20634_v11 = vld [vmem:[%s22147_s2] sm:$0x3] }
 0x2d5   :  { %v17135_v13 = vadd.s32 4294967295, %v20634_v11 }
 0x2d7   :  { %19602 = vmatpush3.bf16.msra.mxu0 %v20412_v20  ;;  %1158 = vperm.xlu0 %20100, %v17135_v13  }
 0x2d8   :  { %19603 = vmatprep.subr.bf16.mxu0 %v20272_v3 }
 0x2db   :  { %19605 = vmatpush3.bf16.msra.mxu0 %v20427_v24 }
 0x2dc   :  { %19606 = vmatprep.subr.bf16.mxu0 %v20272_v3 }
 0x2df   :  { %19608 = vmatpush3.bf16.msra.mxu0 %v20439_v27 }
 0x2e0   :  { %19609 = vmatprep.subr.bf16.mxu0 %v20272_v3 }
 0x2e3   :  { %19611 = vmatpush3.bf16.msra.mxu0 %v20451_v30 }
 0x2e4   :  { %19612 = vmatprep.subr.bf16.mxu0 %v20272_v3 }
 0x2e7   :  { %19614 = vmatpush3.bf16.msra.mxu0 %v20463_v33 }
 0x2e8   :  { %19639 = vmatprep.subr.bf16.mxu0 %v20272_v3 }
 0x39d   :  { %v463_v46 = vpop.f32.mrb[4].mxu0 }
 0x39e   :  { %v468_v48 = vrot.slane %v463_v46, 4  ;;  %v18001_v49 = vpop.f32.mrb[5].mxu0 }
 0x3a0   :  { %v470_v52 = vadd.f32 %v468_v48, %v146_v14  ;;  %v151_v14 = vadd.f32 %v20502_v36, %v150_v45 }
 0x3a2   :  { %20108 = vtanh.f32 %v470_v52 }
 0x3ac   :  { %v20109_v53 = vpop.eup %20108 }
 0x3ad   :  { %v843_v54 = vcombine.high %v20109_v53, %v20109_v53  ;;  %v473_v55 = vrot.slane %v20109_v53, 4 }
 0x3af   :  { %v850_v56 = vrot.slane %v843_v54, %v20527_v51  ;;  %18035 = vmatmul.mubr.f32.vlgmr.msra.gmra.mrb[6].mxu1 %v473_v55 }
 0x3b0   :  { %19617 = vmatpush3.bf16.msra.mxu1 %v20368_v4  ;;  %18104 = vmatprep.mubr.msk.f32.mxu1 %vm20273_vm0, %v20274_v6 }
 0x3b1   :  { %v851_v57 = vcombine.high %v850_v56, %v850_v56  ;;  %v858_v58 = vrot.slane %v850_v56, %v20527_v51  ;;  %19618 = vmatprep.subr.bf16.mxu1 %v20272_v3 }
 0x3b3   :  { %v982_v59 = vrot.slane %v858_v58, %v20540_v63  ;;  %v1058_v60 = vcombine.high %v858_v58, %v858_v58  ;;  %v865_v61 = vrot.slane %v851_v57, %v20527_v51 }
 0x3b4   :  { %19620 = vmatpush3.bf16.msra.mxu1 %v20376_v7 }
 0x3b5   :  { %v1091_v62 = vrot.slane %v1058_v60, %v20540_v63  ;;  %v1036_v0 = vsel %vm1035_vm4, %v1033_v35, %v982_v59  ;;  %19621 = vmatprep.subr.bf16.mxu1 %v20272_v3  ;;  %v986_v1 = vrot.slane %v865_v61, %v20540_v63  ;;  %v1059_v2 = vcombine.high %v865_v61, %v865_v61 }
 0x3b7   :  { %v1142_v5 = vsel %vm1035_vm4, %v1140_v41, %v1091_v62  ;;  %v1095_v8 = vrot.slane %v1059_v2, %v20540_v63  ;;  %v1037_v9 = vsel %vm1035_vm4, %v1034_v40, %v986_v1 }
 0x3b8   :  { %19623 = vmatpush3.bf16.msra.mxu1 %v20401_v17 }
 0x3b9   :  { %19624 = vmatprep.subr.bf16.mxu1 %v20272_v3  ;;  %v1143_v10 = vsel %vm1035_vm4, %v1141_v43, %v1095_v8 }
 0x3bc   :  { %19626 = vmatpush3.bf16.msra.mxu1 %v20412_v20 }
 0x3bd   :  { %19627 = vmatprep.subr.bf16.mxu1 %v20272_v3 }
 0x3c0   :  { %19629 = vmatpush3.bf16.msra.mxu1 %v20427_v24 }
 0x3c1   :  { %19630 = vmatprep.subr.bf16.mxu1 %v20272_v3 }
 0x3c4   :  { %19632 = vmatpush3.bf16.msra.mxu1 %v20439_v27 }
 0x3c5   :  { %19633 = vmatprep.subr.bf16.mxu1 %v20272_v3 }
 0x3c8   :  { %19635 = vmatpush3.bf16.msra.mxu1 %v20451_v30 }
 0x3c9   :  { %19636 = vmatprep.subr.bf16.mxu1 %v20272_v3 }
 0x3cc   :  { %19638 = vmatpush3.bf16.msra.mxu1 %v20463_v33 }
 0x482   :  { %v541_v15 = vpop.f32.mrb[6].mxu1 }
 0x483   :  { %v545_v16 = vadd.f32 %v541_v15, %v151_v14  ;;  %v18036_v18 = vpop.f32.mrb[7].mxu1 }
 0x485   :  { %20110 = vtanh.f32 %v545_v16 }
 0x48f   :  { %v20111_v19 = vpop.eup %20110 }
 0x490   :  { %v873_v21 = vrot.slane %v20111_v19, %v20527_v51  ;;  %18070 = vmatmul.mubr.f32.vlgmr.msra.gmra.mrb[6].mxu0 %v20111_v19 }
 0x491   :  { %19641 = vmatpush3.bf16.msra.mxu0 %v20368_v4  ;;  %18139 = vmatprep.mubr.msk.f32.mxu0 %vm20273_vm0, %v20274_v6 }
 0x492   :  { %v874_v22 = vcombine.high %v873_v21, %v873_v21  ;;  %v881_v23 = vrot.slane %v873_v21, %v20527_v51  ;;  %19642 = vmatprep.subr.bf16.mxu0 %v20272_v3 }
 0x494   :  { %v888_v25 = vrot.slane %v874_v22, %v20527_v51  ;;  %v992_v26 = vrot.slane %v881_v23, %v20540_v63  ;;  %v1060_v28 = vcombine.high %v881_v23, %v881_v23 }
 0x495   :  { %19644 = vmatpush3.bf16.msra.mxu0 %v20376_v7 }
 0x496   :  { %v996_v29 = vrot.slane %v888_v25, %v20540_v63  ;;  %v1039_v4 = vsel %vm1038_vm5, %v1036_v0, %v992_v26  ;;  %v1101_v31 = vrot.slane %v1060_v28, %v20540_v63  ;;  %19645 = vmatprep.subr.bf16.mxu0 %v20272_v3  ;;  %v1061_v32 = vcombine.high %v888_v25, %v888_v25 }
 0x498   :  { %v1144_v34 = vsel %vm1038_vm5, %v1142_v5, %v1101_v31  ;;  %v1105_v35 = vrot.slane %v1061_v32, %v20540_v63  ;;  %v1040_v37 = vsel %vm1038_vm5, %v1037_v9, %v996_v29  ;;  %v20692_v9 = vadd.f32 %v20605_v44, %v20502_v36  ;;  %v1326_v31 = vld [vmem:[%s22153_s8 + $0x8] sm:$0xff] }
 0x499   :  { %19647 = vmatpush3.bf16.msra.mxu0 %v20401_v17  ;;  %v1159_v17 = vpop.permute.xlu0 %1158 }
 0x49a   :  { %19648 = vmatprep.subr.bf16.mxu0 %v20272_v3  ;;  %v1145_v7 = vsel %vm1038_vm5, %v1143_v10, %v1105_v35  ;;  %v1328_v35 = vld [vmem:[%s22153_s8 + $0x18] sm:$0xff] }
 0x49d   :  { %19650 = vmatpush3.bf16.msra.mxu0 %v20412_v20  ;;  %v20668_v20 = vand.u32 127, %v776_v47 }
 0x49e   :  { %19651 = vmatprep.subr.bf16.mxu0 %v20272_v3 }
 0x49f   :  { %vm1160_vm6 = vcmp.eq.s32.totalorder %v20668_v20, %v1159_v17  ;;  %v1234_v17 = vld [vmem:[%s22152_s7 + $0x8] sm:$0xff] }
 0x4a1   :  { %19653 = vmatpush3.bf16.msra.mxu0 %v20427_v24  ;;  %v1179_v24 = vsub.s32 1, %v20524_v50 }
 0x4a2   :  { %19654 = vmatprep.subr.bf16.mxu0 %v20272_v3 }
 0x4a5   :  { %19656 = vmatpush3.bf16.msra.mxu0 %v20439_v27  ;;  %v17136_v27 = vsel %vm1160_vm6, 1.0, %v20274_v6 }
 0x4a6   :  { %19657 = vmatprep.subr.bf16.mxu0 %v20272_v3  ;;  %v1180_v38 = vrot.slane %v17136_v27, %v1179_v24 }
 0x4a8   :  { %1182 = vbcast.lane.b32.xlu1 %v1180_v38, 256 }
 0x4a9   :  { %19659 = vmatpush3.bf16.msra.mxu0 %v20451_v30  ;;  %v1155_v30 = vld [vmem:[%s22148_s3] sm:$0x3] }
 0x4aa   :  { %19660 = vmatprep.subr.bf16.mxu0 %v20272_v3  ;;  %v17137_v39 = vadd.s32 4294967295, %v1155_v30  ;;  %v1330_v30 = vld [vmem:[%s22153_s8 + $0x28] sm:$0xff] }
 0x4ac   :  { %1165 = vperm.xlu1 %20101, %v17137_v39   ;;  %v1235_v39 = vld [vmem:[%s22152_s7 + $0x10] sm:$0xff] }
 0x4ad   :  { %19662 = vmatpush3.bf16.msra.mxu0 %v20463_v33  ;;  %v1173_v33 = vrot.slane %v17136_v27, %v20540_v63 }
 0x4ae   :  { %19671 = vmatprep.subr.bf16.mxu0 %v20272_v3 }
 0x4af   :  { %1175 = vbcast.lane.b32.xlu0 %v1173_v33, 256  ;;  %v1236_v33 = vld [vmem:[%s22152_s7 + $0x18] sm:$0xff] }
 0x51a   :  { %v20684_v0 = vpop.permute.xlu1 %1182 }
 0x52b   :  { %v1166_v1 = vpop.permute.xlu1 %1165 }
 0x52c   :  { %vm1167_vm8 = vcmp.eq.s32.totalorder %v20668_v20, %v1166_v1 }
 0x52d   :  { %v17138_v2 = vsel %vm1167_vm8, 1.0, %v20274_v6 }
 0x52e   :  { %v1201_v5 = vrot.slane %v17138_v2, %v20540_v63  ;;  %v1208_v8 = vrot.slane %v17138_v2, %v1179_v24  ;;  %v1329_v24 = vld [vmem:[%s22153_s8 + $0x20] sm:$0xff] }
 0x52f   :  { %v20748_v38 = vpack.c.bf16 %v1330_v30, %v1329_v24 }
 0x530   :  { %1203 = vbcast.lane.b32.xlu0 %v1201_v5, 256  ;;  %1210 = vbcast.lane.b32.xlu1 %v1208_v8, 256 }
 0x534   :  { %1227 = vperm.xlu0 %20100, %v20634_v11  }
 0x563   :  { %v613_v40 = vpop.f32.mrb[6].mxu0 }
 0x564   :  { %v618_v47 = vrot.slane %v613_v40, 4  ;;  %v18071_v41 = vpop.f32.mrb[7].mxu0  ;;  %v1331_v40 = vld [vmem:[%s22153_s8 + $0x30] sm:$0xff] }
 0x565   :  { %v1332_v41 = vld [vmem:[%s22153_s8 + $0x38] sm:$0xff] }
 0x566   :  { %v620_v42 = vadd.f32 %v618_v47, %v151_v14  ;;  %v19667_v47 = vpack.c.bf16 %v1236_v33, %v1235_v39 }
 0x568   :  { %20112 = vtanh.f32 %v620_v42  ;;  %v20764_v42 = vpack.c.bf16 %v1332_v41, %v1331_v40 }
 0x572   :  { %v20113_v50 = vpop.eup %20112 }
 0x573   :  { %v889_v43 = vcombine.high %v20113_v50, %v20113_v50  ;;  %v623_v45 = vrot.slane %v20113_v50, 4  ;;  %v1333_v50 = vld [vmem:[%s22153_s8 + $0x40] sm:$0xff] }
 0x575   :  { %v896_v46 = vrot.slane %v889_v43, %v20527_v51  ;;  %18105 = vmatmul.mubr.f32.vlgmr.msra.gmra.mrb[8].mxu1 %v623_v45  ;;  %v1334_v43 = vld [vmem:[%s22153_s8 + $0x48] sm:$0xff] }
 0x576   :  { %v20774_v45 = vpack.c.bf16 %v1334_v43, %v1333_v50 }
 0x577   :  { %v904_v48 = vrot.slane %v896_v46, %v20527_v51  ;;  %v897_v49 = vcombine.high %v896_v46, %v896_v46  ;;  %v1335_v46 = vld [vmem:[%s22153_s8 + $0x50] sm:$0xff] }
 0x579   :  { %v1002_v52 = vrot.slane %v904_v48, %v20540_v63  ;;  %v1062_v53 = vcombine.high %v904_v48, %v904_v48  ;;  %v911_v54 = vrot.slane %v897_v49, %v20527_v51  ;;  %v1336_v48 = vld [vmem:[%s22153_s8 + $0x58] sm:$0xff] }
 0x57a   :  { %v20785_v49 = vpack.c.bf16 %v1336_v48, %v1335_v46 }
 0x57b   :  { %v1111_v55 = vrot.slane %v1062_v53, %v20540_v63  ;;  %v1042_v56 = vsel %vm1041_vm7, %v1039_v4, %v1002_v52  ;;  %v1006_v57 = vrot.slane %v911_v54, %v20540_v63  ;;  %v1063_v58 = vcombine.high %v911_v54, %v911_v54  ;;  %v1325_v4 = vld [vmem:[%s22153_s8] sm:$0xff]  ;;  %v1232_v53 = vld [vmem:[%s22146_s1 + $0x8] sm:$0xff] }
 0x57c   :  { %v20722_v32 = vpack.c.bf16 %v1326_v31, %v1325_v4  ;;  %v1231_v52 = vld [vmem:[%s22146_s1] sm:$0xff] }
 0x57d   :  { %v1146_v59 = vsel %vm1041_vm7, %v1144_v34, %v1111_v55  ;;  %v1115_v60 = vrot.slane %v1063_v58, %v20540_v63  ;;  %v1043_v61 = vsel %vm1041_vm7, %v1040_v37, %v1006_v57  ;;  %v1327_v34 = vld [vmem:[%s22153_s8 + $0x10] sm:$0xff]  ;;  %18150 = vmatprep.mubr.msk.f32.mxu1 %vm61_vm1, %v1231_v52  ;;  %v1337_v54 = vld [vmem:[%s22153_s8 + $0x60] sm:$0xff]  ;;  %v1338_v55 = vld [vmem:[%s22153_s8 + $0x68] sm:$0xff] }
 0x57e   :  { %v20732_v37 = vpack.c.bf16 %v1328_v35, %v1327_v34  ;;  %v1339_v57 = vld [vmem:[%s22153_s8 + $0x70] sm:$0xff]  ;;  %v1340_v58 = vld [vmem:[%s22153_s8 + $0x78] sm:$0xff] }
 0x57f   :  { %v1147_v62 = vsel %vm1041_vm7, %v1145_v7, %v1115_v60  ;;  %v1233_v7 = vld [vmem:[%s22152_s7] sm:$0xff] }
 0x580   :  { %v19663_v27 = vpack.c.bf16 %v1234_v17, %v1233_v7 }
 0x582   :  { %19664 = vmatprep.subr.bf16.mxu1 %v19663_v27 }
 0x583   :  { %19666 = vmatpush3.bf16.msra.mxu1 %v19663_v27 }
 0x584   :  { %19668 = vmatprep.subr.bf16.mxu1 %v19667_v47 }
 0x587   :  { %19670 = vmatpush3.bf16.msra.mxu1 %v19667_v47 }
 0x588   :  { %18188 = vmatprep.subr.mxu1 %v20274_v6 }
 0x58a   :  { %18151 = vmatmul.mubr.msk.f32.vlgmr.msra.gmra.mrb[10].mxu1 %vm61_vm1, %v1232_v53  ;;  %vm2351_vm1 = vcmask 58368  }
 0x58b   :  { %18190 = vmatprep.mubr.msk.f32.mxu1 %vm20273_vm0, %v20274_v6 }
 0x648   :  { %v691_v10 = vpop.f32.mrb[8].mxu1 }
 0x649   :  { %v695_v12 = vadd.f32 %v691_v10, %v20692_v9  ;;  %v18106_v13 = vpop.f32.mrb[9].mxu1  ;;  %v1176_v10 = vpop.permute.xlu0 %1175 }
 0x64b   :  { %20114 = vtanh.f32 %v695_v12 }
 0x655   :  { %v20115_v14 = vpop.eup %20114 }
 0x656   :  { %v919_v15 = vrot.slane %v20115_v14, %v20527_v51  ;;  %18140 = vmatmul.mubr.f32.vlgmr.msra.gmra.mrb[8].mxu0 %v20115_v14 }
 0x657   :  { %18185 = vmatprep.mubr.msk.f32.mxu0 %vm20273_vm0, %v20274_v6  ;;  %19673 = vmatpush3.bf16.msra.mxu0 %v20722_v32 }
 0x658   :  { %v920_v16 = vcombine.high %v919_v15, %v919_v15  ;;  %v927_v11 = vrot.slane %v919_v15, %v20527_v51  ;;  %19674 = vmatprep.subr.bf16.mxu0 %v20272_v3 }
 0x65a   :  { %v1012_v18 = vrot.slane %v927_v11, %v20540_v63  ;;  %v1064_v36 = vcombine.high %v927_v11, %v927_v11  ;;  %v934_v44 = vrot.slane %v920_v16, %v20527_v51 }
 0x65b   :  { %19676 = vmatpush3.bf16.msra.mxu0 %v20732_v37 }
 0x65c   :  { %v1121_v19 = vrot.slane %v1064_v36, %v20540_v63  ;;  %v20703_v21 = vsel %vm1044_vm9, %v1042_v56, %v1012_v18  ;;  %v1016_v22 = vrot.slane %v934_v44, %v20540_v63  ;;  %v1065_v23 = vcombine.high %v934_v44, %v934_v44  ;;  %19677 = vmatprep.subr.bf16.mxu0 %v20272_v3 }
 0x65d   :  { %v20803_v56 = vpack.c.bf16 %v1338_v55, %v1337_v54 }
 0x65e   :  { %v20707_v25 = vsel %vm1044_vm9, %v1146_v59, %v1121_v19  ;;  %v1125_v26 = vrot.slane %v1065_v23, %v20540_v63  ;;  %v20711_v28 = vsel %vm1044_vm9, %v1043_v61, %v1016_v22  ;;  %v20815_v59 = vpack.c.bf16 %v1340_v58, %v1339_v57  ;;  %v1204_v22 = vpop.permute.xlu0 %1203 }
 0x65f   :  { %19679 = vmatpush3.bf16.msra.mxu0 %v20748_v38 }
 0x660   :  { %v20714_v29 = vsel %vm1044_vm9, %v1147_v62, %v1125_v26  ;;  %19680 = vmatprep.subr.bf16.mxu0 %v20272_v3  ;;  %v1211_v26 = vpop.permute.xlu1 %1210 }
 0x663   :  { %19682 = vmatpush3.bf16.msra.mxu0 %v20764_v42 }
 0x664   :  { %19683 = vmatprep.subr.bf16.mxu0 %v20272_v3 }
 0x667   :  { %19685 = vmatpush3.bf16.msra.mxu0 %v20774_v45 }
 0x668   :  { %19686 = vmatprep.subr.bf16.mxu0 %v20272_v3 }
 0x66b   :  { %19688 = vmatpush3.bf16.msra.mxu0 %v20785_v49 }
 0x66c   :  { %19689 = vmatprep.subr.bf16.mxu0 %v20272_v3 }
 0x66f   :  { %19691 = vmatpush3.bf16.msra.mxu0 %v20803_v56 }
 0x670   :  { %19692 = vmatprep.subr.bf16.mxu0 %v20272_v3 }
 0x673   :  { %19694 = vmatpush3.bf16.msra.mxu0 %v20815_v59 }
 0x674   :  { %18228 = vmatprep.subr.mxu0 %v20274_v6 }
 0x729   :  { %v763_v60 = vpop.f32.mrb[8].mxu0 }
 0x72a   :  { %v768_v61 = vrot.slane %v763_v60, 4  ;;  %v18141_v62 = vpop.f32.mrb[9].mxu0 }
 0x72c   :  { %v770_v1 = vadd.f32 %v768_v61, %v20692_v9 }
 0x72e   :  { %20116 = vtanh.f32 %v770_v1 }
 0x738   :  { %v20117_v2 = vpop.eup %20116 }
 0x739   :  { %v936_v5 = vcombine.high %v20117_v2, %v20117_v2 }
 0x73b   :  { %v943_v8 = vrot.slane %v936_v5, %v20527_v51 }
 0x73d   :  { %v944_v12 = vcombine.high %v943_v8, %v943_v8  ;;  %v951_v13 = vrot.slane %v943_v8, %v20527_v51 }
 0x73f   :  { %v1022_v14 = vrot.slane %v951_v13, %v20540_v63  ;;  %v1066_v15 = vcombine.high %v951_v13, %v951_v13  ;;  %v958_v16 = vrot.slane %v944_v12, %v20527_v51  ;;  %v18152_v12 = vpop.f32.mrb[10].mxu1 }
 0x741   :  { %v20826_v11 = vsel %vm1047_vm10, %v20703_v21, %v1022_v14  ;;  %v1131_v9 = vrot.slane %v1066_v15, %v20540_v63  ;;  %v1026_v18 = vrot.slane %v958_v16, %v20540_v63  ;;  %v1067_v36 = vcombine.high %v958_v16, %v958_v16  ;;  %v1316_v14 = vpop.f32.mrb[11].mxu1 }
 0x742   :  { %v20831_v44 = vand.u32 4294901760, %v20826_v11  ;;  %v1184_v19 = vmul.f32 %v1176_v10, %v20826_v11  ;;  %v17139_v10 = vld [vmem:[%s22154_s9] ss:$0 sm:$0xff] }
 0x743   :  { %v1150_v23 = vsel %vm1047_vm10, %v20707_v25, %v1131_v9  ;;  %v1135_v4 = vrot.slane %v1067_v36, %v20540_v63  ;;  %v1049_v21 = vsel %vm1047_vm10, %v20711_v28, %v1026_v18  ;;  %v20869_v13 = vadd.f32 %v18152_v12, %v17139_v10 }
 0x744   :  { %v1212_v31 = vmul.f32 %v1204_v22, %v1150_v23  ;;  %18189 = vmatpush3.xpose.msra.mxu1 %v20831_v44  ;;  %v1185_v34 = vmul.f32 %v20684_v0, %v1049_v21  ;;  %v1186_v35 = vrot.slane %v1184_v19, 4  ;;  %v20844_v53 = vand.u32 4294901760, %v1049_v21 }
 0x745   :  { %v1151_v7 = vsel %vm1047_vm10, %v20714_v29, %v1135_v4  ;;  %18193 = vmatprep.subr.mxu1 %v20274_v6  ;;  %v20871_v15 = vadd.f32 %v17139_v10, %v1316_v14  ;;  %v20881_v23 = vsub.f32 %v20826_v11, %v20831_v44 }
 0x746   :  { %v1214_v17 = vrot.slane %v1212_v31, 4  ;;  %v1213_v24 = vmul.f32 %v1211_v26, %v1151_v7  ;;  %v1187_v25 = vadd.f32 %v1186_v35, %v1184_v19  ;;  %v1192_v27 = vrot.slane %v1185_v34, 4 }
 0x747   :  { %v20848_v62 = vsub.f32 %v1049_v21, %v20844_v53 }
 0x748   :  { %v1215_v30 = vadd.f32 %v1214_v17, %v1212_v31  ;;  %v1220_v63 = vrot.slane %v1213_v24, 4  ;;  %v1188_v39 = vrot.slane %v1187_v25, 2  ;;  %v1193_v33 = vadd.f32 %v1192_v27, %v1185_v34 }
 0x749   :  { %v20886_v34 = vand.u32 4294901760, %v20881_v23 }
 0x74a   :  { %v1216_v28 = vrot.slane %v1215_v30, 2  ;;  %v1221_v40 = vadd.f32 %v1220_v63, %v1213_v24  ;;  %v1189_v47 = vadd.f32 %v1188_v39, %v1187_v25  ;;  %v1194_v41 = vrot.slane %v1193_v33, 2 }
 0x74b   :  { %v20889_v25 = vand.u32 4294901760, %v20848_v62  ;;  %v1528_v11 = vsub.f32 %v20881_v23, %v20886_v34 }
 0x74c   :  { %v1217_v50 = vadd.f32 %v1216_v28, %v1215_v30  ;;  %v1222_v0 = vrot.slane %v1221_v40, 2  ;;  %v1190_v43 = vrot.slane %v1189_v47, 1  ;;  %v1195_v46 = vadd.f32 %v1194_v41, %v1193_v33 }
 0x74d   :  { %v20897_v63 = vand.u32 4294901760, %v1528_v11  ;;  %v1974_v28 = vsub.f32 %v20848_v62, %v20889_v25 }
 0x74e   :  { %v1218_v48 = vrot.slane %v1217_v50, 1  ;;  %v1223_v29 = vadd.f32 %v1222_v0, %v1221_v40  ;;  %v1196_v52 = vrot.slane %v1195_v46, 1  ;;  %v1191_v55 = vadd.f32 %v1190_v43, %v1189_v47 }
 0x74f   :  { %v20929_v47 = vand.u32 4294901760, %v1974_v28 }
 0x750   :  { %v1224_v54 = vrot.slane %v1223_v29, 1  ;;  %v1197_v57 = vadd.f32 %v1196_v52, %v1195_v46  ;;  %v1219_v58 = vadd.f32 %v1218_v48, %v1217_v50 }
 0x752   :  { %v1225_v60 = vadd.f32 %v1224_v54, %v1223_v29  ;;  %v1344_v61 = vsel %vm1343_vm11, %v1197_v57, %v1191_v55 }
 0x753   :  { %18186 = vmatmul.mubr.f32.vlgmr.msra.gmra.mrb[10].mxu0 %v1344_v61 }
 0x754   :  { %v20851_v1 = vsel %vm1343_vm11, %v1225_v60, %v1219_v58  ;;  %v20854_v2 = vsel %vm3355_vm12, %v1225_v60, %v1219_v58  ;;  %v20857_v5 = vsel %vm5290_vm13, %v1225_v60, %v1219_v58  ;;  %v20860_v8 = vsel %vm7224_vm14, %v1225_v60, %v1219_v58  ;;  %18229 = vmatpush3.xpose.msra.mxu0 %v20848_v62 }
 0x755   :  { %18230 = vmatprep.mubr.msk.f32.mxu0 %vm20273_vm0, %v20274_v6  ;;  %18238 = vmatprep.subr.mxu0 %v20274_v6 }
 0x826   :  { %v1412_v16 = vpop.f32.mrb[10].mxu0 }
 0x827   :  { %v1416_v9 = vadd.f32 %v1412_v16, %v20871_v15  ;;  %v18187_v18 = vpop.f32.mrb[11].mxu0 }
 0x829   :  { %20118 = vtanh.f32 %v1416_v9 }
 0x833   :  { %v20874_v36 = vpop.eup %20118 }
 0x834   :  { %v1422_v19 = vadd.f32 %v20874_v36, %v20851_v1 }
 0x836   :  { %v1430_v22 = vrot.slane %v1422_v19, %v20527_v51 }
 0x838   :  { %v1431_v26 = vcombine.high %v1430_v22, %v1430_v22  ;;  %v1438_v4 = vrot.slane %v1430_v22, %v20527_v51 }
 0x83a   :  { %v1445_v21 = vrot.slane %v1431_v26, %v20527_v51  ;;  %v1514_v31 = vand.u32 4294901760, %v1438_v4 }
 0x83c   :  { %v1960_v35 = vand.u32 4294901760, %v1445_v21  ;;  %v1515_v7 = vsub.f32 %v1438_v4, %v1514_v31  ;;  %v1228_v4 = vpop.permute.xlu0 %1227 }
 0x83d   :  { %vm1229_vm15 = vcmp.lt.s32.totalorder %v20668_v20, %v1228_v4 }
 0x83e   :  { %v1961_v17 = vsub.f32 %v1445_v21, %v1960_v35  ;;  %v1516_v24 = vand.u32 4294901760, %v1515_v7 }
 0x840   :  { %18231 = vmatmul.mubr.f32.vlgmr.msra.gmra.mrb[12].mxu0 %v1961_v17  ;;  %v1517_v27 = vsub.f32 %v1515_v7, %v1516_v24  ;;  %v1962_v39 = vand.u32 4294901760, %v1961_v17 }
 0x841   :  { %18239 = vmatpush3.xpose.msra.mxu0 %v20889_v25  ;;  %18240 = vmatprep.mubr.msk.f32.mxu0 %vm20273_vm0, %v20274_v6 }
 0x842   :  { %18248 = vmatprep.subr.mxu0 %v20274_v6  ;;  %v1518_v30 = vand.u32 4294901760, %v1517_v27  ;;  %v1963_v33 = vsub.f32 %v1961_v17, %v1962_v39  ;;  %v20277_v27 = vmov -1e+09  }
 0x844   :  { %18191 = vmatmul.mubr.f32.vlgmr.msra.gmra.mrb[12].mxu1 %v1518_v30  ;;  %18241 = vmatmul.mubr.f32.vlgmr.msra.gmra.mrb[14].mxu0 %v1960_v35  ;;  %v1964_v40 = vand.u32 4294901760, %v1963_v33  ;;  %v20948_v30 = vsel %vm1229_vm15, 0.0, %v20277_v27 }
 0x845   :  { %18194 = vmatpush3.xpose.msra.mxu1 %v20897_v63  ;;  %18249 = vmatpush3.msra.mxu0 %v20831_v44  ;;  %v20951_v28 = vrot.slane %v20948_v30, 1 }
 0x846   :  { %18195 = vmatprep.mubr.msk.f32.mxu1 %vm20273_vm0, %v20274_v6  ;;  %18198 = vmatprep.subr.mxu1 %v20274_v6 }
 0x847   :  { %18250 = vmatprep.mubr.msk.f32.mxu0 %vm20273_vm0, %v20274_v6  ;;  %18253 = vmatprep.subr.mxu0 %v20274_v6 }
 0x848   :  { %18196 = vmatmul.mubr.f32.vlgmr.msra.gmra.mrb[14].mxu1 %v1514_v31 }
 0x849   :  { %18199 = vmatpush3.xpose.msra.mxu1 %v20881_v23  ;;  %18200 = vmatprep.mubr.msk.f32.mxu1 %vm20273_vm0, %v20274_v6 }
 0x84a   :  { %18203 = vmatprep.subr.mxu1 %v20274_v6 }
 0x84c   :  { %18201 = vmatmul.mubr.f32.vlgmr.msra.gmra.mrb[16].mxu1 %v1515_v7 }
 0x84d   :  { %18204 = vmatpush3.xpose.msra.mxu1 %v20831_v44  ;;  %18205 = vmatprep.mubr.msk.f32.mxu1 %vm20273_vm0, %v20274_v6 }
 0x84e   :  { %18208 = vmatprep.subr.mxu1 %v20274_v6 }
 0x850   :  { %18206 = vmatmul.mubr.f32.vlgmr.msra.gmra.mrb[18].mxu1 %v1516_v24 }
 0x851   :  { %18209 = vmatpush3.xpose.msra.mxu1 %v20886_v34  ;;  %18210 = vmatprep.mubr.msk.f32.mxu1 %vm20273_vm0, %v20274_v6 }
 0x852   :  { %18213 = vmatprep.subr.mxu1 %v20274_v6 }
 0x854   :  { %18211 = vmatmul.mubr.f32.vlgmr.msra.gmra.mrb[20].mxu1 %v1514_v31 }
 0x855   :  { %18214 = vmatpush3.xpose.msra.mxu1 %v20831_v44  ;;  %18215 = vmatprep.mubr.msk.f32.mxu1 %vm20273_vm0, %v20274_v6 }
 0x856   :  { %18218 = vmatprep.subr.mxu1 %v20274_v6 }
 0x858   :  { %18216 = vmatmul.mubr.f32.vlgmr.msra.gmra.mrb[22].mxu1 %v1514_v31 }
 0x859   :  { %18219 = vmatpush3.xpose.msra.mxu1 %v20844_v53  ;;  %18220 = vmatprep.mubr.msk.f32.mxu1 %vm20273_vm0, %v20274_v6 }
 0x85a   :  { %18223 = vmatprep.subr.mxu1 %v20274_v6 }
 0x85c   :  { %18221 = vmatmul.mubr.f32.vlgmr.msra.gmra.mrb[24].mxu1 %v1964_v40 }
 0x85d   :  { %18224 = vmatpush3.xpose.msra.mxu1 %v20929_v47  ;;  %18225 = vmatprep.mubr.msk.f32.mxu1 %vm20273_vm0, %v20274_v6 }
 0x85e   :  { %18233 = vmatprep.subr.mxu1 %v20274_v6 }
 0x860   :  { %18226 = vmatmul.mubr.f32.vlgmr.msra.gmra.mrb[26].mxu1 %v1960_v35 }
 0x861   :  { %18234 = vmatpush3.xpose.msra.mxu1 %v20844_v53  ;;  %18235 = vmatprep.mubr.msk.f32.mxu1 %vm20273_vm0, %v20274_v6 }
 0x862   :  { %18243 = vmatprep.subr.mxu1 %v20274_v6 }
 0x864   :  { %18236 = vmatmul.mubr.f32.vlgmr.msra.gmra.mrb[28].mxu1 %v1962_v39 }
 0x865   :  { %18244 = vmatpush3.xpose.msra.mxu1 %v20844_v53  ;;  %18245 = vmatprep.mubr.msk.f32.mxu1 %vm20273_vm0, %v20274_v6 }
 0x866   :  { %18278 = vmatprep.subr.mxu1 %v20274_v6 }
 0x868   :  { %18246 = vmatmul.mubr.f32.vlgmr.msra.gmra.mrb[30].mxu1 %v1960_v35 }
 0x869   :  { %18279 = vmatpush3.msra.mxu1 %v20844_v53  ;;  %18280 = vmatprep.mubr.msk.f32.mxu1 %vm20273_vm0, %v20274_v6 }
 0x86a   :  { %18283 = vmatprep.subr.mxu1 %v20274_v6 }
 0x913   :  { %v2116_v41 = vpop.f32.mrb[12].mxu0 }
 0x914   :  { %v18232_v50 = vpop.f32.mrb[13].mxu0 }
 0x917   :  { %v1520_v0 = vpop.f32.mrb[12].mxu1  ;;  %v2264_v43 = vpop.f32.mrb[14].mxu0 }
 0x918   :  { %v18192_v46 = vpop.f32.mrb[13].mxu1  ;;  %v18242_v48 = vpop.f32.mrb[15].mxu0 }
 0x91b   :  { %v1596_v29 = vpop.f32.mrb[14].mxu1 }
 0x91c   :  { %v1597_v52 = vadd.f32 %v1596_v29, %v1520_v0  ;;  %v18197_v54 = vpop.f32.mrb[15].mxu1 }
 0x91f   :  { %v1670_v55 = vpop.f32.mrb[16].mxu1 }
 0x920   :  { %v1671_v57 = vadd.f32 %v1670_v55, %v1597_v52  ;;  %v18202_v58 = vpop.f32.mrb[17].mxu1 }
 0x923   :  { %v1744_v60 = vpop.f32.mrb[18].mxu1 }
 0x924   :  { %v1745_v61 = vadd.f32 %v1744_v60, %v1671_v57  ;;  %v18207_v10 = vpop.f32.mrb[19].mxu1 }
 0x927   :  { %v1818_v12 = vpop.f32.mrb[20].mxu1 }
 0x928   :  { %v1819_v14 = vadd.f32 %v1818_v12, %v1745_v61  ;;  %v18212_v16 = vpop.f32.mrb[21].mxu1 }
 0x92b   :  { %v1890_v9 = vpop.f32.mrb[22].mxu1 }
 0x92c   :  { %v1891_v18 = vadd.f32 %v1890_v9, %v1819_v14  ;;  %v18217_v19 = vpop.f32.mrb[23].mxu1 }
 0x92e   :  { %v2344_v46 = vadd.f32 %v1891_v18, %v20948_v30 }
 0x92f   :  { %v1966_v22 = vpop.f32.mrb[24].mxu1 }
 0x930   :  { %v18222_v26 = vpop.f32.mrb[25].mxu1 }
 0x933   :  { %v2042_v21 = vpop.f32.mrb[26].mxu1 }
 0x934   :  { %v2043_v31 = vadd.f32 %v2042_v21, %v1966_v22  ;;  %v18227_v35 = vpop.f32.mrb[27].mxu1 }
 0x936   :  { %v2117_v7 = vadd.f32 %v2116_v41, %v2043_v31 }
 0x937   :  { %v2190_v17 = vpop.f32.mrb[28].mxu1 }
 0x938   :  { %v2191_v24 = vadd.f32 %v2190_v17, %v2117_v7  ;;  %v18237_v11 = vpop.f32.mrb[29].mxu1 }
 0x93a   :  { %v2265_v39 = vadd.f32 %v2264_v43, %v2191_v24 }
 0x93b   :  { %v2336_v33 = vpop.f32.mrb[30].mxu1 }
 0x93c   :  { %v2337_v40 = vadd.f32 %v2336_v33, %v2265_v39  ;;  %v18247_v50 = vpop.f32.mrb[31].mxu1 }
 0x93e   :  { %v2345_v0 = vadd.f32 %v20951_v28, %v2337_v40 }
 0x940   :  { %v2348_v48 = vrot.slane %v2345_v0, 7 }
 0x942   :  { %v2349_v20 = vsel %vm1343_vm11, %v2348_v48, %v2344_v46 }
 0x943   :  { %v2352_v41 = vsel %vm2351_vm1, %v2349_v20, -inf }
 0x944   :  { %2353 = vmax.xlane.f32.xlu1 %v2352_v41 }
 0x9d1   :  { %v2354_v29 = vpop.xlane.xlu1 %2353 }
 0x9d2   :  { %v2356_v52 = vrot.slane %v2354_v29, 1  ;;  %v2359_v43 = vsub.f32 %v2344_v46, %v2354_v29 }
 0x9d4   :  { %v2360_v54 = vsub.f32 %v2345_v0, %v2356_v52  ;;  %v2361_v55 = vmul.f32 1.442695, %v2359_v43 }
 0x9d6   :  { %v2363_v57 = vmul.f32 1.442695, %v2360_v54 }
 0x9d8   :  { %20120 = vpow2.f32 %v2363_v57 }
 0x9d9   :  { %20122 = vpow2.f32 %v2361_v55 }
 0x9e2   :  { %v20121_v58 = vpop.eup %20120 }
 0x9e3   :  { %v2367_v60 = vrot.slane %v20121_v58, 7  ;;  %v20123_v61 = vpop.eup %20122 }
 0x9e5   :  { %v2368_v10 = vsel %vm1343_vm11, %v2367_v60, %v20123_v61 }
 0x9e6   :  { %v2370_v12 = vsel %vm2351_vm1, %v2368_v10, 0.0 }
 0x9e7   :  { %2371 = vadd.xlane.f32.xlu0 %v2370_v12 }
 0xa74   :  { %v2372_v14 = vpop.xlane.xlu0 %2371 }
 0xa75   :  { %v2374_v16 = vrot.slane %v2372_v14, 1  ;;  %20124 = vrcp.f32 %v2372_v14 }
 0xa77   :  { %20126 = vrcp.f32 %v2374_v16 }
 0xa7f   :  { %v20125_v9 = vpop.eup %20124 }
 0xa80   :  { %v2378_v18 = vmul.f32 %v20125_v9, %v20123_v61 }
 0xa81   :  { %v20127_v19 = vpop.eup %20126 }
 0xa82   :  { %v2380_v22 = vmul.f32 %v20127_v19, %v20121_v58  ;;  %v2383_v26 = vsel %vm2381_vm2, %v2378_v18, 0 }
 0xa83   :  { %v2451_v4 = vand.u32 4294901760, %v2383_v26 }
 0xa84   :  { %v17046_v21 = vrot.slane %v2380_v22, 7  ;;  %v2832_v31 = vsel %vm2381_vm2, %v2380_v22, 0 }
 0xa85   :  { %v2452_v35 = vsub.f32 %v2383_v26, %v2451_v4  ;;  %v2900_v7 = vand.u32 4294901760, %v2832_v31 }
 0xa86   :  { %v20962_v17 = vsel %vm1343_vm11, %v17046_v21, %v2378_v18 }
 0xa87   :  { %v2453_v24 = vand.u32 4294901760, %v2452_v35  ;;  %v2901_v11 = vsub.f32 %v2832_v31, %v2900_v7 }
 0xa89   :  { %v2454_v27 = vsub.f32 %v2452_v35, %v2453_v24  ;;  %v2902_v39 = vand.u32 4294901760, %v2901_v11 }
 0xa8b   :  { %v2455_v33 = vand.u32 4294901760, %v2454_v27  ;;  %v2903_v40 = vsub.f32 %v2901_v11, %v2902_v39 }
 0xa8d   :  { %18251 = vmatmul.mubr.f32.vlgmr.msra.gmra.mrb[16].mxu0 %v2455_v33  ;;  %v2904_v50 = vand.u32 4294901760, %v2903_v40 }
 0xa8e   :  { %18254 = vmatpush3.msra.mxu0 %v20897_v63  ;;  %18255 = vmatprep.mubr.msk.f32.mxu0 %vm20273_vm0, %v20274_v6 }
 0xa8f   :  { %18281 = vmatmul.mubr.f32.vlgmr.msra.gmra.mrb[32].mxu1 %v2904_v50  ;;  %18258 = vmatprep.subr.mxu0 %v20274_v6 }
 0xa90   :  { %18284 = vmatpush3.msra.mxu1 %v20929_v47  ;;  %18285 = vmatprep.mubr.msk.f32.mxu1 %vm20273_vm0, %v20274_v6 }
 0xa91   :  { %18288 = vmatprep.subr.mxu1 %v20274_v6 }
 0xa95   :  { %18256 = vmatmul.mubr.f32.vlgmr.msra.gmra.mrb[16].mxu0 %v2451_v4 }
 0xa96   :  { %18259 = vmatpush3.msra.mxu0 %v20881_v23  ;;  %18260 = vmatprep.mubr.msk.f32.mxu0 %vm20273_vm0, %v20274_v6 }
 0xa97   :  { %18286 = vmatmul.mubr.f32.vlgmr.msra.gmra.mrb[32].mxu1 %v2900_v7  ;;  %18263 = vmatprep.subr.mxu0 %v20274_v6 }
 0xa98   :  { %18289 = vmatpush3.msra.mxu1 %v20848_v62  ;;  %18290 = vmatprep.mubr.msk.f32.mxu1 %vm20273_vm0, %v20274_v6 }
 0xa99   :  { %18293 = vmatprep.subr.mxu1 %v20274_v6 }
 0xa9d   :  { %18261 = vmatmul.mubr.f32.vlgmr.msra.gmra.mrb[16].mxu0 %v2452_v35 }
 0xa9e   :  { %18264 = vmatpush3.msra.mxu0 %v20831_v44  ;;  %18265 = vmatprep.mubr.msk.f32.mxu0 %vm20273_vm0, %v20274_v6 }
 0xa9f   :  { %18291 = vmatmul.mubr.f32.vlgmr.msra.gmra.mrb[32].mxu1 %v2901_v11  ;;  %18268 = vmatprep.subr.mxu0 %v20274_v6 }
 0xaa0   :  { %18294 = vmatpush3.msra.mxu1 %v20844_v53  ;;  %18295 = vmatprep.mubr.msk.f32.mxu1 %vm20273_vm0, %v20274_v6 }
 0xaa1   :  { %18298 = vmatprep.subr.mxu1 %v20274_v6 }
 0xaa5   :  { %18266 = vmatmul.mubr.f32.vlgmr.msra.gmra.mrb[16].mxu0 %v2453_v24 }
 0xaa6   :  { %18269 = vmatpush3.msra.mxu0 %v20886_v34  ;;  %18270 = vmatprep.mubr.msk.f32.mxu0 %vm20273_vm0, %v20274_v6 }
 0xaa7   :  { %18296 = vmatmul.mubr.f32.vlgmr.msra.gmra.mrb[32].mxu1 %v2902_v39  ;;  %18273 = vmatprep.subr.mxu0 %v20274_v6 }
 0xaa8   :  { %18299 = vmatpush3.msra.mxu1 %v20889_v25  ;;  %18300 = vmatprep.mubr.msk.f32.mxu1 %vm20273_vm0, %v20274_v6 }
 0xaa9   :  { %18303 = vmatprep.subr.mxu1 %v20274_v6 }
 0xaad   :  { %18271 = vmatmul.mubr.f32.vlgmr.msra.gmra.mrb[16].mxu0 %v2451_v4 }
 0xaae   :  { %18274 = vmatpush3.msra.mxu0 %v20831_v44  ;;  %18275 = vmatprep.mubr.msk.f32.mxu0 %vm20273_vm0, %v20274_v6 }
 0xaaf   :  { %18301 = vmatmul.mubr.f32.vlgmr.msra.gmra.mrb[32].mxu1 %v2900_v7  ;;  %19695 = vmatprep.subr.bf16.mxu0 %v20272_v3 }
 0xab0   :  { %18304 = vmatpush3.msra.mxu1 %v20844_v53  ;;  %18305 = vmatprep.mubr.msk.f32.mxu1 %vm20273_vm0, %v20274_v6 }
 0xab1   :  { %18343 = vmatprep.subr.mxu1 %v20274_v6 }
 0xab5   :  { %18276 = vmatmul.mubr.f32.vlgmr.msra.gmra.mrb[16].mxu0 %v2451_v4 }
 0xab6   :  { %19697 = vmatpush3.bf16.msra.mxu0 %v20722_v32  ;;  %18340 = vmatprep.mubr.msk.f32.mxu0 %vm20273_vm0, %v20274_v6 }
 0xab7   :  { %18306 = vmatmul.mubr.f32.vlgmr.msra.gmra.mrb[32].mxu1 %v2900_v7  ;;  %19698 = vmatprep.subr.bf16.mxu0 %v20272_v3 }
 0xab8   :  { %18344 = vmatpush3.xpose.msra.mxu1 %v20831_v44  ;;  %18345 = vmatprep.mubr.msk.f32.mxu1 %vm20273_vm0, %v20274_v6 }
 0xab9   :  { %18348 = vmatprep.subr.mxu1 %v20274_v6 }
 0xaba   :  { %19700 = vmatpush3.bf16.msra.mxu0 %v20732_v37 }
 0xabb   :  { %19701 = vmatprep.subr.bf16.mxu0 %v20272_v3 }
 0xabe   :  { %19703 = vmatpush3.bf16.msra.mxu0 %v20748_v38 }
 0xabf   :  { %19704 = vmatprep.subr.bf16.mxu0 %v20272_v3 }
 0xac2   :  { %19706 = vmatpush3.bf16.msra.mxu0 %v20764_v42 }
 0xac3   :  { %19707 = vmatprep.subr.bf16.mxu0 %v20272_v3 }
 0xac6   :  { %19709 = vmatpush3.bf16.msra.mxu0 %v20774_v45 }
 0xac7   :  { %19710 = vmatprep.subr.bf16.mxu0 %v20272_v3 }
 0xaca   :  { %19712 = vmatpush3.bf16.msra.mxu0 %v20785_v49 }
 0xacb   :  { %19713 = vmatprep.subr.bf16.mxu0 %v20272_v3 }
 0xace   :  { %19715 = vmatpush3.bf16.msra.mxu0 %v20803_v56 }
 0xacf   :  { %19716 = vmatprep.subr.bf16.mxu0 %v20272_v3 }
 0xad2   :  { %19718 = vmatpush3.bf16.msra.mxu0 %v20815_v59 }
 0xad3   :  { %18383 = vmatprep.subr.mxu0 %v20274_v6 }
 0xad5   :  { %18341 = vmatmul.mubr.f32.vlgmr.msra.gmra.mrb[18].mxu0 %v20874_v36 }
 0xad6   :  { %18385 = vmatprep.mubr.msk.f32.mxu0 %vm20273_vm0, %v20274_v6 }
 0xadb   :  { %18384 = vmatpush3.xpose.msra.mxu0 %v20848_v62 }
 0xadc   :  { %18393 = vmatprep.subr.mxu0 %v20274_v6 }
 0xb88   :  { %v2827_v0 = vpop.f32.mrb[16].mxu0 }
 0xb89   :  { %v18277_v46 = vpop.f32.mrb[17].mxu0 }
 0xb8a   :  { %v3276_v48 = vpop.f32.mrb[32].mxu1 }
 0xb8b   :  { %v16810_v20 = vrot.slane %v3276_v48, 7  ;;  %v18307_v41 = vpop.f32.mrb[33].mxu1 }
 0xb8d   :  { %v21032_v29 = vsel %vm1343_vm11, %v16810_v20, %v2827_v0 }
 0xba8   :  { %v3346_v52 = vpop.f32.mrb[18].mxu0 }
 0xba9   :  { %v3351_v43 = vrot.slane %v3346_v52, 6  ;;  %v18342_v54 = vpop.f32.mrb[19].mxu0 }
 0xbab   :  { %v3353_v55 = vadd.f32 %v3351_v43, %v20871_v15 }
 0xbad   :  { %20128 = vtanh.f32 %v3353_v55 }
 0xbb7   :  { %v21035_v57 = vpop.eup %20128 }
 0xbb8   :  { %v3358_v58 = vadd.f32 %v21035_v57, %v20854_v2 }
 0xbba   :  { %v3366_v60 = vrot.slane %v3358_v58, %v20527_v51 }
 0xbbc   :  { %v3367_v61 = vcombine.high %v3366_v60, %v3366_v60  ;;  %v3374_v10 = vrot.slane %v3366_v60, %v20527_v51 }
 0xbbe   :  { %v3381_v12 = vrot.slane %v3367_v61, %v20527_v51  ;;  %v3382_v14 = vcombine.high %v3374_v10, %v3374_v10 }
 0xbc0   :  { %v3383_v16 = vcombine.high %v3381_v12, %v3381_v12  ;;  %v3452_v9 = vand.u32 4294901760, %v3382_v14 }
 0xbc2   :  { %v3898_v18 = vand.u32 4294901760, %v3383_v16  ;;  %v3453_v19 = vsub.f32 %v3382_v14, %v3452_v9 }
 0xbc4   :  { %v3899_v22 = vsub.f32 %v3383_v16, %v3898_v18  ;;  %v3454_v26 = vand.u32 4294901760, %v3453_v19 }
 0xbc6   :  { %18386 = vmatmul.mubr.f32.vlgmr.msra.gmra.mrb[20].mxu0 %v3899_v22  ;;  %v3455_v4 = vsub.f32 %v3453_v19, %v3454_v26  ;;  %v3900_v31 = vand.u32 4294901760, %v3899_v22 }
 0xbc7   :  { %18394 = vmatpush3.xpose.msra.mxu0 %v20889_v25  ;;  %18395 = vmatprep.mubr.msk.f32.mxu0 %vm20273_vm0, %v20274_v6 }
 0xbc8   :  { %18403 = vmatprep.subr.mxu0 %v20274_v6  ;;  %v3456_v21 = vand.u32 4294901760, %v3455_v4  ;;  %v3901_v35 = vsub.f32 %v3899_v22, %v3900_v31 }
 0xbca   :  { %18346 = vmatmul.mubr.f32.vlgmr.msra.gmra.mrb[34].mxu1 %v3456_v21  ;;  %18396 = vmatmul.mubr.f32.vlgmr.msra.gmra.mrb[22].mxu0 %v3898_v18  ;;  %v3902_v7 = vand.u32 4294901760, %v3901_v35 }
 0xbcb   :  { %18349 = vmatpush3.xpose.msra.mxu1 %v20897_v63  ;;  %18404 = vmatpush3.msra.mxu0 %v20831_v44 }
 0xbcc   :  { %18350 = vmatprep.mubr.msk.f32.mxu1 %vm20273_vm0, %v20274_v6  ;;  %18353 = vmatprep.subr.mxu1 %v20274_v6 }
 0xbcd   :  { %18405 = vmatprep.mubr.msk.f32.mxu0 %vm20273_vm0, %v20274_v6  ;;  %18408 = vmatprep.subr.mxu0 %v20274_v6 }
 0xbce   :  { %18351 = vmatmul.mubr.f32.vlgmr.msra.gmra.mrb[36].mxu1 %v3452_v9 }
 0xbcf   :  { %18354 = vmatpush3.xpose.msra.mxu1 %v20881_v23  ;;  %18355 = vmatprep.mubr.msk.f32.mxu1 %vm20273_vm0, %v20274_v6 }
 0xbd0   :  { %18358 = vmatprep.subr.mxu1 %v20274_v6 }
 0xbd2   :  { %18356 = vmatmul.mubr.f32.vlgmr.msra.gmra.mrb[38].mxu1 %v3453_v19 }
 0xbd3   :  { %18359 = vmatpush3.xpose.msra.mxu1 %v20831_v44  ;;  %18360 = vmatprep.mubr.msk.f32.mxu1 %vm20273_vm0, %v20274_v6 }
 0xbd4   :  { %18363 = vmatprep.subr.mxu1 %v20274_v6 }
 0xbd6   :  { %18361 = vmatmul.mubr.f32.vlgmr.msra.gmra.mrb[40].mxu1 %v3454_v26 }
 0xbd7   :  { %18364 = vmatpush3.xpose.msra.mxu1 %v20886_v34  ;;  %18365 = vmatprep.mubr.msk.f32.mxu1 %vm20273_vm0, %v20274_v6 }
 0xbd8   :  { %18368 = vmatprep.subr.mxu1 %v20274_v6 }
 0xbda   :  { %18366 = vmatmul.mubr.f32.vlgmr.msra.gmra.mrb[42].mxu1 %v3452_v9 }
 0xbdb   :  { %18369 = vmatpush3.xpose.msra.mxu1 %v20831_v44  ;;  %18370 = vmatprep.mubr.msk.f32.mxu1 %vm20273_vm0, %v20274_v6 }
 0xbdc   :  { %18373 = vmatprep.subr.mxu1 %v20274_v6 }
 0xbde   :  { %18371 = vmatmul.mubr.f32.vlgmr.msra.gmra.mrb[44].mxu1 %v3452_v9 }
 0xbdf   :  { %18374 = vmatpush3.xpose.msra.mxu1 %v20844_v53  ;;  %18375 = vmatprep.mubr.msk.f32.mxu1 %vm20273_vm0, %v20274_v6 }
 0xbe0   :  { %18378 = vmatprep.subr.mxu1 %v20274_v6 }
 0xbe2   :  { %18376 = vmatmul.mubr.f32.vlgmr.msra.gmra.mrb[46].mxu1 %v3902_v7 }
 0xbe3   :  { %18379 = vmatpush3.xpose.msra.mxu1 %v20929_v47  ;;  %18380 = vmatprep.mubr.msk.f32.mxu1 %vm20273_vm0, %v20274_v6 }
 0xbe4   :  { %18388 = vmatprep.subr.mxu1 %v20274_v6 }
 0xbe6   :  { %18381 = vmatmul.mubr.f32.vlgmr.msra.gmra.mrb[48].mxu1 %v3898_v18 }
 0xbe7   :  { %18389 = vmatpush3.xpose.msra.mxu1 %v20844_v53  ;;  %18390 = vmatprep.mubr.msk.f32.mxu1 %vm20273_vm0, %v20274_v6 }
 0xbe8   :  { %18398 = vmatprep.subr.mxu1 %v20274_v6 }
 0xbea   :  { %18391 = vmatmul.mubr.f32.vlgmr.msra.gmra.mrb[50].mxu1 %v3900_v31 }
 0xbeb   :  { %18399 = vmatpush3.xpose.msra.mxu1 %v20844_v53  ;;  %18400 = vmatprep.mubr.msk.f32.mxu1 %vm20273_vm0, %v20274_v6 }
 0xbec   :  { %18433 = vmatprep.subr.mxu1 %v20274_v6 }
 0xbee   :  { %18401 = vmatmul.mubr.f32.vlgmr.msra.gmra.mrb[52].mxu1 %v3898_v18 }
 0xbef   :  { %18434 = vmatpush3.msra.mxu1 %v20844_v53  ;;  %18435 = vmatprep.mubr.msk.f32.mxu1 %vm20273_vm0, %v20274_v6 }
 0xbf0   :  { %18438 = vmatprep.subr.mxu1 %v20274_v6 }
 0xc99   :  { %v4054_v24 = vpop.f32.mrb[20].mxu0 }
 0xc9a   :  { %v18387_v11 = vpop.f32.mrb[21].mxu0 }
 0xc9d   :  { %v3458_v27 = vpop.f32.mrb[34].mxu1  ;;  %v4202_v39 = vpop.f32.mrb[22].mxu0 }
 0xc9e   :  { %v18347_v33 = vpop.f32.mrb[35].mxu1  ;;  %v18397_v40 = vpop.f32.mrb[23].mxu0 }
 0xca1   :  { %v3534_v50 = vpop.f32.mrb[36].mxu1 }
 0xca2   :  { %v3535_v0 = vadd.f32 %v3534_v50, %v3458_v27  ;;  %v18352_v46 = vpop.f32.mrb[37].mxu1 }
 0xca5   :  { %v3608_v48 = vpop.f32.mrb[38].mxu1 }
 0xca6   :  { %v3609_v20 = vadd.f32 %v3608_v48, %v3535_v0  ;;  %v18357_v41 = vpop.f32.mrb[39].mxu1 }
 0xca9   :  { %v3682_v52 = vpop.f32.mrb[40].mxu1 }
 0xcaa   :  { %v3683_v43 = vadd.f32 %v3682_v52, %v3609_v20  ;;  %v18362_v54 = vpop.f32.mrb[41].mxu1 }
 0xcad   :  { %v3756_v55 = vpop.f32.mrb[42].mxu1 }
 0xcae   :  { %v3757_v58 = vadd.f32 %v3756_v55, %v3683_v43  ;;  %v18367_v60 = vpop.f32.mrb[43].mxu1 }
 0xcb1   :  { %v3828_v61 = vpop.f32.mrb[44].mxu1 }
 0xcb2   :  { %v3829_v10 = vadd.f32 %v3828_v61, %v3757_v58  ;;  %v18372_v12 = vpop.f32.mrb[45].mxu1 }
 0xcb4   :  { %v4278_v33 = vadd.f32 %v3829_v10, %v20948_v30 }
 0xcb5   :  { %v3904_v14 = vpop.f32.mrb[46].mxu1 }
 0xcb6   :  { %v18377_v16 = vpop.f32.mrb[47].mxu1 }
 0xcb9   :  { %v3980_v9 = vpop.f32.mrb[48].mxu1 }
 0xcba   :  { %v3981_v18 = vadd.f32 %v3980_v9, %v3904_v14  ;;  %v18382_v19 = vpop.f32.mrb[49].mxu1 }
 0xcbc   :  { %v4055_v22 = vadd.f32 %v4054_v24, %v3981_v18 }
 0xcbd   :  { %v4128_v26 = vpop.f32.mrb[50].mxu1 }
 0xcbe   :  { %v4129_v4 = vadd.f32 %v4128_v26, %v4055_v22  ;;  %v18392_v21 = vpop.f32.mrb[51].mxu1 }
 0xcc0   :  { %v4203_v31 = vadd.f32 %v4202_v39, %v4129_v4 }
 0xcc1   :  { %v4274_v35 = vpop.f32.mrb[52].mxu1 }
 0xcc2   :  { %v4275_v7 = vadd.f32 %v4274_v35, %v4203_v31  ;;  %v18402_v11 = vpop.f32.mrb[53].mxu1 }
 0xcc4   :  { %v4279_v27 = vadd.f32 %v4275_v7, %v20951_v28 }
 0xcc6   :  { %v4282_v40 = vrot.slane %v4279_v27, 7 }
 0xcc8   :  { %v4283_v50 = vsel %vm1343_vm11, %v4282_v40, %v4278_v33 }
 0xcc9   :  { %v4285_v0 = vsel %vm2351_vm1, %v4283_v50, -inf }
 0xcca   :  { %4286 = vmax.xlane.f32.xlu0 %v4285_v0 }
 0xd57   :  { %v4287_v46 = vpop.xlane.xlu0 %4286 }
 0xd58   :  { %v4289_v48 = vrot.slane %v4287_v46, 1  ;;  %v4292_v24 = vsub.f32 %v4278_v33, %v4287_v46 }
 0xd5a   :  { %v4293_v20 = vsub.f32 %v4279_v27, %v4289_v48  ;;  %v4294_v41 = vmul.f32 1.442695, %v4292_v24 }
 0xd5c   :  { %v4296_v52 = vmul.f32 1.442695, %v4293_v20 }
 0xd5e   :  { %20130 = vpow2.f32 %v4296_v52 }
 0xd5f   :  { %20132 = vpow2.f32 %v4294_v41 }
 0xd68   :  { %v20131_v39 = vpop.eup %20130 }
 0xd69   :  { %v4300_v43 = vrot.slane %v20131_v39, 7  ;;  %v20133_v54 = vpop.eup %20132 }
 0xd6b   :  { %v4301_v55 = vsel %vm1343_vm11, %v4300_v43, %v20133_v54 }
 0xd6c   :  { %v4303_v58 = vsel %vm2351_vm1, %v4301_v55, 0.0 }
 0xd6d   :  { %4304 = vadd.xlane.f32.xlu1 %v4303_v58 }
 0xdfa   :  { %v4305_v60 = vpop.xlane.xlu1 %4304 }
 0xdfb   :  { %v4307_v61 = vrot.slane %v4305_v60, 1  ;;  %20134 = vrcp.f32 %v4305_v60 }
 0xdfd   :  { %20136 = vrcp.f32 %v4307_v61 }
 0xe05   :  { %v20135_v10 = vpop.eup %20134 }
 0xe06   :  { %v4311_v12 = vmul.f32 %v20135_v10, %v20133_v54  ;;  %v16802_v10 = vsel %vm1032_vm3, %v20874_v36, %v21035_v57 }
 0xe07   :  { %v20137_v14 = vpop.eup %20136 }
 0xe08   :  { %v4313_v16 = vmul.f32 %v20137_v14, %v20131_v39  ;;  %v4315_v9 = vsel %vm2381_vm2, %v4311_v12, 0  ;;  %v17049_v19 = vrot.slane %v4311_v12, 6 }
 0xe09   :  { %v4383_v18 = vand.u32 4294901760, %v4315_v9 }
 0xe0a   :  { %v17050_v22 = vrot.slane %v4313_v16, 5  ;;  %v4764_v26 = vsel %vm2381_vm2, %v4313_v16, 0 }
 0xe0b   :  { %v4384_v4 = vsub.f32 %v4315_v9, %v4383_v18  ;;  %v4832_v21 = vand.u32 4294901760, %v4764_v26 }
 0xe0c   :  { %v17051_v31 = vsel %vm3355_vm12, %v17050_v22, %v17049_v19 }
 0xe0d   :  { %v4385_v35 = vand.u32 4294901760, %v4384_v4  ;;  %v4833_v7 = vsub.f32 %v4764_v26, %v4832_v21  ;;  %v21101_v11 = vsel %vm1032_vm3, %v20962_v17, %v17051_v31  ;;  %v5213_v17 = vrot.slane %v21035_v57, 2 }
 0xe0f   :  { %v4386_v27 = vsub.f32 %v4384_v4, %v4385_v35  ;;  %v4834_v33 = vand.u32 4294901760, %v4833_v7 }
 0xe11   :  { %v4387_v40 = vand.u32 4294901760, %v4386_v27  ;;  %v4835_v50 = vsub.f32 %v4833_v7, %v4834_v33 }
 0xe13   :  { %18406 = vmatmul.mubr.f32.vlgmr.msra.gmra.mrb[24].mxu0 %v4387_v40  ;;  %v4836_v0 = vand.u32 4294901760, %v4835_v50 }
 0xe14   :  { %18409 = vmatpush3.msra.mxu0 %v20897_v63  ;;  %18410 = vmatprep.mubr.msk.f32.mxu0 %vm20273_vm0, %v20274_v6 }
 0xe15   :  { %18436 = vmatmul.mubr.f32.vlgmr.msra.gmra.mrb[54].mxu1 %v4836_v0  ;;  %18413 = vmatprep.subr.mxu0 %v20274_v6 }
 0xe16   :  { %18439 = vmatpush3.msra.mxu1 %v20929_v47  ;;  %18440 = vmatprep.mubr.msk.f32.mxu1 %vm20273_vm0, %v20274_v6 }
 0xe17   :  { %18443 = vmatprep.subr.mxu1 %v20274_v6 }
 0xe1b   :  { %18411 = vmatmul.mubr.f32.vlgmr.msra.gmra.mrb[24].mxu0 %v4383_v18 }
 0xe1c   :  { %18414 = vmatpush3.msra.mxu0 %v20881_v23  ;;  %18415 = vmatprep.mubr.msk.f32.mxu0 %vm20273_vm0, %v20274_v6 }
 0xe1d   :  { %18441 = vmatmul.mubr.f32.vlgmr.msra.gmra.mrb[54].mxu1 %v4832_v21  ;;  %18418 = vmatprep.subr.mxu0 %v20274_v6 }
 0xe1e   :  { %18444 = vmatpush3.msra.mxu1 %v20848_v62  ;;  %18445 = vmatprep.mubr.msk.f32.mxu1 %vm20273_vm0, %v20274_v6 }
 0xe1f   :  { %18448 = vmatprep.subr.mxu1 %v20274_v6 }
 0xe23   :  { %18416 = vmatmul.mubr.f32.vlgmr.msra.gmra.mrb[24].mxu0 %v4384_v4 }
 0xe24   :  { %18419 = vmatpush3.msra.mxu0 %v20831_v44  ;;  %18420 = vmatprep.mubr.msk.f32.mxu0 %vm20273_vm0, %v20274_v6 }
 0xe25   :  { %18446 = vmatmul.mubr.f32.vlgmr.msra.gmra.mrb[54].mxu1 %v4833_v7  ;;  %18423 = vmatprep.subr.mxu0 %v20274_v6 }
 0xe26   :  { %18449 = vmatpush3.msra.mxu1 %v20844_v53  ;;  %18450 = vmatprep.mubr.msk.f32.mxu1 %vm20273_vm0, %v20274_v6 }
 0xe27   :  { %18453 = vmatprep.subr.mxu1 %v20274_v6 }
 0xe2b   :  { %18421 = vmatmul.mubr.f32.vlgmr.msra.gmra.mrb[24].mxu0 %v4385_v35 }
 0xe2c   :  { %18424 = vmatpush3.msra.mxu0 %v20886_v34  ;;  %18425 = vmatprep.mubr.msk.f32.mxu0 %vm20273_vm0, %v20274_v6 }
 0xe2d   :  { %18451 = vmatmul.mubr.f32.vlgmr.msra.gmra.mrb[54].mxu1 %v4834_v33  ;;  %18428 = vmatprep.subr.mxu0 %v20274_v6 }
 0xe2e   :  { %18454 = vmatpush3.msra.mxu1 %v20889_v25  ;;  %18455 = vmatprep.mubr.msk.f32.mxu1 %vm20273_vm0, %v20274_v6 }
 0xe2f   :  { %18458 = vmatprep.subr.mxu1 %v20274_v6 }
 0xe33   :  { %18426 = vmatmul.mubr.f32.vlgmr.msra.gmra.mrb[24].mxu0 %v4383_v18 }
 0xe34   :  { %18429 = vmatpush3.msra.mxu0 %v20831_v44  ;;  %18430 = vmatprep.mubr.msk.f32.mxu0 %vm20273_vm0, %v20274_v6 }
 0xe35   :  { %18456 = vmatmul.mubr.f32.vlgmr.msra.gmra.mrb[54].mxu1 %v4832_v21  ;;  %19719 = vmatprep.subr.bf16.mxu0 %v20272_v3 }
 0xe36   :  { %18459 = vmatpush3.msra.mxu1 %v20844_v53  ;;  %18460 = vmatprep.mubr.msk.f32.mxu1 %vm20273_vm0, %v20274_v6 }
 0xe37   :  { %18498 = vmatprep.subr.mxu1 %v20274_v6 }
 0xe3b   :  { %18431 = vmatmul.mubr.f32.vlgmr.msra.gmra.mrb[24].mxu0 %v4383_v18 }
 0xe3c   :  { %19721 = vmatpush3.bf16.msra.mxu0 %v20722_v32  ;;  %18495 = vmatprep.mubr.msk.f32.mxu0 %vm20273_vm0, %v20274_v6 }
 0xe3d   :  { %18461 = vmatmul.mubr.f32.vlgmr.msra.gmra.mrb[54].mxu1 %v4832_v21  ;;  %19722 = vmatprep.subr.bf16.mxu0 %v20272_v3 }
 0xe3e   :  { %18499 = vmatpush3.xpose.msra.mxu1 %v20831_v44  ;;  %18500 = vmatprep.mubr.msk.f32.mxu1 %vm20273_vm0, %v20274_v6 }
 0xe3f   :  { %18503 = vmatprep.subr.mxu1 %v20274_v6 }
 0xe40   :  { %19724 = vmatpush3.bf16.msra.mxu0 %v20732_v37 }
 0xe41   :  { %19725 = vmatprep.subr.bf16.mxu0 %v20272_v3 }
 0xe44   :  { %19727 = vmatpush3.bf16.msra.mxu0 %v20748_v38 }
 0xe45   :  { %19728 = vmatprep.subr.bf16.mxu0 %v20272_v3 }
 0xe48   :  { %19730 = vmatpush3.bf16.msra.mxu0 %v20764_v42 }
 0xe49   :  { %19731 = vmatprep.subr.bf16.mxu0 %v20272_v3 }
 0xe4c   :  { %19733 = vmatpush3.bf16.msra.mxu0 %v20774_v45 }
 0xe4d   :  { %19734 = vmatprep.subr.bf16.mxu0 %v20272_v3 }
 0xe50   :  { %19736 = vmatpush3.bf16.msra.mxu0 %v20785_v49 }
 0xe51   :  { %19737 = vmatprep.subr.bf16.mxu0 %v20272_v3 }
 0xe54   :  { %19739 = vmatpush3.bf16.msra.mxu0 %v20803_v56 }
 0xe55   :  { %19740 = vmatprep.subr.bf16.mxu0 %v20272_v3 }
 0xe58   :  { %19742 = vmatpush3.bf16.msra.mxu0 %v20815_v59 }
 0xe59   :  { %18538 = vmatprep.subr.mxu0 %v20274_v6 }
 0xe5b   :  { %18496 = vmatmul.mubr.f32.vlgmr.msra.gmra.mrb[26].mxu0 %v5213_v17 }
 0xe5c   :  { %18540 = vmatprep.mubr.msk.f32.mxu0 %vm20273_vm0, %v20274_v6 }
 0xe61   :  { %18539 = vmatpush3.xpose.msra.mxu0 %v20848_v62 }
 0xe62   :  { %18548 = vmatprep.subr.mxu0 %v20274_v6 }
 0xf0e   :  { %v4759_v46 = vpop.f32.mrb[24].mxu0 }
 0xf0f   :  { %v18432_v48 = vpop.f32.mrb[25].mxu0  ;;  %v16815_v20 = vrot.slane %v4759_v46, 6 }
 0xf10   :  { %v5208_v24 = vpop.f32.mrb[54].mxu1 }
 0xf11   :  { %v16816_v41 = vrot.slane %v5208_v24, 5  ;;  %v18462_v52 = vpop.f32.mrb[55].mxu1 }
 0xf13   :  { %v16817_v39 = vsel %vm3355_vm12, %v16816_v41, %v16815_v20 }
 0xf14   :  { %v21173_v43 = vsel %vm1032_vm3, %v21032_v29, %v16817_v39 }
 0xf2e   :  { %v5281_v54 = vpop.f32.mrb[26].mxu0 }
 0xf2f   :  { %v5286_v55 = vrot.slane %v5281_v54, 4  ;;  %v18497_v58 = vpop.f32.mrb[27].mxu0 }
 0xf31   :  { %v5288_v60 = vadd.f32 %v5286_v55, %v20871_v15 }
 0xf33   :  { %20138 = vtanh.f32 %v5288_v60 }
 0xf3d   :  { %v21176_v61 = vpop.eup %20138 }
 0xf3e   :  { %v5293_v12 = vadd.f32 %v21176_v61, %v20857_v5  ;;  %v21185_v14 = vsel %vm1038_vm5, %v16802_v10, %v21176_v61 }
 0xf40   :  { %v5295_v29 = vcombine.high %v5293_v12, %v5293_v12 }
 0xf42   :  { %v5302_v16 = vrot.slane %v5295_v29, %v20527_v51 }
 0xf44   :  { %v5303_v9 = vcombine.high %v5302_v16, %v5302_v16  ;;  %v5310_v18 = vrot.slane %v5302_v16, %v20527_v51 }
 0xf46   :  { %v5317_v19 = vrot.slane %v5303_v9, %v20527_v51  ;;  %v5386_v22 = vand.u32 4294901760, %v5310_v18 }
 0xf48   :  { %v5832_v26 = vand.u32 4294901760, %v5317_v19  ;;  %v5387_v4 = vsub.f32 %v5310_v18, %v5386_v22 }
 0xf4a   :  { %v5833_v21 = vsub.f32 %v5317_v19, %v5832_v26  ;;  %v5388_v36 = vand.u32 4294901760, %v5387_v4 }
 0xf4c   :  { %18541 = vmatmul.mubr.f32.vlgmr.msra.gmra.mrb[28].mxu0 %v5833_v21  ;;  %v5389_v57 = vsub.f32 %v5387_v4, %v5388_v36  ;;  %v5834_v35 = vand.u32 4294901760, %v5833_v21 }
 0xf4d   :  { %18549 = vmatpush3.xpose.msra.mxu0 %v20889_v25  ;;  %18550 = vmatprep.mubr.msk.f32.mxu0 %vm20273_vm0, %v20274_v6 }
 0xf4e   :  { %18558 = vmatprep.subr.mxu0 %v20274_v6  ;;  %v5390_v31 = vand.u32 4294901760, %v5389_v57  ;;  %v5835_v7 = vsub.f32 %v5833_v21, %v5834_v35 }
 0xf50   :  { %18501 = vmatmul.mubr.f32.vlgmr.msra.gmra.mrb[56].mxu1 %v5390_v31  ;;  %18551 = vmatmul.mubr.f32.vlgmr.msra.gmra.mrb[30].mxu0 %v5832_v26  ;;  %v5836_v27 = vand.u32 4294901760, %v5835_v7 }
 0xf51   :  { %18504 = vmatpush3.xpose.msra.mxu1 %v20897_v63  ;;  %18559 = vmatpush3.msra.mxu0 %v20831_v44 }
 0xf52   :  { %18505 = vmatprep.mubr.msk.f32.mxu1 %vm20273_vm0, %v20274_v6  ;;  %18508 = vmatprep.subr.mxu1 %v20274_v6 }
 0xf53   :  { %18560 = vmatprep.mubr.msk.f32.mxu0 %vm20273_vm0, %v20274_v6  ;;  %18563 = vmatprep.subr.mxu0 %v20274_v6 }
 0xf54   :  { %18506 = vmatmul.mubr.f32.vlgmr.msra.gmra.mrb[58].mxu1 %v5386_v22 }
 0xf55   :  { %18509 = vmatpush3.xpose.msra.mxu1 %v20881_v23  ;;  %18510 = vmatprep.mubr.msk.f32.mxu1 %vm20273_vm0, %v20274_v6 }
 0xf56   :  { %18513 = vmatprep.subr.mxu1 %v20274_v6 }
 0xf58   :  { %18511 = vmatmul.mubr.f32.vlgmr.msra.gmra.mrb[60].mxu1 %v5387_v4 }
 0xf59   :  { %18514 = vmatpush3.xpose.msra.mxu1 %v20831_v44  ;;  %18515 = vmatprep.mubr.msk.f32.mxu1 %vm20273_vm0, %v20274_v6 }
 0xf5a   :  { %18518 = vmatprep.subr.mxu1 %v20274_v6 }
 0xf5c   :  { %18516 = vmatmul.mubr.f32.vlgmr.msra.gmra.mrb[62].mxu1 %v5388_v36 }
 0xf5d   :  { %18519 = vmatpush3.xpose.msra.mxu1 %v20886_v34  ;;  %18520 = vmatprep.mubr.msk.f32.mxu1 %vm20273_vm0, %v20274_v6 }
 0xf5e   :  { %18523 = vmatprep.subr.mxu1 %v20274_v6 }
 0xf60   :  { %18521 = vmatmul.mubr.f32.vlgmr.msra.gmra.mrb[64].mxu1 %v5386_v22 }
 0xf61   :  { %18524 = vmatpush3.xpose.msra.mxu1 %v20831_v44  ;;  %18525 = vmatprep.mubr.msk.f32.mxu1 %vm20273_vm0, %v20274_v6 }
 0xf62   :  { %18528 = vmatprep.subr.mxu1 %v20274_v6 }
 0xf64   :  { %18526 = vmatmul.mubr.f32.vlgmr.msra.gmra.mrb[66].mxu1 %v5386_v22 }
 0xf65   :  { %18529 = vmatpush3.xpose.msra.mxu1 %v20844_v53  ;;  %18530 = vmatprep.mubr.msk.f32.mxu1 %vm20273_vm0, %v20274_v6 }
 0xf66   :  { %18533 = vmatprep.subr.mxu1 %v20274_v6 }
 0xf68   :  { %18531 = vmatmul.mubr.f32.vlgmr.msra.gmra.mrb[68].mxu1 %v5836_v27 }
 0xf69   :  { %18534 = vmatpush3.xpose.msra.mxu1 %v20929_v47  ;;  %18535 = vmatprep.mubr.msk.f32.mxu1 %vm20273_vm0, %v20274_v6 }
 0xf6a   :  { %18543 = vmatprep.subr.mxu1 %v20274_v6 }
 0xf6c   :  { %18536 = vmatmul.mubr.f32.vlgmr.msra.gmra.mrb[70].mxu1 %v5832_v26 }
 0xf6d   :  { %18544 = vmatpush3.xpose.msra.mxu1 %v20844_v53  ;;  %18545 = vmatprep.mubr.msk.f32.mxu1 %vm20273_vm0, %v20274_v6 }
 0xf6e   :  { %18553 = vmatprep.subr.mxu1 %v20274_v6 }
 0xf70   :  { %18546 = vmatmul.mubr.f32.vlgmr.msra.gmra.mrb[72].mxu1 %v5834_v35 }
 0xf71   :  { %18554 = vmatpush3.xpose.msra.mxu1 %v20844_v53  ;;  %18555 = vmatprep.mubr.msk.f32.mxu1 %vm20273_vm0, %v20274_v6 }
 0xf72   :  { %18588 = vmatprep.subr.mxu1 %v20274_v6 }
 0xf74   :  { %18556 = vmatmul.mubr.f32.vlgmr.msra.gmra.mrb[74].mxu1 %v5832_v26 }
 0xf75   :  { %18589 = vmatpush3.msra.mxu1 %v20844_v53  ;;  %18590 = vmatprep.mubr.msk.f32.mxu1 %vm20273_vm0, %v20274_v6 }
 0xf76   :  { %18593 = vmatprep.subr.mxu1 %v20274_v6 }
0x101f   :  { %v5988_v33 = vpop.f32.mrb[28].mxu0 }
0x1020   :  { %v18542_v40 = vpop.f32.mrb[29].mxu0 }
0x1023   :  { %v5392_v50 = vpop.f32.mrb[56].mxu1  ;;  %v6136_v0 = vpop.f32.mrb[30].mxu0 }
0x1024   :  { %v18502_v17 = vpop.f32.mrb[57].mxu1  ;;  %v18552_v46 = vpop.f32.mrb[31].mxu0 }
0x1027   :  { %v5468_v48 = vpop.f32.mrb[58].mxu1 }
0x1028   :  { %v5469_v24 = vadd.f32 %v5468_v48, %v5392_v50  ;;  %v18507_v20 = vpop.f32.mrb[59].mxu1 }
0x102b   :  { %v5542_v41 = vpop.f32.mrb[60].mxu1 }
0x102c   :  { %v5543_v52 = vadd.f32 %v5542_v41, %v5469_v24  ;;  %v18512_v39 = vpop.f32.mrb[61].mxu1 }
0x102f   :  { %v5616_v54 = vpop.f32.mrb[62].mxu1 }
0x1030   :  { %v5617_v55 = vadd.f32 %v5616_v54, %v5543_v52  ;;  %v18517_v58 = vpop.f32.mrb[63].mxu1 }
0x1033   :  { %v5690_v60 = vpop.f32.mrb[64].mxu1 }
0x1034   :  { %v5691_v10 = vadd.f32 %v5690_v60, %v5617_v55  ;;  %v18522_v12 = vpop.f32.mrb[65].mxu1 }
0x1037   :  { %v5762_v29 = vpop.f32.mrb[66].mxu1 }
0x1038   :  { %v5763_v16 = vadd.f32 %v5762_v29, %v5691_v10  ;;  %v18527_v9 = vpop.f32.mrb[67].mxu1 }
0x103a   :  { %v6212_v17 = vadd.f32 %v5763_v16, %v20948_v30 }
0x103b   :  { %v5838_v18 = vpop.f32.mrb[68].mxu1 }
0x103c   :  { %v18532_v19 = vpop.f32.mrb[69].mxu1 }
0x103f   :  { %v5914_v22 = vpop.f32.mrb[70].mxu1 }
0x1040   :  { %v5915_v26 = vadd.f32 %v5914_v22, %v5838_v18  ;;  %v18537_v4 = vpop.f32.mrb[71].mxu1 }
0x1042   :  { %v5989_v21 = vadd.f32 %v5988_v33, %v5915_v26 }
0x1043   :  { %v6062_v36 = vpop.f32.mrb[72].mxu1 }
0x1044   :  { %v6063_v57 = vadd.f32 %v6062_v36, %v5989_v21  ;;  %v18547_v31 = vpop.f32.mrb[73].mxu1 }
0x1046   :  { %v6137_v35 = vadd.f32 %v6136_v0, %v6063_v57 }
0x1047   :  { %v6208_v7 = vpop.f32.mrb[74].mxu1 }
0x1048   :  { %v6209_v27 = vadd.f32 %v6208_v7, %v6137_v35  ;;  %v18557_v40 = vpop.f32.mrb[75].mxu1 }
0x104a   :  { %v6213_v50 = vadd.f32 %v6209_v27, %v20951_v28 }
0x104c   :  { %v6216_v46 = vrot.slane %v6213_v50, 7 }
0x104e   :  { %v6217_v48 = vsel %vm1343_vm11, %v6216_v46, %v6212_v17 }
0x104f   :  { %v6219_v24 = vsel %vm2351_vm1, %v6217_v48, -inf }
0x1050   :  { %6220 = vmax.xlane.f32.xlu0 %v6219_v24 }
0x10dd   :  { %v6221_v20 = vpop.xlane.xlu0 %6220 }
0x10de   :  { %v6223_v41 = vrot.slane %v6221_v20, 1  ;;  %v6226_v33 = vsub.f32 %v6212_v17, %v6221_v20 }
0x10e0   :  { %v6227_v52 = vsub.f32 %v6213_v50, %v6223_v41  ;;  %v6228_v39 = vmul.f32 1.442695, %v6226_v33 }
0x10e2   :  { %v6230_v54 = vmul.f32 1.442695, %v6227_v52 }
0x10e4   :  { %20140 = vpow2.f32 %v6230_v54 }
0x10e5   :  { %20142 = vpow2.f32 %v6228_v39 }
0x10ee   :  { %v20141_v0 = vpop.eup %20140 }
0x10ef   :  { %v6234_v55 = vrot.slane %v20141_v0, 7  ;;  %v20143_v58 = vpop.eup %20142 }
0x10f1   :  { %v6235_v60 = vsel %vm1343_vm11, %v6234_v55, %v20143_v58 }
0x10f2   :  { %v6237_v10 = vsel %vm2351_vm1, %v6235_v60, 0.0 }
0x10f3   :  { %6238 = vadd.xlane.f32.xlu1 %v6237_v10 }
0x1180   :  { %v6239_v12 = vpop.xlane.xlu1 %6238 }
0x1181   :  { %v6241_v29 = vrot.slane %v6239_v12, 1  ;;  %20144 = vrcp.f32 %v6239_v12 }
0x1183   :  { %20146 = vrcp.f32 %v6241_v29 }
0x118b   :  { %v20145_v16 = vpop.eup %20144 }
0x118c   :  { %v6245_v9 = vmul.f32 %v20145_v16, %v20143_v58 }
0x118d   :  { %v20147_v18 = vpop.eup %20146 }
0x118e   :  { %v6247_v19 = vmul.f32 %v20147_v18, %v20141_v0  ;;  %v6249_v22 = vsel %vm2381_vm2, %v6245_v9, 0  ;;  %v17053_v4 = vrot.slane %v6245_v9, 4 }
0x118f   :  { %v6317_v26 = vand.u32 4294901760, %v6249_v22 }
0x1190   :  { %v17054_v21 = vrot.slane %v6247_v19, 3  ;;  %v6698_v36 = vsel %vm2381_vm2, %v6247_v19, 0 }
0x1191   :  { %v6318_v57 = vsub.f32 %v6249_v22, %v6317_v26  ;;  %v6766_v31 = vand.u32 4294901760, %v6698_v36 }
0x1192   :  { %v17055_v35 = vsel %vm5290_vm13, %v17054_v21, %v17053_v4 }
0x1193   :  { %v6319_v7 = vand.u32 4294901760, %v6318_v57  ;;  %v6767_v27 = vsub.f32 %v6698_v36, %v6766_v31  ;;  %v21249_v40 = vsel %vm1038_vm5, %v21101_v11, %v17055_v35  ;;  %v7147_v11 = vrot.slane %v21176_v61, 4 }
0x1195   :  { %v6320_v50 = vsub.f32 %v6318_v57, %v6319_v7  ;;  %v6768_v17 = vand.u32 4294901760, %v6767_v27 }
0x1197   :  { %v6321_v46 = vand.u32 4294901760, %v6320_v50  ;;  %v6769_v48 = vsub.f32 %v6767_v27, %v6768_v17 }
0x1199   :  { %18561 = vmatmul.mubr.f32.vlgmr.msra.gmra.mrb[32].mxu0 %v6321_v46  ;;  %v6770_v24 = vand.u32 4294901760, %v6769_v48 }
0x119a   :  { %18564 = vmatpush3.msra.mxu0 %v20897_v63  ;;  %18565 = vmatprep.mubr.msk.f32.mxu0 %vm20273_vm0, %v20274_v6 }
0x119b   :  { %18591 = vmatmul.mubr.f32.vlgmr.msra.gmra.mrb[76].mxu1 %v6770_v24  ;;  %18568 = vmatprep.subr.mxu0 %v20274_v6 }
0x119c   :  { %18594 = vmatpush3.msra.mxu1 %v20929_v47  ;;  %18595 = vmatprep.mubr.msk.f32.mxu1 %vm20273_vm0, %v20274_v6 }
0x119d   :  { %18598 = vmatprep.subr.mxu1 %v20274_v6 }
0x11a1   :  { %18566 = vmatmul.mubr.f32.vlgmr.msra.gmra.mrb[32].mxu0 %v6317_v26 }
0x11a2   :  { %18569 = vmatpush3.msra.mxu0 %v20881_v23  ;;  %18570 = vmatprep.mubr.msk.f32.mxu0 %vm20273_vm0, %v20274_v6 }
0x11a3   :  { %18596 = vmatmul.mubr.f32.vlgmr.msra.gmra.mrb[76].mxu1 %v6766_v31  ;;  %18573 = vmatprep.subr.mxu0 %v20274_v6 }
0x11a4   :  { %18599 = vmatpush3.msra.mxu1 %v20848_v62  ;;  %18600 = vmatprep.mubr.msk.f32.mxu1 %vm20273_vm0, %v20274_v6 }
0x11a5   :  { %18603 = vmatprep.subr.mxu1 %v20274_v6 }
0x11a9   :  { %18571 = vmatmul.mubr.f32.vlgmr.msra.gmra.mrb[32].mxu0 %v6318_v57 }
0x11aa   :  { %18574 = vmatpush3.msra.mxu0 %v20831_v44  ;;  %18575 = vmatprep.mubr.msk.f32.mxu0 %vm20273_vm0, %v20274_v6 }
0x11ab   :  { %18601 = vmatmul.mubr.f32.vlgmr.msra.gmra.mrb[76].mxu1 %v6767_v27  ;;  %18578 = vmatprep.subr.mxu0 %v20274_v6 }
0x11ac   :  { %18604 = vmatpush3.msra.mxu1 %v20844_v53  ;;  %18605 = vmatprep.mubr.msk.f32.mxu1 %vm20273_vm0, %v20274_v6 }
0x11ad   :  { %18608 = vmatprep.subr.mxu1 %v20274_v6 }
0x11b1   :  { %18576 = vmatmul.mubr.f32.vlgmr.msra.gmra.mrb[32].mxu0 %v6319_v7 }
0x11b2   :  { %18579 = vmatpush3.msra.mxu0 %v20886_v34  ;;  %18580 = vmatprep.mubr.msk.f32.mxu0 %vm20273_vm0, %v20274_v6 }
0x11b3   :  { %18606 = vmatmul.mubr.f32.vlgmr.msra.gmra.mrb[76].mxu1 %v6768_v17  ;;  %18583 = vmatprep.subr.mxu0 %v20274_v6 }
0x11b4   :  { %18609 = vmatpush3.msra.mxu1 %v20889_v25  ;;  %18610 = vmatprep.mubr.msk.f32.mxu1 %vm20273_vm0, %v20274_v6 }
0x11b5   :  { %18613 = vmatprep.subr.mxu1 %v20274_v6 }
0x11b9   :  { %18581 = vmatmul.mubr.f32.vlgmr.msra.gmra.mrb[32].mxu0 %v6317_v26 }
0x11ba   :  { %18584 = vmatpush3.msra.mxu0 %v20831_v44  ;;  %18585 = vmatprep.mubr.msk.f32.mxu0 %vm20273_vm0, %v20274_v6 }
0x11bb   :  { %18611 = vmatmul.mubr.f32.vlgmr.msra.gmra.mrb[76].mxu1 %v6766_v31  ;;  %19743 = vmatprep.subr.bf16.mxu0 %v20272_v3 }
0x11bc   :  { %18614 = vmatpush3.msra.mxu1 %v20844_v53  ;;  %18615 = vmatprep.mubr.msk.f32.mxu1 %vm20273_vm0, %v20274_v6 }
0x11bd   :  { %18653 = vmatprep.subr.mxu1 %v20274_v6 }
0x11c1   :  { %18586 = vmatmul.mubr.f32.vlgmr.msra.gmra.mrb[32].mxu0 %v6317_v26 }
0x11c2   :  { %19745 = vmatpush3.bf16.msra.mxu0 %v20722_v32  ;;  %18650 = vmatprep.mubr.msk.f32.mxu0 %vm20273_vm0, %v20274_v6 }
0x11c3   :  { %18616 = vmatmul.mubr.f32.vlgmr.msra.gmra.mrb[76].mxu1 %v6766_v31  ;;  %19746 = vmatprep.subr.bf16.mxu0 %v20272_v3 }
0x11c4   :  { %18654 = vmatpush3.xpose.msra.mxu1 %v20831_v44  ;;  %18655 = vmatprep.mubr.msk.f32.mxu1 %vm20273_vm0, %v20274_v6 }
0x11c5   :  { %18658 = vmatprep.subr.mxu1 %v20274_v6 }
0x11c6   :  { %19748 = vmatpush3.bf16.msra.mxu0 %v20732_v37 }
0x11c7   :  { %19749 = vmatprep.subr.bf16.mxu0 %v20272_v3 }
0x11ca   :  { %19751 = vmatpush3.bf16.msra.mxu0 %v20748_v38 }
0x11cb   :  { %19752 = vmatprep.subr.bf16.mxu0 %v20272_v3 }
0x11ce   :  { %19754 = vmatpush3.bf16.msra.mxu0 %v20764_v42 }
0x11cf   :  { %19755 = vmatprep.subr.bf16.mxu0 %v20272_v3 }
0x11d2   :  { %19757 = vmatpush3.bf16.msra.mxu0 %v20774_v45 }
0x11d3   :  { %19758 = vmatprep.subr.bf16.mxu0 %v20272_v3 }
0x11d6   :  { %19760 = vmatpush3.bf16.msra.mxu0 %v20785_v49 }
0x11d7   :  { %19761 = vmatprep.subr.bf16.mxu0 %v20272_v3 }
0x11da   :  { %19763 = vmatpush3.bf16.msra.mxu0 %v20803_v56 }
0x11db   :  { %19764 = vmatprep.subr.bf16.mxu0 %v20272_v3 }
0x11de   :  { %19766 = vmatpush3.bf16.msra.mxu0 %v20815_v59 }
0x11df   :  { %18693 = vmatprep.subr.mxu0 %v20274_v6 }
0x11e1   :  { %18651 = vmatmul.mubr.f32.vlgmr.msra.gmra.mrb[34].mxu0 %v7147_v11 }
0x11e2   :  { %18695 = vmatprep.mubr.msk.f32.mxu0 %vm20273_vm0, %v20274_v6 }
0x11e7   :  { %18694 = vmatpush3.xpose.msra.mxu0 %v20848_v62 }
0x11e8   :  { %18703 = vmatprep.subr.mxu0 %v20274_v6 }
0x1294   :  { %v6693_v20 = vpop.f32.mrb[32].mxu0 }
0x1295   :  { %v18587_v41 = vpop.f32.mrb[33].mxu0  ;;  %v16821_v52 = vrot.slane %v6693_v20, 4 }
0x1296   :  { %v7142_v33 = vpop.f32.mrb[76].mxu1 }
0x1297   :  { %v16822_v39 = vrot.slane %v7142_v33, 3  ;;  %v18617_v54 = vpop.f32.mrb[77].mxu1 }
0x1299   :  { %v16823_v0 = vsel %vm5290_vm13, %v16822_v39, %v16821_v52 }
0x129a   :  { %v21321_v61 = vsel %vm1038_vm5, %v21173_v43, %v16823_v0 }
0x12b4   :  { %v7215_v55 = vpop.f32.mrb[34].mxu0 }
0x12b5   :  { %v7220_v58 = vrot.slane %v7215_v55, 2  ;;  %v18652_v60 = vpop.f32.mrb[35].mxu0 }
0x12b7   :  { %v7222_v10 = vadd.f32 %v7220_v58, %v20871_v15 }
0x12b9   :  { %20148 = vtanh.f32 %v7222_v10 }
0x12c3   :  { %v21324_v12 = vpop.eup %20148 }
0x12c4   :  { %v7227_v29 = vadd.f32 %v21324_v12, %v20860_v8  ;;  %v21331_v16 = vsel %vm1044_vm9, %v21185_v14, %v21324_v12 }
0x12c6   :  { %v7229_v9 = vcombine.high %v7227_v29, %v7227_v29 }
0x12c8   :  { %v7236_v43 = vrot.slane %v7229_v9, %v20527_v51 }
0x12ca   :  { %v7237_v18 = vcombine.high %v7236_v43, %v7236_v43  ;;  %v7244_v19 = vrot.slane %v7236_v43, %v20527_v51 }
0x12cc   :  { %v7251_v22 = vrot.slane %v7237_v18, %v20527_v51  ;;  %v7252_v15 = vcombine.high %v7244_v19, %v7244_v19 }
0x12ce   :  { %v7253_v26 = vcombine.high %v7251_v22, %v7251_v22  ;;  %v7322_v4 = vand.u32 4294901760, %v7252_v15 }
0x12d0   :  { %v7768_v21 = vand.u32 4294901760, %v7253_v26  ;;  %v7323_v36 = vsub.f32 %v7252_v15, %v7322_v4 }
0x12d2   :  { %v7769_v57 = vsub.f32 %v7253_v26, %v7768_v21  ;;  %v7324_v31 = vand.u32 4294901760, %v7323_v36 }
0x12d4   :  { %18696 = vmatmul.mubr.f32.vlgmr.msra.gmra.mrb[36].mxu0 %v7769_v57  ;;  %v7325_v35 = vsub.f32 %v7323_v36, %v7324_v31  ;;  %v7770_v7 = vand.u32 4294901760, %v7769_v57 }
0x12d5   :  { %18704 = vmatpush3.xpose.msra.mxu0 %v20889_v25  ;;  %18705 = vmatprep.mubr.msk.f32.mxu0 %vm20273_vm0, %v20274_v6 }
0x12d6   :  { %18713 = vmatprep.subr.mxu0 %v20274_v6  ;;  %v7326_v14 = vand.u32 4294901760, %v7325_v35  ;;  %v7771_v27 = vsub.f32 %v7769_v57, %v7770_v7 }
0x12d8   :  { %18656 = vmatmul.mubr.f32.vlgmr.msra.gmra.mrb[78].mxu1 %v7326_v14  ;;  %18706 = vmatmul.mubr.f32.vlgmr.msra.gmra.mrb[38].mxu0 %v7768_v21  ;;  %v7772_v50 = vand.u32 4294901760, %v7771_v27 }
0x12d9   :  { %18659 = vmatpush3.xpose.msra.mxu1 %v20897_v63  ;;  %18714 = vmatpush3.msra.mxu0 %v20831_v44 }
0x12da   :  { %18660 = vmatprep.mubr.msk.f32.mxu1 %vm20273_vm0, %v20274_v6  ;;  %18663 = vmatprep.subr.mxu1 %v20274_v6 }
0x12db   :  { %18715 = vmatprep.mubr.msk.f32.mxu0 %vm20273_vm0, %v20274_v6  ;;  %18718 = vmatprep.subr.mxu0 %v20274_v6 }
0x12dc   :  { %18661 = vmatmul.mubr.f32.vlgmr.msra.gmra.mrb[80].mxu1 %v7322_v4 }
0x12dd   :  { %18664 = vmatpush3.xpose.msra.mxu1 %v20881_v23  ;;  %18665 = vmatprep.mubr.msk.f32.mxu1 %vm20273_vm0, %v20274_v6 }
0x12de   :  { %18668 = vmatprep.subr.mxu1 %v20274_v6 }
0x12e0   :  { %18666 = vmatmul.mubr.f32.vlgmr.msra.gmra.mrb[82].mxu1 %v7323_v36 }
0x12e1   :  { %18669 = vmatpush3.xpose.msra.mxu1 %v20831_v44  ;;  %18670 = vmatprep.mubr.msk.f32.mxu1 %vm20273_vm0, %v20274_v6 }
0x12e2   :  { %18673 = vmatprep.subr.mxu1 %v20274_v6 }
0x12e4   :  { %18671 = vmatmul.mubr.f32.vlgmr.msra.gmra.mrb[84].mxu1 %v7324_v31 }
0x12e5   :  { %18674 = vmatpush3.xpose.msra.mxu1 %v20886_v34  ;;  %18675 = vmatprep.mubr.msk.f32.mxu1 %vm20273_vm0, %v20274_v6 }
0x12e6   :  { %18678 = vmatprep.subr.mxu1 %v20274_v6 }
0x12e8   :  { %18676 = vmatmul.mubr.f32.vlgmr.msra.gmra.mrb[86].mxu1 %v7322_v4 }
0x12e9   :  { %18679 = vmatpush3.xpose.msra.mxu1 %v20831_v44  ;;  %18680 = vmatprep.mubr.msk.f32.mxu1 %vm20273_vm0, %v20274_v6 }
0x12ea   :  { %18683 = vmatprep.subr.mxu1 %v20274_v6 }
0x12ec   :  { %18681 = vmatmul.mubr.f32.vlgmr.msra.gmra.mrb[88].mxu1 %v7322_v4 }
0x12ed   :  { %18684 = vmatpush3.xpose.msra.mxu1 %v20844_v53  ;;  %18685 = vmatprep.mubr.msk.f32.mxu1 %vm20273_vm0, %v20274_v6 }
0x12ee   :  { %18688 = vmatprep.subr.mxu1 %v20274_v6 }
0x12f0   :  { %18686 = vmatmul.mubr.f32.vlgmr.msra.gmra.mrb[90].mxu1 %v7772_v50 }
0x12f1   :  { %18689 = vmatpush3.xpose.msra.mxu1 %v20929_v47  ;;  %18690 = vmatprep.mubr.msk.f32.mxu1 %vm20273_vm0, %v20274_v6 }
0x12f2   :  { %18698 = vmatprep.subr.mxu1 %v20274_v6 }
0x12f4   :  { %18691 = vmatmul.mubr.f32.vlgmr.msra.gmra.mrb[92].mxu1 %v7768_v21 }
0x12f5   :  { %18699 = vmatpush3.xpose.msra.mxu1 %v20844_v53  ;;  %18700 = vmatprep.mubr.msk.f32.mxu1 %vm20273_vm0, %v20274_v6 }
0x12f6   :  { %18708 = vmatprep.subr.mxu1 %v20274_v6 }
0x12f8   :  { %18701 = vmatmul.mubr.f32.vlgmr.msra.gmra.mrb[94].mxu1 %v7770_v7 }
0x12f9   :  { %18709 = vmatpush3.xpose.msra.mxu1 %v20844_v53  ;;  %18710 = vmatprep.mubr.msk.f32.mxu1 %vm20273_vm0, %v20274_v6 }
0x12fa   :  { %18743 = vmatprep.subr.mxu1 %v20274_v6 }
0x12fc   :  { %18711 = vmatmul.mubr.f32.vlgmr.msra.gmra.mrb[96].mxu1 %v7768_v21 }
0x12fd   :  { %18744 = vmatpush3.msra.mxu1 %v20844_v53  ;;  %18745 = vmatprep.mubr.msk.f32.mxu1 %vm20273_vm0, %v20274_v6 }
0x12fe   :  { %18748 = vmatprep.subr.mxu1 %v20274_v6 }
0x13a7   :  { %v7924_v17 = vpop.f32.mrb[36].mxu0 }
0x13a8   :  { %v18697_v46 = vpop.f32.mrb[37].mxu0 }
0x13ab   :  { %v7328_v48 = vpop.f32.mrb[78].mxu1  ;;  %v8072_v24 = vpop.f32.mrb[38].mxu0 }
0x13ac   :  { %v18657_v11 = vpop.f32.mrb[79].mxu1  ;;  %v18707_v20 = vpop.f32.mrb[39].mxu0 }
0x13af   :  { %v7404_v41 = vpop.f32.mrb[80].mxu1 }
0x13b0   :  { %v7405_v33 = vadd.f32 %v7404_v41, %v7328_v48  ;;  %v18662_v52 = vpop.f32.mrb[81].mxu1 }
0x13b3   :  { %v7478_v39 = vpop.f32.mrb[82].mxu1 }
0x13b4   :  { %v7479_v54 = vadd.f32 %v7478_v39, %v7405_v33  ;;  %v18667_v0 = vpop.f32.mrb[83].mxu1 }
0x13b7   :  { %v7552_v55 = vpop.f32.mrb[84].mxu1 }
0x13b8   :  { %v7553_v58 = vadd.f32 %v7552_v55, %v7479_v54  ;;  %v18672_v60 = vpop.f32.mrb[85].mxu1 }
0x13bb   :  { %v7626_v10 = vpop.f32.mrb[86].mxu1 }
0x13bc   :  { %v7627_v29 = vadd.f32 %v7626_v10, %v7553_v58  ;;  %v18677_v9 = vpop.f32.mrb[87].mxu1 }
0x13bf   :  { %v7698_v43 = vpop.f32.mrb[88].mxu1 }
0x13c0   :  { %v7699_v18 = vadd.f32 %v7698_v43, %v7627_v29  ;;  %v18682_v19 = vpop.f32.mrb[89].mxu1 }
0x13c2   :  { %v8148_v48 = vadd.f32 %v7699_v18, %v20948_v30 }
0x13c3   :  { %v7774_v22 = vpop.f32.mrb[90].mxu1 }
0x13c4   :  { %v18687_v15 = vpop.f32.mrb[91].mxu1 }
0x13c7   :  { %v7850_v26 = vpop.f32.mrb[92].mxu1 }
0x13c8   :  { %v7851_v4 = vadd.f32 %v7850_v26, %v7774_v22  ;;  %v18692_v21 = vpop.f32.mrb[93].mxu1 }
0x13ca   :  { %v7925_v36 = vadd.f32 %v7924_v17, %v7851_v4 }
0x13cb   :  { %v7998_v57 = vpop.f32.mrb[94].mxu1 }
0x13cc   :  { %v7999_v31 = vadd.f32 %v7998_v57, %v7925_v36  ;;  %v18702_v35 = vpop.f32.mrb[95].mxu1 }
0x13ce   :  { %v8073_v14 = vadd.f32 %v8072_v24, %v7999_v31 }
0x13cf   :  { %v8144_v7 = vpop.f32.mrb[96].mxu1 }
0x13d0   :  { %v8145_v27 = vadd.f32 %v8144_v7, %v8073_v14  ;;  %v18712_v50 = vpop.f32.mrb[97].mxu1 }
0x13d2   :  { %v8149_v46 = vadd.f32 %v8145_v27, %v20951_v28 }
0x13d4   :  { %v8152_v11 = vrot.slane %v8149_v46, 7 }
0x13d6   :  { %v8153_v20 = vsel %vm1343_vm11, %v8152_v11, %v8148_v48 }
0x13d7   :  { %v8155_v41 = vsel %vm2351_vm1, %v8153_v20, -inf }
0x13d8   :  { %8156 = vmax.xlane.f32.xlu0 %v8155_v41 }
0x1465   :  { %v8157_v33 = vpop.xlane.xlu0 %8156 }
0x1466   :  { %v8159_v52 = vrot.slane %v8157_v33, 1  ;;  %v8162_v17 = vsub.f32 %v8148_v48, %v8157_v33 }
0x1468   :  { %v8163_v39 = vsub.f32 %v8149_v46, %v8159_v52  ;;  %v8164_v54 = vmul.f32 1.442695, %v8162_v17 }
0x146a   :  { %v8166_v0 = vmul.f32 1.442695, %v8163_v39 }
0x146c   :  { %20150 = vpow2.f32 %v8166_v0 }
0x146d   :  { %20152 = vpow2.f32 %v8164_v54 }
0x1476   :  { %v20151_v24 = vpop.eup %20150 }
0x1477   :  { %v8170_v55 = vrot.slane %v20151_v24, 7  ;;  %v20153_v58 = vpop.eup %20152 }
0x1479   :  { %v8171_v60 = vsel %vm1343_vm11, %v8170_v55, %v20153_v58 }
0x147a   :  { %v8173_v10 = vsel %vm2351_vm1, %v8171_v60, 0.0 }
0x147b   :  { %8174 = vadd.xlane.f32.xlu1 %v8173_v10 }
0x1508   :  { %v8175_v29 = vpop.xlane.xlu1 %8174 }
0x1509   :  { %v8177_v9 = vrot.slane %v8175_v29, 1  ;;  %20154 = vrcp.f32 %v8175_v29 }
0x150b   :  { %20156 = vrcp.f32 %v8177_v9 }
0x1513   :  { %v20155_v43 = vpop.eup %20154 }
0x1514   :  { %v8181_v18 = vmul.f32 %v20155_v43, %v20153_v58 }
0x1515   :  { %v20157_v19 = vpop.eup %20156 }
0x1516   :  { %v8183_v22 = vmul.f32 %v20157_v19, %v20151_v24  ;;  %v8185_v15 = vsel %vm2381_vm2, %v8181_v18, 0  ;;  %v17057_v4 = vrot.slane %v8181_v18, 2 }
0x1517   :  { %v8253_v26 = vand.u32 4294901760, %v8185_v15 }
0x1518   :  { %v17058_v21 = vrot.slane %v8183_v22, 1  ;;  %v8634_v36 = vsel %vm2381_vm2, %v8183_v22, 0 }
0x1519   :  { %v8254_v57 = vsub.f32 %v8185_v15, %v8253_v26  ;;  %v8702_v31 = vand.u32 4294901760, %v8634_v36 }
0x151a   :  { %v17059_v35 = vsel %vm7224_vm14, %v17058_v21, %v17057_v4 }
0x151b   :  { %v8255_v14 = vand.u32 4294901760, %v8254_v57  ;;  %v8703_v7 = vsub.f32 %v8634_v36, %v8702_v31  ;;  %v17078_v27 = vsel %vm1044_vm9, %v21249_v40, %v17059_v35  ;;  %v9083_v40 = vrot.slane %v21324_v12, 6 }
0x151c   :  { %17082 = vst.msk [vmem:[#allocation4] sm:$0xff] %vm2381_vm2, %v17078_v27 }
0x151d   :  { %v8256_v50 = vsub.f32 %v8254_v57, %v8255_v14  ;;  %v8704_v46 = vand.u32 4294901760, %v8703_v7 }
0x151f   :  { %v8257_v48 = vand.u32 4294901760, %v8256_v50  ;;  %v8705_v11 = vsub.f32 %v8703_v7, %v8704_v46 }
0x1521   :  { %18716 = vmatmul.mubr.f32.vlgmr.msra.gmra.mrb[40].mxu0 %v8257_v48  ;;  %v8706_v20 = vand.u32 4294901760, %v8705_v11 }
0x1522   :  { %18719 = vmatpush3.msra.mxu0 %v20897_v63  ;;  %18720 = vmatprep.mubr.msk.f32.mxu0 %vm20273_vm0, %v20274_v6 }
0x1523   :  { %18746 = vmatmul.mubr.f32.vlgmr.msra.gmra.mrb[98].mxu1 %v8706_v20  ;;  %18723 = vmatprep.subr.mxu0 %v20274_v6 }
0x1524   :  { %18749 = vmatpush3.msra.mxu1 %v20929_v47  ;;  %18750 = vmatprep.mubr.msk.f32.mxu1 %vm20273_vm0, %v20274_v6 }
0x1525   :  { %18753 = vmatprep.subr.mxu1 %v20274_v6 }
0x1529   :  { %18721 = vmatmul.mubr.f32.vlgmr.msra.gmra.mrb[40].mxu0 %v8253_v26 }
0x152a   :  { %18724 = vmatpush3.msra.mxu0 %v20881_v23  ;;  %18725 = vmatprep.mubr.msk.f32.mxu0 %vm20273_vm0, %v20274_v6 }
0x152b   :  { %18751 = vmatmul.mubr.f32.vlgmr.msra.gmra.mrb[98].mxu1 %v8702_v31  ;;  %18728 = vmatprep.subr.mxu0 %v20274_v6 }
0x152c   :  { %18754 = vmatpush3.msra.mxu1 %v20848_v62  ;;  %18755 = vmatprep.mubr.msk.f32.mxu1 %vm20273_vm0, %v20274_v6 }
0x152d   :  { %18758 = vmatprep.subr.mxu1 %v20274_v6 }
0x1531   :  { %18726 = vmatmul.mubr.f32.vlgmr.msra.gmra.mrb[40].mxu0 %v8254_v57 }
0x1532   :  { %18729 = vmatpush3.msra.mxu0 %v20831_v44  ;;  %18730 = vmatprep.mubr.msk.f32.mxu0 %vm20273_vm0, %v20274_v6 }
0x1533   :  { %18756 = vmatmul.mubr.f32.vlgmr.msra.gmra.mrb[98].mxu1 %v8703_v7  ;;  %18733 = vmatprep.subr.mxu0 %v20274_v6 }
0x1534   :  { %18759 = vmatpush3.msra.mxu1 %v20844_v53  ;;  %18760 = vmatprep.mubr.msk.f32.mxu1 %vm20273_vm0, %v20274_v6 }
0x1535   :  { %18763 = vmatprep.subr.mxu1 %v20274_v6 }
0x1539   :  { %18731 = vmatmul.mubr.f32.vlgmr.msra.gmra.mrb[40].mxu0 %v8255_v14 }
0x153a   :  { %18734 = vmatpush3.msra.mxu0 %v20886_v34  ;;  %18735 = vmatprep.mubr.msk.f32.mxu0 %vm20273_vm0, %v20274_v6 }
0x153b   :  { %18761 = vmatmul.mubr.f32.vlgmr.msra.gmra.mrb[98].mxu1 %v8704_v46  ;;  %18738 = vmatprep.subr.mxu0 %v20274_v6 }
0x153c   :  { %18764 = vmatpush3.msra.mxu1 %v20889_v25  ;;  %18765 = vmatprep.mubr.msk.f32.mxu1 %vm20273_vm0, %v20274_v6 }
0x153d   :  { %18768 = vmatprep.subr.mxu1 %v20274_v6 }
0x1541   :  { %18736 = vmatmul.mubr.f32.vlgmr.msra.gmra.mrb[40].mxu0 %v8253_v26 }
0x1542   :  { %18739 = vmatpush3.msra.mxu0 %v20831_v44  ;;  %18740 = vmatprep.mubr.msk.f32.mxu0 %vm20273_vm0, %v20274_v6 }
0x1543   :  { %18766 = vmatmul.mubr.f32.vlgmr.msra.gmra.mrb[98].mxu1 %v8702_v31  ;;  %19767 = vmatprep.subr.bf16.mxu0 %v20272_v3 }
0x1544   :  { %18769 = vmatpush3.msra.mxu1 %v20844_v53  ;;  %18770 = vmatprep.mubr.msk.f32.mxu1 %vm20273_vm0, %v20274_v6 }
0x1545   :  { %18808 = vmatprep.subr.mxu1 %v20274_v6 }
0x1549   :  { %18741 = vmatmul.mubr.f32.vlgmr.msra.gmra.mrb[40].mxu0 %v8253_v26 }
0x154a   :  { %19769 = vmatpush3.bf16.msra.mxu0 %v20722_v32  ;;  %18805 = vmatprep.mubr.msk.f32.mxu0 %vm20273_vm0, %v20274_v6 }
0x154b   :  { %18771 = vmatmul.mubr.f32.vlgmr.msra.gmra.mrb[98].mxu1 %v8702_v31  ;;  %19770 = vmatprep.subr.bf16.mxu0 %v20272_v3 }
0x154c   :  { %18809 = vmatpush3.xpose.msra.mxu1 %v20831_v44  ;;  %18810 = vmatprep.mubr.msk.f32.mxu1 %vm20273_vm0, %v20274_v6 }
0x154d   :  { %18813 = vmatprep.subr.mxu1 %v20274_v6 }
0x154e   :  { %19772 = vmatpush3.bf16.msra.mxu0 %v20732_v37 }
0x154f   :  { %19773 = vmatprep.subr.bf16.mxu0 %v20272_v3 }
0x1552   :  { %19775 = vmatpush3.bf16.msra.mxu0 %v20748_v38 }
0x1553   :  { %19776 = vmatprep.subr.bf16.mxu0 %v20272_v3 }
0x1556   :  { %19778 = vmatpush3.bf16.msra.mxu0 %v20764_v42 }
0x1557   :  { %19779 = vmatprep.subr.bf16.mxu0 %v20272_v3 }
0x155a   :  { %19781 = vmatpush3.bf16.msra.mxu0 %v20774_v45 }
0x155b   :  { %19782 = vmatprep.subr.bf16.mxu0 %v20272_v3 }
0x155e   :  { %19784 = vmatpush3.bf16.msra.mxu0 %v20785_v49 }
0x155f   :  { %19785 = vmatprep.subr.bf16.mxu0 %v20272_v3 }
0x1562   :  { %19787 = vmatpush3.bf16.msra.mxu0 %v20803_v56 }
0x1563   :  { %19788 = vmatprep.subr.bf16.mxu0 %v20272_v3 }
0x1566   :  { %19790 = vmatpush3.bf16.msra.mxu0 %v20815_v59 }
0x1567   :  { %18848 = vmatprep.subr.mxu0 %v20274_v6 }
0x1569   :  { %18806 = vmatmul.mubr.f32.vlgmr.msra.gmra.mrb[42].mxu0 %v9083_v40 }
0x156a   :  { %18850 = vmatprep.mubr.msk.f32.mxu0 %vm20273_vm0, %v20274_v6 }
0x156f   :  { %18849 = vmatpush3.xpose.msra.mxu0 %v20848_v62 }
0x1570   :  { %18858 = vmatprep.subr.mxu0 %v20274_v6 }
0x161c   :  { %v8629_v41 = vpop.f32.mrb[40].mxu0 }
0x161d   :  { %v18742_v33 = vpop.f32.mrb[41].mxu0  ;;  %v16827_v17 = vrot.slane %v8629_v41, 2 }
0x161e   :  { %v9078_v52 = vpop.f32.mrb[98].mxu1 }
0x161f   :  { %v16828_v39 = vrot.slane %v9078_v52, 1  ;;  %v18772_v54 = vpop.f32.mrb[99].mxu1 }
0x1621   :  { %v16829_v0 = vsel %vm7224_vm14, %v16828_v39, %v16827_v17 }
0x1622   :  { %v21466_v12 = vsel %vm1044_vm9, %v21321_v61, %v16829_v0 }
0x163c   :  { %v9151_v24 = vpop.f32.mrb[42].mxu0 }
0x163d   :  { %v9155_v55 = vadd.f32 %v9151_v24, %v20869_v13  ;;  %v18807_v58 = vpop.f32.mrb[43].mxu0 }
0x163f   :  { %20158 = vtanh.f32 %v9155_v55 }
0x1649   :  { %v21469_v60 = vpop.eup %20158 }
0x164a   :  { %v9157_v10 = vadd.f32 %v21469_v60, %v20851_v1 }
0x164c   :  { %v9165_v29 = vrot.slane %v9157_v10, %v20527_v51 }
0x164e   :  { %v9166_v9 = vcombine.high %v9165_v29, %v9165_v29  ;;  %v9173_v43 = vrot.slane %v9165_v29, %v20527_v51 }
0x1650   :  { %v9180_v18 = vrot.slane %v9166_v9, %v20527_v51  ;;  %v9249_v19 = vand.u32 4294901760, %v9173_v43 }
0x1652   :  { %v9695_v61 = vand.u32 4294901760, %v9180_v18  ;;  %v9250_v22 = vsub.f32 %v9173_v43, %v9249_v19 }
0x1654   :  { %v9696_v15 = vsub.f32 %v9180_v18, %v9695_v61  ;;  %v9251_v26 = vand.u32 4294901760, %v9250_v22 }
0x1656   :  { %18851 = vmatmul.mubr.f32.vlgmr.msra.gmra.mrb[44].mxu0 %v9696_v15  ;;  %v9252_v4 = vsub.f32 %v9250_v22, %v9251_v26  ;;  %v9697_v21 = vand.u32 4294901760, %v9696_v15 }
0x1657   :  { %18859 = vmatpush3.xpose.msra.mxu0 %v20889_v25  ;;  %18860 = vmatprep.mubr.msk.f32.mxu0 %vm20273_vm0, %v20274_v6 }
0x1658   :  { %18868 = vmatprep.subr.mxu0 %v20274_v6  ;;  %v9253_v1 = vand.u32 4294901760, %v9252_v4  ;;  %v9698_v36 = vsub.f32 %v9696_v15, %v9697_v21 }
0x165a   :  { %18811 = vmatmul.mubr.f32.vlgmr.msra.gmra.mrb[100].mxu1 %v9253_v1  ;;  %18861 = vmatmul.mubr.f32.vlgmr.msra.gmra.mrb[46].mxu0 %v9695_v61  ;;  %v9699_v57 = vand.u32 4294901760, %v9698_v36 }
0x165b   :  { %18814 = vmatpush3.xpose.msra.mxu1 %v20897_v63  ;;  %18869 = vmatpush3.msra.mxu0 %v20831_v44 }
0x165c   :  { %18815 = vmatprep.mubr.msk.f32.mxu1 %vm20273_vm0, %v20274_v6  ;;  %18818 = vmatprep.subr.mxu1 %v20274_v6 }
0x165d   :  { %18870 = vmatprep.mubr.msk.f32.mxu0 %vm20273_vm0, %v20274_v6  ;;  %18873 = vmatprep.subr.mxu0 %v20274_v6 }
0x165e   :  { %18816 = vmatmul.mubr.f32.vlgmr.msra.gmra.mrb[102].mxu1 %v9249_v19 }
0x165f   :  { %18819 = vmatpush3.xpose.msra.mxu1 %v20881_v23  ;;  %18820 = vmatprep.mubr.msk.f32.mxu1 %vm20273_vm0, %v20274_v6 }
0x1660   :  { %18823 = vmatprep.subr.mxu1 %v20274_v6 }
0x1662   :  { %18821 = vmatmul.mubr.f32.vlgmr.msra.gmra.mrb[104].mxu1 %v9250_v22 }
0x1663   :  { %18824 = vmatpush3.xpose.msra.mxu1 %v20831_v44  ;;  %18825 = vmatprep.mubr.msk.f32.mxu1 %vm20273_vm0, %v20274_v6 }
0x1664   :  { %18828 = vmatprep.subr.mxu1 %v20274_v6 }
0x1666   :  { %18826 = vmatmul.mubr.f32.vlgmr.msra.gmra.mrb[106].mxu1 %v9251_v26 }
0x1667   :  { %18829 = vmatpush3.xpose.msra.mxu1 %v20886_v34  ;;  %18830 = vmatprep.mubr.msk.f32.mxu1 %vm20273_vm0, %v20274_v6 }
0x1668   :  { %18833 = vmatprep.subr.mxu1 %v20274_v6 }
0x166a   :  { %18831 = vmatmul.mubr.f32.vlgmr.msra.gmra.mrb[108].mxu1 %v9249_v19 }
0x166b   :  { %18834 = vmatpush3.xpose.msra.mxu1 %v20831_v44  ;;  %18835 = vmatprep.mubr.msk.f32.mxu1 %vm20273_vm0, %v20274_v6 }
0x166c   :  { %18838 = vmatprep.subr.mxu1 %v20274_v6 }
0x166e   :  { %18836 = vmatmul.mubr.f32.vlgmr.msra.gmra.mrb[110].mxu1 %v9249_v19 }
0x166f   :  { %18839 = vmatpush3.xpose.msra.mxu1 %v20844_v53  ;;  %18840 = vmatprep.mubr.msk.f32.mxu1 %vm20273_vm0, %v20274_v6 }
0x1670   :  { %18843 = vmatprep.subr.mxu1 %v20274_v6 }
0x1672   :  { %18841 = vmatmul.mubr.f32.vlgmr.msra.gmra.mrb[112].mxu1 %v9699_v57 }
0x1673   :  { %18844 = vmatpush3.xpose.msra.mxu1 %v20929_v47  ;;  %18845 = vmatprep.mubr.msk.f32.mxu1 %vm20273_vm0, %v20274_v6 }
0x1674   :  { %18853 = vmatprep.subr.mxu1 %v20274_v6 }
0x1676   :  { %18846 = vmatmul.mubr.f32.vlgmr.msra.gmra.mrb[114].mxu1 %v9695_v61 }
0x1677   :  { %18854 = vmatpush3.xpose.msra.mxu1 %v20844_v53  ;;  %18855 = vmatprep.mubr.msk.f32.mxu1 %vm20273_vm0, %v20274_v6 }
0x1678   :  { %18863 = vmatprep.subr.mxu1 %v20274_v6 }
0x167a   :  { %18856 = vmatmul.mubr.f32.vlgmr.msra.gmra.mrb[116].mxu1 %v9697_v21 }
0x167b   :  { %18864 = vmatpush3.xpose.msra.mxu1 %v20844_v53  ;;  %18865 = vmatprep.mubr.msk.f32.mxu1 %vm20273_vm0, %v20274_v6 }
0x167c   :  { %18898 = vmatprep.subr.mxu1 %v20274_v6 }
0x167e   :  { %18866 = vmatmul.mubr.f32.vlgmr.msra.gmra.mrb[118].mxu1 %v9695_v61 }
0x167f   :  { %18899 = vmatpush3.msra.mxu1 %v20844_v53  ;;  %18900 = vmatprep.mubr.msk.f32.mxu1 %vm20273_vm0, %v20274_v6 }
0x1680   :  { %18903 = vmatprep.subr.mxu1 %v20274_v6 }
0x1729   :  { %v9851_v31 = vpop.f32.mrb[44].mxu0 }
0x172a   :  { %v18852_v35 = vpop.f32.mrb[45].mxu0 }
0x172d   :  { %v9255_v14 = vpop.f32.mrb[100].mxu1  ;;  %v9999_v7 = vpop.f32.mrb[46].mxu0 }
0x172e   :  { %v18812_v27 = vpop.f32.mrb[101].mxu1  ;;  %v18862_v50 = vpop.f32.mrb[47].mxu0 }
0x1731   :  { %v9331_v46 = vpop.f32.mrb[102].mxu1 }
0x1732   :  { %v9332_v48 = vadd.f32 %v9331_v46, %v9255_v14  ;;  %v18817_v11 = vpop.f32.mrb[103].mxu1 }
0x1735   :  { %v9405_v20 = vpop.f32.mrb[104].mxu1 }
0x1736   :  { %v9406_v40 = vadd.f32 %v9405_v20, %v9332_v48  ;;  %v18822_v41 = vpop.f32.mrb[105].mxu1 }
0x1739   :  { %v9479_v33 = vpop.f32.mrb[106].mxu1 }
0x173a   :  { %v9480_v52 = vadd.f32 %v9479_v33, %v9406_v40  ;;  %v18827_v17 = vpop.f32.mrb[107].mxu1 }
0x173d   :  { %v9553_v39 = vpop.f32.mrb[108].mxu1 }
0x173e   :  { %v9554_v54 = vadd.f32 %v9553_v39, %v9480_v52  ;;  %v18832_v0 = vpop.f32.mrb[109].mxu1 }
0x1741   :  { %v9625_v24 = vpop.f32.mrb[110].mxu1 }
0x1742   :  { %v9626_v55 = vadd.f32 %v9625_v24, %v9554_v54  ;;  %v18837_v58 = vpop.f32.mrb[111].mxu1 }
0x1744   :  { %v10075_v57 = vadd.f32 %v9626_v55, %v20948_v30 }
0x1745   :  { %v9701_v10 = vpop.f32.mrb[112].mxu1 }
0x1746   :  { %v18842_v29 = vpop.f32.mrb[113].mxu1 }
0x1749   :  { %v9777_v9 = vpop.f32.mrb[114].mxu1 }
0x174a   :  { %v9778_v43 = vadd.f32 %v9777_v9, %v9701_v10  ;;  %v18847_v18 = vpop.f32.mrb[115].mxu1 }
0x174c   :  { %v9852_v19 = vadd.f32 %v9851_v31, %v9778_v43 }
0x174d   :  { %v9925_v61 = vpop.f32.mrb[116].mxu1 }
0x174e   :  { %v9926_v22 = vadd.f32 %v9925_v61, %v9852_v19  ;;  %v18857_v15 = vpop.f32.mrb[117].mxu1 }
0x1750   :  { %v10000_v26 = vadd.f32 %v9999_v7, %v9926_v22 }
0x1751   :  { %v10071_v4 = vpop.f32.mrb[118].mxu1 }
0x1752   :  { %v10072_v1 = vadd.f32 %v10071_v4, %v10000_v26  ;;  %v18867_v21 = vpop.f32.mrb[119].mxu1 }
0x1754   :  { %v10076_v36 = vadd.f32 %v10072_v1, %v20951_v28 }
0x1756   :  { %v10079_v35 = vrot.slane %v10076_v36, 7 }
0x1758   :  { %v10080_v14 = vsel %vm1343_vm11, %v10079_v35, %v10075_v57 }
0x1759   :  { %v10082_v27 = vsel %vm2351_vm1, %v10080_v14, -inf }
0x175a   :  { %10083 = vmax.xlane.f32.xlu0 %v10082_v27 }
0x17e7   :  { %v10084_v50 = vpop.xlane.xlu0 %10083 }
0x17e8   :  { %v10086_v46 = vrot.slane %v10084_v50, 1  ;;  %v10089_v31 = vsub.f32 %v10075_v57, %v10084_v50 }
0x17ea   :  { %v10090_v48 = vsub.f32 %v10076_v36, %v10086_v46  ;;  %v10091_v11 = vmul.f32 1.442695, %v10089_v31 }
0x17ec   :  { %v10093_v20 = vmul.f32 1.442695, %v10090_v48 }
0x17ee   :  { %20160 = vpow2.f32 %v10093_v20 }
0x17ef   :  { %20162 = vpow2.f32 %v10091_v11 }
0x17f8   :  { %v20161_v7 = vpop.eup %20160 }
0x17f9   :  { %v10097_v40 = vrot.slane %v20161_v7, 7  ;;  %v20163_v41 = vpop.eup %20162 }
0x17fb   :  { %v10098_v33 = vsel %vm1343_vm11, %v10097_v40, %v20163_v41 }
0x17fc   :  { %v10100_v52 = vsel %vm2351_vm1, %v10098_v33, 0.0 }
0x17fd   :  { %10101 = vadd.xlane.f32.xlu1 %v10100_v52 }
0x188a   :  { %v10102_v17 = vpop.xlane.xlu1 %10101 }
0x188b   :  { %v10104_v39 = vrot.slane %v10102_v17, 1  ;;  %20164 = vrcp.f32 %v10102_v17 }
0x188d   :  { %20166 = vrcp.f32 %v10104_v39 }
0x1895   :  { %v20165_v54 = vpop.eup %20164 }
0x1896   :  { %v10108_v0 = vmul.f32 %v20165_v54, %v20163_v41 }
0x1897   :  { %v20167_v24 = vpop.eup %20166 }
0x1898   :  { %v10110_v55 = vmul.f32 %v20167_v24, %v20161_v7  ;;  %v10112_v58 = vsel %vm2381_vm2, %v10108_v0, 0 }
0x1899   :  { %v10180_v10 = vand.u32 4294901760, %v10112_v58 }
0x189a   :  { %v17061_v29 = vrot.slane %v10110_v55, 7  ;;  %v10561_v9 = vsel %vm2381_vm2, %v10110_v55, 0 }
0x189b   :  { %v10181_v43 = vsub.f32 %v10112_v58, %v10180_v10  ;;  %v10629_v18 = vand.u32 4294901760, %v10561_v9 }
0x189c   :  { %v21533_v19 = vsel %vm1343_vm11, %v17061_v29, %v10108_v0 }
0x189d   :  { %v10182_v61 = vand.u32 4294901760, %v10181_v43  ;;  %v10630_v22 = vsub.f32 %v10561_v9, %v10629_v18 }
0x189f   :  { %v10183_v15 = vsub.f32 %v10181_v43, %v10182_v61  ;;  %v10631_v26 = vand.u32 4294901760, %v10630_v22 }
0x18a1   :  { %v10184_v4 = vand.u32 4294901760, %v10183_v15  ;;  %v10632_v1 = vsub.f32 %v10630_v22, %v10631_v26 }
0x18a3   :  { %18871 = vmatmul.mubr.f32.vlgmr.msra.gmra.mrb[48].mxu0 %v10184_v4  ;;  %v10633_v21 = vand.u32 4294901760, %v10632_v1 }
0x18a4   :  { %18874 = vmatpush3.msra.mxu0 %v20897_v63  ;;  %18875 = vmatprep.mubr.msk.f32.mxu0 %vm20273_vm0, %v20274_v6 }
0x18a5   :  { %18901 = vmatmul.mubr.f32.vlgmr.msra.gmra.mrb[120].mxu1 %v10633_v21  ;;  %18878 = vmatprep.subr.mxu0 %v20274_v6 }
0x18a6   :  { %18904 = vmatpush3.msra.mxu1 %v20929_v47  ;;  %18905 = vmatprep.mubr.msk.f32.mxu1 %vm20273_vm0, %v20274_v6 }
0x18a7   :  { %18908 = vmatprep.subr.mxu1 %v20274_v6 }
0x18ab   :  { %18876 = vmatmul.mubr.f32.vlgmr.msra.gmra.mrb[48].mxu0 %v10180_v10 }
0x18ac   :  { %18879 = vmatpush3.msra.mxu0 %v20881_v23  ;;  %18880 = vmatprep.mubr.msk.f32.mxu0 %vm20273_vm0, %v20274_v6 }
0x18ad   :  { %18906 = vmatmul.mubr.f32.vlgmr.msra.gmra.mrb[120].mxu1 %v10629_v18  ;;  %18883 = vmatprep.subr.mxu0 %v20274_v6 }
0x18ae   :  { %18909 = vmatpush3.msra.mxu1 %v20848_v62  ;;  %18910 = vmatprep.mubr.msk.f32.mxu1 %vm20273_vm0, %v20274_v6 }
0x18af   :  { %18913 = vmatprep.subr.mxu1 %v20274_v6 }
0x18b3   :  { %18881 = vmatmul.mubr.f32.vlgmr.msra.gmra.mrb[48].mxu0 %v10181_v43 }
0x18b4   :  { %18884 = vmatpush3.msra.mxu0 %v20831_v44  ;;  %18885 = vmatprep.mubr.msk.f32.mxu0 %vm20273_vm0, %v20274_v6 }
0x18b5   :  { %18911 = vmatmul.mubr.f32.vlgmr.msra.gmra.mrb[120].mxu1 %v10630_v22  ;;  %18888 = vmatprep.subr.mxu0 %v20274_v6 }
0x18b6   :  { %18914 = vmatpush3.msra.mxu1 %v20844_v53  ;;  %18915 = vmatprep.mubr.msk.f32.mxu1 %vm20273_vm0, %v20274_v6 }
0x18b7   :  { %18918 = vmatprep.subr.mxu1 %v20274_v6 }
0x18bb   :  { %18886 = vmatmul.mubr.f32.vlgmr.msra.gmra.mrb[48].mxu0 %v10182_v61 }
0x18bc   :  { %18889 = vmatpush3.msra.mxu0 %v20886_v34  ;;  %18890 = vmatprep.mubr.msk.f32.mxu0 %vm20273_vm0, %v20274_v6 }
0x18bd   :  { %18916 = vmatmul.mubr.f32.vlgmr.msra.gmra.mrb[120].mxu1 %v10631_v26  ;;  %18893 = vmatprep.subr.mxu0 %v20274_v6 }
0x18be   :  { %18919 = vmatpush3.msra.mxu1 %v20889_v25  ;;  %18920 = vmatprep.mubr.msk.f32.mxu1 %vm20273_vm0, %v20274_v6 }
0x18bf   :  { %18923 = vmatprep.subr.mxu1 %v20274_v6 }
0x18c3   :  { %18891 = vmatmul.mubr.f32.vlgmr.msra.gmra.mrb[48].mxu0 %v10180_v10 }
0x18c4   :  { %18894 = vmatpush3.msra.mxu0 %v20831_v44  ;;  %18895 = vmatprep.mubr.msk.f32.mxu0 %vm20273_vm0, %v20274_v6 }
0x18c5   :  { %18921 = vmatmul.mubr.f32.vlgmr.msra.gmra.mrb[120].mxu1 %v10629_v18  ;;  %19791 = vmatprep.subr.bf16.mxu0 %v20272_v3 }
0x18c6   :  { %18924 = vmatpush3.msra.mxu1 %v20844_v53  ;;  %18925 = vmatprep.mubr.msk.f32.mxu1 %vm20273_vm0, %v20274_v6 }
0x18c7   :  { %18963 = vmatprep.subr.mxu1 %v20274_v6 }
0x18cb   :  { %18896 = vmatmul.mubr.f32.vlgmr.msra.gmra.mrb[48].mxu0 %v10180_v10 }
0x18cc   :  { %19793 = vmatpush3.bf16.msra.mxu0 %v20722_v32  ;;  %18960 = vmatprep.mubr.msk.f32.mxu0 %vm20273_vm0, %v20274_v6 }
0x18cd   :  { %18926 = vmatmul.mubr.f32.vlgmr.msra.gmra.mrb[120].mxu1 %v10629_v18  ;;  %19794 = vmatprep.subr.bf16.mxu0 %v20272_v3 }
0x18ce   :  { %18964 = vmatpush3.xpose.msra.mxu1 %v20831_v44  ;;  %18965 = vmatprep.mubr.msk.f32.mxu1 %vm20273_vm0, %v20274_v6 }
0x18cf   :  { %18968 = vmatprep.subr.mxu1 %v20274_v6 }
0x18d0   :  { %19796 = vmatpush3.bf16.msra.mxu0 %v20732_v37 }
0x18d1   :  { %19797 = vmatprep.subr.bf16.mxu0 %v20272_v3 }
0x18d4   :  { %19799 = vmatpush3.bf16.msra.mxu0 %v20748_v38 }
0x18d5   :  { %19800 = vmatprep.subr.bf16.mxu0 %v20272_v3 }
0x18d8   :  { %19802 = vmatpush3.bf16.msra.mxu0 %v20764_v42 }
0x18d9   :  { %19803 = vmatprep.subr.bf16.mxu0 %v20272_v3 }
0x18dc   :  { %19805 = vmatpush3.bf16.msra.mxu0 %v20774_v45 }
0x18dd   :  { %19806 = vmatprep.subr.bf16.mxu0 %v20272_v3 }
0x18e0   :  { %19808 = vmatpush3.bf16.msra.mxu0 %v20785_v49 }
0x18e1   :  { %19809 = vmatprep.subr.bf16.mxu0 %v20272_v3 }
0x18e4   :  { %19811 = vmatpush3.bf16.msra.mxu0 %v20803_v56 }
0x18e5   :  { %19812 = vmatprep.subr.bf16.mxu0 %v20272_v3 }
0x18e8   :  { %19814 = vmatpush3.bf16.msra.mxu0 %v20815_v59 }
0x18e9   :  { %19003 = vmatprep.subr.mxu0 %v20274_v6 }
0x18eb   :  { %18961 = vmatmul.mubr.f32.vlgmr.msra.gmra.mrb[50].mxu0 %v21469_v60 }
0x18ec   :  { %19005 = vmatprep.mubr.msk.f32.mxu0 %vm20273_vm0, %v20274_v6 }
0x18f1   :  { %19004 = vmatpush3.xpose.msra.mxu0 %v20848_v62 }
0x18f2   :  { %19013 = vmatprep.subr.mxu0 %v20274_v6 }
0x199e   :  { %v10556_v36 = vpop.f32.mrb[48].mxu0 }
0x199f   :  { %v18897_v57 = vpop.f32.mrb[49].mxu0 }
0x19a0   :  { %v11005_v35 = vpop.f32.mrb[120].mxu1 }
0x19a1   :  { %v16833_v14 = vrot.slane %v11005_v35, 7  ;;  %v18927_v27 = vpop.f32.mrb[121].mxu1 }
0x19a3   :  { %v21603_v50 = vsel %vm1343_vm11, %v16833_v14, %v10556_v36 }
0x19be   :  { %v11075_v46 = vpop.f32.mrb[50].mxu0 }
0x19bf   :  { %v11080_v31 = vrot.slane %v11075_v46, 6  ;;  %v18962_v48 = vpop.f32.mrb[51].mxu0 }
0x19c1   :  { %v11082_v11 = vadd.f32 %v11080_v31, %v20869_v13 }
0x19c3   :  { %20168 = vtanh.f32 %v11082_v11 }
0x19cd   :  { %v21606_v20 = vpop.eup %20168 }
0x19ce   :  { %v11084_v7 = vadd.f32 %v21606_v20, %v20854_v2 }
0x19d0   :  { %v11092_v40 = vrot.slane %v11084_v7, %v20527_v51 }
0x19d2   :  { %v11093_v41 = vcombine.high %v11092_v40, %v11092_v40  ;;  %v11100_v33 = vrot.slane %v11092_v40, %v20527_v51 }
0x19d4   :  { %v11107_v52 = vrot.slane %v11093_v41, %v20527_v51  ;;  %v11108_v17 = vcombine.high %v11100_v33, %v11100_v33 }
0x19d6   :  { %v11109_v39 = vcombine.high %v11107_v52, %v11107_v52  ;;  %v11178_v54 = vand.u32 4294901760, %v11108_v17 }
0x19d8   :  { %v11624_v0 = vand.u32 4294901760, %v11109_v39  ;;  %v11179_v24 = vsub.f32 %v11108_v17, %v11178_v54 }
0x19da   :  { %v11625_v55 = vsub.f32 %v11109_v39, %v11624_v0  ;;  %v11180_v58 = vand.u32 4294901760, %v11179_v24 }
0x19dc   :  { %19006 = vmatmul.mubr.f32.vlgmr.msra.gmra.mrb[52].mxu0 %v11625_v55  ;;  %v11181_v10 = vsub.f32 %v11179_v24, %v11180_v58  ;;  %v11626_v29 = vand.u32 4294901760, %v11625_v55 }
0x19dd   :  { %19014 = vmatpush3.xpose.msra.mxu0 %v20889_v25  ;;  %19015 = vmatprep.mubr.msk.f32.mxu0 %vm20273_vm0, %v20274_v6 }
0x19de   :  { %19023 = vmatprep.subr.mxu0 %v20274_v6  ;;  %v11182_v2 = vand.u32 4294901760, %v11181_v10  ;;  %v11627_v9 = vsub.f32 %v11625_v55, %v11626_v29 }
0x19e0   :  { %18966 = vmatmul.mubr.f32.vlgmr.msra.gmra.mrb[122].mxu1 %v11182_v2  ;;  %19016 = vmatmul.mubr.f32.vlgmr.msra.gmra.mrb[54].mxu0 %v11624_v0  ;;  %v11628_v43 = vand.u32 4294901760, %v11627_v9 }
0x19e1   :  { %18969 = vmatpush3.xpose.msra.mxu1 %v20897_v63  ;;  %19024 = vmatpush3.msra.mxu0 %v20831_v44 }
0x19e2   :  { %18970 = vmatprep.mubr.msk.f32.mxu1 %vm20273_vm0, %v20274_v6  ;;  %18973 = vmatprep.subr.mxu1 %v20274_v6 }
0x19e3   :  { %19025 = vmatprep.mubr.msk.f32.mxu0 %vm20273_vm0, %v20274_v6  ;;  %19028 = vmatprep.subr.mxu0 %v20274_v6 }
0x19e4   :  { %18971 = vmatmul.mubr.f32.vlgmr.msra.gmra.mrb[124].mxu1 %v11178_v54 }
0x19e5   :  { %18974 = vmatpush3.xpose.msra.mxu1 %v20881_v23  ;;  %18975 = vmatprep.mubr.msk.f32.mxu1 %vm20273_vm0, %v20274_v6 }
0x19e6   :  { %18978 = vmatprep.subr.mxu1 %v20274_v6 }
0x19e8   :  { %18976 = vmatmul.mubr.f32.vlgmr.msra.gmra.mrb[126].mxu1 %v11179_v24 }
0x19e9   :  { %18979 = vmatpush3.xpose.msra.mxu1 %v20831_v44  ;;  %18980 = vmatprep.mubr.msk.f32.mxu1 %vm20273_vm0, %v20274_v6 }
0x19ea   :  { %18983 = vmatprep.subr.mxu1 %v20274_v6 }
0x19ec   :  { %18981 = vmatmul.mubr.f32.vlgmr.msra.gmra.mrb[128].mxu1 %v11180_v58 }
0x19ed   :  { %18984 = vmatpush3.xpose.msra.mxu1 %v20886_v34  ;;  %18985 = vmatprep.mubr.msk.f32.mxu1 %vm20273_vm0, %v20274_v6 }
0x19ee   :  { %18988 = vmatprep.subr.mxu1 %v20274_v6 }
0x19f0   :  { %18986 = vmatmul.mubr.f32.vlgmr.msra.gmra.mrb[130].mxu1 %v11178_v54 }
0x19f1   :  { %18989 = vmatpush3.xpose.msra.mxu1 %v20831_v44  ;;  %18990 = vmatprep.mubr.msk.f32.mxu1 %vm20273_vm0, %v20274_v6 }
0x19f2   :  { %18993 = vmatprep.subr.mxu1 %v20274_v6 }
0x19f4   :  { %18991 = vmatmul.mubr.f32.vlgmr.msra.gmra.mrb[132].mxu1 %v11178_v54 }
0x19f5   :  { %18994 = vmatpush3.xpose.msra.mxu1 %v20844_v53  ;;  %18995 = vmatprep.mubr.msk.f32.mxu1 %vm20273_vm0, %v20274_v6 }
0x19f6   :  { %18998 = vmatprep.subr.mxu1 %v20274_v6 }
0x19f8   :  { %18996 = vmatmul.mubr.f32.vlgmr.msra.gmra.mrb[134].mxu1 %v11628_v43 }
0x19f9   :  { %18999 = vmatpush3.xpose.msra.mxu1 %v20929_v47  ;;  %19000 = vmatprep.mubr.msk.f32.mxu1 %vm20273_vm0, %v20274_v6 }
0x19fa   :  { %19008 = vmatprep.subr.mxu1 %v20274_v6 }
0x19fc   :  { %19001 = vmatmul.mubr.f32.vlgmr.msra.gmra.mrb[136].mxu1 %v11624_v0 }
0x19fd   :  { %19009 = vmatpush3.xpose.msra.mxu1 %v20844_v53  ;;  %19010 = vmatprep.mubr.msk.f32.mxu1 %vm20273_vm0, %v20274_v6 }
0x19fe   :  { %19018 = vmatprep.subr.mxu1 %v20274_v6 }
0x1a00   :  { %19011 = vmatmul.mubr.f32.vlgmr.msra.gmra.mrb[138].mxu1 %v11626_v29 }
0x1a01   :  { %19019 = vmatpush3.xpose.msra.mxu1 %v20844_v53  ;;  %19020 = vmatprep.mubr.msk.f32.mxu1 %vm20273_vm0, %v20274_v6 }
0x1a02   :  { %19053 = vmatprep.subr.mxu1 %v20274_v6 }
0x1a04   :  { %19021 = vmatmul.mubr.f32.vlgmr.msra.gmra.mrb[140].mxu1 %v11624_v0 }
0x1a05   :  { %19054 = vmatpush3.msra.mxu1 %v20844_v53  ;;  %19055 = vmatprep.mubr.msk.f32.mxu1 %vm20273_vm0, %v20274_v6 }
0x1a06   :  { %19058 = vmatprep.subr.mxu1 %v20274_v6 }
0x1aaf   :  { %v11780_v18 = vpop.f32.mrb[52].mxu0 }
0x1ab0   :  { %v19007_v61 = vpop.f32.mrb[53].mxu0 }
0x1ab3   :  { %v11184_v22 = vpop.f32.mrb[122].mxu1  ;;  %v11928_v15 = vpop.f32.mrb[54].mxu0 }
0x1ab4   :  { %v18967_v26 = vpop.f32.mrb[123].mxu1  ;;  %v19017_v4 = vpop.f32.mrb[55].mxu0 }
0x1ab7   :  { %v11260_v1 = vpop.f32.mrb[124].mxu1 }
0x1ab8   :  { %v11261_v21 = vadd.f32 %v11260_v1, %v11184_v22  ;;  %v18972_v36 = vpop.f32.mrb[125].mxu1 }
0x1abb   :  { %v11334_v57 = vpop.f32.mrb[126].mxu1 }
0x1abc   :  { %v11335_v35 = vadd.f32 %v11334_v57, %v11261_v21  ;;  %v18977_v14 = vpop.f32.mrb[127].mxu1 }
0x1abf   :  { %v11408_v27 = vpop.f32.mrb[128].mxu1 }
0x1ac0   :  { %v11409_v46 = vadd.f32 %v11408_v27, %v11335_v35  ;;  %v18982_v31 = vpop.f32.mrb[129].mxu1 }
0x1ac3   :  { %v11482_v48 = vpop.f32.mrb[130].mxu1 }
0x1ac4   :  { %v11483_v11 = vadd.f32 %v11482_v48, %v11409_v46  ;;  %v18987_v7 = vpop.f32.mrb[131].mxu1 }
0x1ac7   :  { %v11554_v40 = vpop.f32.mrb[132].mxu1 }
0x1ac8   :  { %v11555_v41 = vadd.f32 %v11554_v40, %v11483_v11  ;;  %v18992_v33 = vpop.f32.mrb[133].mxu1 }
0x1aca   :  { %v12004_v22 = vadd.f32 %v11555_v41, %v20948_v30 }
0x1acb   :  { %v11630_v52 = vpop.f32.mrb[134].mxu1 }
0x1acc   :  { %v18997_v17 = vpop.f32.mrb[135].mxu1 }
0x1acf   :  { %v11706_v39 = vpop.f32.mrb[136].mxu1 }
0x1ad0   :  { %v11707_v54 = vadd.f32 %v11706_v39, %v11630_v52  ;;  %v19002_v0 = vpop.f32.mrb[137].mxu1 }
0x1ad2   :  { %v11781_v24 = vadd.f32 %v11780_v18, %v11707_v54 }
0x1ad3   :  { %v11854_v55 = vpop.f32.mrb[138].mxu1 }
0x1ad4   :  { %v11855_v58 = vadd.f32 %v11854_v55, %v11781_v24  ;;  %v19012_v10 = vpop.f32.mrb[139].mxu1 }
0x1ad6   :  { %v11929_v2 = vadd.f32 %v11928_v15, %v11855_v58 }
0x1ad7   :  { %v12000_v29 = vpop.f32.mrb[140].mxu1 }
0x1ad8   :  { %v12001_v9 = vadd.f32 %v12000_v29, %v11929_v2  ;;  %v19022_v43 = vpop.f32.mrb[141].mxu1 }
0x1ada   :  { %v12005_v61 = vadd.f32 %v12001_v9, %v20951_v28 }
0x1adc   :  { %v12008_v26 = vrot.slane %v12005_v61, 7 }
0x1ade   :  { %v12009_v4 = vsel %vm1343_vm11, %v12008_v26, %v12004_v22 }
0x1adf   :  { %v12011_v1 = vsel %vm2351_vm1, %v12009_v4, -inf }
0x1ae0   :  { %12012 = vmax.xlane.f32.xlu0 %v12011_v1 }
0x1b6d   :  { %v12013_v21 = vpop.xlane.xlu0 %12012 }
0x1b6e   :  { %v12015_v36 = vrot.slane %v12013_v21, 1  ;;  %v12018_v18 = vsub.f32 %v12004_v22, %v12013_v21 }
0x1b70   :  { %v12019_v57 = vsub.f32 %v12005_v61, %v12015_v36  ;;  %v12020_v35 = vmul.f32 1.442695, %v12018_v18 }
0x1b72   :  { %v12022_v14 = vmul.f32 1.442695, %v12019_v57 }
0x1b74   :  { %20170 = vpow2.f32 %v12022_v14 }
0x1b75   :  { %20172 = vpow2.f32 %v12020_v35 }
0x1b7e   :  { %v20171_v15 = vpop.eup %20170 }
0x1b7f   :  { %v12026_v27 = vrot.slane %v20171_v15, 7  ;;  %v20173_v46 = vpop.eup %20172 }
0x1b81   :  { %v12027_v31 = vsel %vm1343_vm11, %v12026_v27, %v20173_v46 }
0x1b82   :  { %v12029_v48 = vsel %vm2351_vm1, %v12027_v31, 0.0 }
0x1b83   :  { %12030 = vadd.xlane.f32.xlu1 %v12029_v48 }
0x1c10   :  { %v12031_v11 = vpop.xlane.xlu1 %12030 }
0x1c11   :  { %v12033_v7 = vrot.slane %v12031_v11, 1  ;;  %20174 = vrcp.f32 %v12031_v11 }
0x1c13   :  { %20176 = vrcp.f32 %v12033_v7  ;;  %v16805_v7 = vsel %vm1032_vm3, %v21469_v60, %v21606_v20 }
0x1c1b   :  { %v20175_v40 = vpop.eup %20174 }
0x1c1c   :  { %v12037_v41 = vmul.f32 %v20175_v40, %v20173_v46 }
0x1c1d   :  { %v20177_v33 = vpop.eup %20176 }
0x1c1e   :  { %v12039_v52 = vmul.f32 %v20177_v33, %v20171_v15  ;;  %v12041_v17 = vsel %vm2381_vm2, %v12037_v41, 0  ;;  %v17064_v54 = vrot.slane %v12037_v41, 6 }
0x1c1f   :  { %v12109_v39 = vand.u32 4294901760, %v12041_v17 }
0x1c20   :  { %v17065_v0 = vrot.slane %v12039_v52, 5  ;;  %v12490_v24 = vsel %vm2381_vm2, %v12039_v52, 0 }
0x1c21   :  { %v12110_v55 = vsub.f32 %v12041_v17, %v12109_v39  ;;  %v12558_v58 = vand.u32 4294901760, %v12490_v24 }
0x1c22   :  { %v17066_v10 = vsel %vm3355_vm12, %v17065_v0, %v17064_v54 }
0x1c23   :  { %v12111_v2 = vand.u32 4294901760, %v12110_v55  ;;  %v12559_v29 = vsub.f32 %v12490_v24, %v12558_v58  ;;  %v21672_v9 = vsel %vm1032_vm3, %v21533_v19, %v17066_v10  ;;  %v12939_v19 = vrot.slane %v21606_v20, 2 }
0x1c25   :  { %v12112_v43 = vsub.f32 %v12110_v55, %v12111_v2  ;;  %v12560_v61 = vand.u32 4294901760, %v12559_v29 }
0x1c27   :  { %v12113_v22 = vand.u32 4294901760, %v12112_v43  ;;  %v12561_v26 = vsub.f32 %v12559_v29, %v12560_v61 }
0x1c29   :  { %19026 = vmatmul.mubr.f32.vlgmr.msra.gmra.mrb[56].mxu0 %v12113_v22  ;;  %v12562_v4 = vand.u32 4294901760, %v12561_v26 }
0x1c2a   :  { %19029 = vmatpush3.msra.mxu0 %v20897_v63  ;;  %19030 = vmatprep.mubr.msk.f32.mxu0 %vm20273_vm0, %v20274_v6 }
0x1c2b   :  { %19056 = vmatmul.mubr.f32.vlgmr.msra.gmra.mrb[142].mxu1 %v12562_v4  ;;  %19033 = vmatprep.subr.mxu0 %v20274_v6 }
0x1c2c   :  { %19059 = vmatpush3.msra.mxu1 %v20929_v47  ;;  %19060 = vmatprep.mubr.msk.f32.mxu1 %vm20273_vm0, %v20274_v6 }
0x1c2d   :  { %19063 = vmatprep.subr.mxu1 %v20274_v6 }
0x1c31   :  { %19031 = vmatmul.mubr.f32.vlgmr.msra.gmra.mrb[56].mxu0 %v12109_v39 }
0x1c32   :  { %19034 = vmatpush3.msra.mxu0 %v20881_v23  ;;  %19035 = vmatprep.mubr.msk.f32.mxu0 %vm20273_vm0, %v20274_v6 }
0x1c33   :  { %19061 = vmatmul.mubr.f32.vlgmr.msra.gmra.mrb[142].mxu1 %v12558_v58  ;;  %19038 = vmatprep.subr.mxu0 %v20274_v6 }
0x1c34   :  { %19064 = vmatpush3.msra.mxu1 %v20848_v62  ;;  %19065 = vmatprep.mubr.msk.f32.mxu1 %vm20273_vm0, %v20274_v6 }
0x1c35   :  { %19068 = vmatprep.subr.mxu1 %v20274_v6 }
0x1c39   :  { %19036 = vmatmul.mubr.f32.vlgmr.msra.gmra.mrb[56].mxu0 %v12110_v55 }
0x1c3a   :  { %19039 = vmatpush3.msra.mxu0 %v20831_v44  ;;  %19040 = vmatprep.mubr.msk.f32.mxu0 %vm20273_vm0, %v20274_v6 }
0x1c3b   :  { %19066 = vmatmul.mubr.f32.vlgmr.msra.gmra.mrb[142].mxu1 %v12559_v29  ;;  %19043 = vmatprep.subr.mxu0 %v20274_v6 }
0x1c3c   :  { %19069 = vmatpush3.msra.mxu1 %v20844_v53  ;;  %19070 = vmatprep.mubr.msk.f32.mxu1 %vm20273_vm0, %v20274_v6 }
0x1c3d   :  { %19073 = vmatprep.subr.mxu1 %v20274_v6 }
0x1c41   :  { %19041 = vmatmul.mubr.f32.vlgmr.msra.gmra.mrb[56].mxu0 %v12111_v2 }
0x1c42   :  { %19044 = vmatpush3.msra.mxu0 %v20886_v34  ;;  %19045 = vmatprep.mubr.msk.f32.mxu0 %vm20273_vm0, %v20274_v6 }
0x1c43   :  { %19071 = vmatmul.mubr.f32.vlgmr.msra.gmra.mrb[142].mxu1 %v12560_v61  ;;  %19048 = vmatprep.subr.mxu0 %v20274_v6 }
0x1c44   :  { %19074 = vmatpush3.msra.mxu1 %v20889_v25  ;;  %19075 = vmatprep.mubr.msk.f32.mxu1 %vm20273_vm0, %v20274_v6 }
0x1c45   :  { %19078 = vmatprep.subr.mxu1 %v20274_v6 }
0x1c49   :  { %19046 = vmatmul.mubr.f32.vlgmr.msra.gmra.mrb[56].mxu0 %v12109_v39 }
0x1c4a   :  { %19049 = vmatpush3.msra.mxu0 %v20831_v44  ;;  %19050 = vmatprep.mubr.msk.f32.mxu0 %vm20273_vm0, %v20274_v6 }
0x1c4b   :  { %19076 = vmatmul.mubr.f32.vlgmr.msra.gmra.mrb[142].mxu1 %v12558_v58  ;;  %19815 = vmatprep.subr.bf16.mxu0 %v20272_v3 }
0x1c4c   :  { %19079 = vmatpush3.msra.mxu1 %v20844_v53  ;;  %19080 = vmatprep.mubr.msk.f32.mxu1 %vm20273_vm0, %v20274_v6 }
0x1c4d   :  { %19118 = vmatprep.subr.mxu1 %v20274_v6 }
0x1c51   :  { %19051 = vmatmul.mubr.f32.vlgmr.msra.gmra.mrb[56].mxu0 %v12109_v39 }
0x1c52   :  { %19817 = vmatpush3.bf16.msra.mxu0 %v20722_v32  ;;  %19115 = vmatprep.mubr.msk.f32.mxu0 %vm20273_vm0, %v20274_v6 }
0x1c53   :  { %19081 = vmatmul.mubr.f32.vlgmr.msra.gmra.mrb[142].mxu1 %v12558_v58  ;;  %19818 = vmatprep.subr.bf16.mxu0 %v20272_v3 }
0x1c54   :  { %19119 = vmatpush3.xpose.msra.mxu1 %v20831_v44  ;;  %19120 = vmatprep.mubr.msk.f32.mxu1 %vm20273_vm0, %v20274_v6 }
0x1c55   :  { %19123 = vmatprep.subr.mxu1 %v20274_v6 }
0x1c56   :  { %19820 = vmatpush3.bf16.msra.mxu0 %v20732_v37 }
0x1c57   :  { %19821 = vmatprep.subr.bf16.mxu0 %v20272_v3 }
0x1c5a   :  { %19823 = vmatpush3.bf16.msra.mxu0 %v20748_v38 }
0x1c5b   :  { %19824 = vmatprep.subr.bf16.mxu0 %v20272_v3 }
0x1c5e   :  { %19826 = vmatpush3.bf16.msra.mxu0 %v20764_v42 }
0x1c5f   :  { %19827 = vmatprep.subr.bf16.mxu0 %v20272_v3 }
0x1c62   :  { %19829 = vmatpush3.bf16.msra.mxu0 %v20774_v45 }
0x1c63   :  { %19830 = vmatprep.subr.bf16.mxu0 %v20272_v3 }
0x1c66   :  { %19832 = vmatpush3.bf16.msra.mxu0 %v20785_v49 }
0x1c67   :  { %19833 = vmatprep.subr.bf16.mxu0 %v20272_v3 }
0x1c6a   :  { %19835 = vmatpush3.bf16.msra.mxu0 %v20803_v56 }
0x1c6b   :  { %19836 = vmatprep.subr.bf16.mxu0 %v20272_v3 }
0x1c6e   :  { %19838 = vmatpush3.bf16.msra.mxu0 %v20815_v59 }
0x1c6f   :  { %19158 = vmatprep.subr.mxu0 %v20274_v6 }
0x1c71   :  { %19116 = vmatmul.mubr.f32.vlgmr.msra.gmra.mrb[58].mxu0 %v12939_v19 }
0x1c72   :  { %19160 = vmatprep.mubr.msk.f32.mxu0 %vm20273_vm0, %v20274_v6 }
0x1c77   :  { %19159 = vmatpush3.xpose.msra.mxu0 %v20848_v62 }
0x1c78   :  { %19168 = vmatprep.subr.mxu0 %v20274_v6 }
0x1d24   :  { %v12485_v1 = vpop.f32.mrb[56].mxu0 }
0x1d25   :  { %v19052_v21 = vpop.f32.mrb[57].mxu0  ;;  %v16838_v18 = vrot.slane %v12485_v1, 6 }
0x1d26   :  { %v12934_v36 = vpop.f32.mrb[142].mxu1 }
0x1d27   :  { %v16839_v57 = vrot.slane %v12934_v36, 5  ;;  %v19082_v35 = vpop.f32.mrb[143].mxu1 }
0x1d29   :  { %v16840_v14 = vsel %vm3355_vm12, %v16839_v57, %v16838_v18 }
0x1d2a   :  { %v21744_v15 = vsel %vm1032_vm3, %v21603_v50, %v16840_v14 }
0x1d44   :  { %v13007_v27 = vpop.f32.mrb[58].mxu0 }
0x1d45   :  { %v13012_v46 = vrot.slane %v13007_v27, 4  ;;  %v19117_v31 = vpop.f32.mrb[59].mxu0 }
0x1d47   :  { %v13014_v48 = vadd.f32 %v13012_v46, %v20869_v13 }
0x1d49   :  { %20178 = vtanh.f32 %v13014_v48 }
0x1d53   :  { %v21747_v11 = vpop.eup %20178 }
0x1d54   :  { %v13016_v40 = vadd.f32 %v21747_v11, %v20857_v5  ;;  %v21756_v41 = vsel %vm1038_vm5, %v16805_v7, %v21747_v11 }
0x1d56   :  { %v13018_v50 = vcombine.high %v13016_v40, %v13016_v40 }
0x1d58   :  { %v13025_v33 = vrot.slane %v13018_v50, %v20527_v51 }
0x1d5a   :  { %v13026_v52 = vcombine.high %v13025_v33, %v13025_v33  ;;  %v13033_v17 = vrot.slane %v13025_v33, %v20527_v51 }
0x1d5c   :  { %v13040_v39 = vrot.slane %v13026_v52, %v20527_v51  ;;  %v13109_v54 = vand.u32 4294901760, %v13033_v17 }
0x1d5e   :  { %v13555_v0 = vand.u32 4294901760, %v13040_v39  ;;  %v13110_v24 = vsub.f32 %v13033_v17, %v13109_v54 }
0x1d60   :  { %v13556_v55 = vsub.f32 %v13040_v39, %v13555_v0  ;;  %v13111_v60 = vand.u32 4294901760, %v13110_v24 }
0x1d62   :  { %19161 = vmatmul.mubr.f32.vlgmr.msra.gmra.mrb[60].mxu0 %v13556_v55  ;;  %v13112_v20 = vsub.f32 %v13110_v24, %v13111_v60  ;;  %v13557_v58 = vand.u32 4294901760, %v13556_v55 }
0x1d63   :  { %19169 = vmatpush3.xpose.msra.mxu0 %v20889_v25  ;;  %19170 = vmatprep.mubr.msk.f32.mxu0 %vm20273_vm0, %v20274_v6 }
0x1d64   :  { %19178 = vmatprep.subr.mxu0 %v20274_v6  ;;  %v13113_v5 = vand.u32 4294901760, %v13112_v20  ;;  %v13558_v10 = vsub.f32 %v13556_v55, %v13557_v58 }
0x1d66   :  { %19121 = vmatmul.mubr.f32.vlgmr.msra.gmra.mrb[144].mxu1 %v13113_v5  ;;  %19171 = vmatmul.mubr.f32.vlgmr.msra.gmra.mrb[62].mxu0 %v13555_v0  ;;  %v13559_v2 = vand.u32 4294901760, %v13558_v10 }
0x1d67   :  { %19124 = vmatpush3.xpose.msra.mxu1 %v20897_v63  ;;  %19179 = vmatpush3.msra.mxu0 %v20831_v44 }
0x1d68   :  { %19125 = vmatprep.mubr.msk.f32.mxu1 %vm20273_vm0, %v20274_v6  ;;  %19128 = vmatprep.subr.mxu1 %v20274_v6 }
0x1d69   :  { %19180 = vmatprep.mubr.msk.f32.mxu0 %vm20273_vm0, %v20274_v6  ;;  %19183 = vmatprep.subr.mxu0 %v20274_v6 }
0x1d6a   :  { %19126 = vmatmul.mubr.f32.vlgmr.msra.gmra.mrb[146].mxu1 %v13109_v54 }
0x1d6b   :  { %19129 = vmatpush3.xpose.msra.mxu1 %v20881_v23  ;;  %19130 = vmatprep.mubr.msk.f32.mxu1 %vm20273_vm0, %v20274_v6 }
0x1d6c   :  { %19133 = vmatprep.subr.mxu1 %v20274_v6 }
0x1d6e   :  { %19131 = vmatmul.mubr.f32.vlgmr.msra.gmra.mrb[148].mxu1 %v13110_v24 }
0x1d6f   :  { %19134 = vmatpush3.xpose.msra.mxu1 %v20831_v44  ;;  %19135 = vmatprep.mubr.msk.f32.mxu1 %vm20273_vm0, %v20274_v6 }
0x1d70   :  { %19138 = vmatprep.subr.mxu1 %v20274_v6 }
0x1d72   :  { %19136 = vmatmul.mubr.f32.vlgmr.msra.gmra.mrb[150].mxu1 %v13111_v60 }
0x1d73   :  { %19139 = vmatpush3.xpose.msra.mxu1 %v20886_v34  ;;  %19140 = vmatprep.mubr.msk.f32.mxu1 %vm20273_vm0, %v20274_v6 }
0x1d74   :  { %19143 = vmatprep.subr.mxu1 %v20274_v6 }
0x1d76   :  { %19141 = vmatmul.mubr.f32.vlgmr.msra.gmra.mrb[152].mxu1 %v13109_v54 }
0x1d77   :  { %19144 = vmatpush3.xpose.msra.mxu1 %v20831_v44  ;;  %19145 = vmatprep.mubr.msk.f32.mxu1 %vm20273_vm0, %v20274_v6 }
0x1d78   :  { %19148 = vmatprep.subr.mxu1 %v20274_v6 }
0x1d7a   :  { %19146 = vmatmul.mubr.f32.vlgmr.msra.gmra.mrb[154].mxu1 %v13109_v54 }
0x1d7b   :  { %19149 = vmatpush3.xpose.msra.mxu1 %v20844_v53  ;;  %19150 = vmatprep.mubr.msk.f32.mxu1 %vm20273_vm0, %v20274_v6 }
0x1d7c   :  { %19153 = vmatprep.subr.mxu1 %v20274_v6 }
0x1d7e   :  { %19151 = vmatmul.mubr.f32.vlgmr.msra.gmra.mrb[156].mxu1 %v13559_v2 }
0x1d7f   :  { %19154 = vmatpush3.xpose.msra.mxu1 %v20929_v47  ;;  %19155 = vmatprep.mubr.msk.f32.mxu1 %vm20273_vm0, %v20274_v6 }
0x1d80   :  { %19163 = vmatprep.subr.mxu1 %v20274_v6 }
0x1d82   :  { %19156 = vmatmul.mubr.f32.vlgmr.msra.gmra.mrb[158].mxu1 %v13555_v0 }
0x1d83   :  { %19164 = vmatpush3.xpose.msra.mxu1 %v20844_v53  ;;  %19165 = vmatprep.mubr.msk.f32.mxu1 %vm20273_vm0, %v20274_v6 }
0x1d84   :  { %19173 = vmatprep.subr.mxu1 %v20274_v6 }
0x1d86   :  { %19166 = vmatmul.mubr.f32.vlgmr.msra.gmra.mrb[160].mxu1 %v13557_v58 }
0x1d87   :  { %19174 = vmatpush3.xpose.msra.mxu1 %v20844_v53  ;;  %19175 = vmatprep.mubr.msk.f32.mxu1 %vm20273_vm0, %v20274_v6 }
0x1d88   :  { %19208 = vmatprep.subr.mxu1 %v20274_v6 }
0x1d8a   :  { %19176 = vmatmul.mubr.f32.vlgmr.msra.gmra.mrb[162].mxu1 %v13555_v0 }
0x1d8b   :  { %19209 = vmatpush3.msra.mxu1 %v20844_v53  ;;  %19210 = vmatprep.mubr.msk.f32.mxu1 %vm20273_vm0, %v20274_v6 }
0x1d8c   :  { %19213 = vmatprep.subr.mxu1 %v20274_v6 }
0x1e35   :  { %v13711_v29 = vpop.f32.mrb[60].mxu0 }
0x1e36   :  { %v19162_v43 = vpop.f32.mrb[61].mxu0 }
0x1e39   :  { %v13115_v61 = vpop.f32.mrb[144].mxu1  ;;  %v13859_v22 = vpop.f32.mrb[62].mxu0 }
0x1e3a   :  { %v19122_v26 = vpop.f32.mrb[145].mxu1  ;;  %v19172_v4 = vpop.f32.mrb[63].mxu0 }
0x1e3d   :  { %v13191_v19 = vpop.f32.mrb[146].mxu1 }
0x1e3e   :  { %v13192_v1 = vadd.f32 %v13191_v19, %v13115_v61  ;;  %v19127_v21 = vpop.f32.mrb[147].mxu1 }
0x1e41   :  { %v13265_v36 = vpop.f32.mrb[148].mxu1 }
0x1e42   :  { %v13266_v18 = vadd.f32 %v13265_v36, %v13192_v1  ;;  %v19132_v57 = vpop.f32.mrb[149].mxu1 }
0x1e45   :  { %v13339_v35 = vpop.f32.mrb[150].mxu1 }
0x1e46   :  { %v13340_v14 = vadd.f32 %v13339_v35, %v13266_v18  ;;  %v19137_v27 = vpop.f32.mrb[151].mxu1 }
0x1e49   :  { %v13413_v46 = vpop.f32.mrb[152].mxu1 }
0x1e4a   :  { %v13414_v31 = vadd.f32 %v13413_v46, %v13340_v14  ;;  %v19142_v48 = vpop.f32.mrb[153].mxu1 }
0x1e4d   :  { %v13485_v7 = vpop.f32.mrb[154].mxu1 }
0x1e4e   :  { %v13486_v40 = vadd.f32 %v13485_v7, %v13414_v31  ;;  %v19147_v50 = vpop.f32.mrb[155].mxu1 }
0x1e50   :  { %v13935_v43 = vadd.f32 %v13486_v40, %v20948_v30 }
0x1e51   :  { %v13561_v33 = vpop.f32.mrb[156].mxu1 }
0x1e52   :  { %v19152_v52 = vpop.f32.mrb[157].mxu1 }
0x1e55   :  { %v13637_v17 = vpop.f32.mrb[158].mxu1 }
0x1e56   :  { %v13638_v39 = vadd.f32 %v13637_v17, %v13561_v33  ;;  %v19157_v54 = vpop.f32.mrb[159].mxu1 }
0x1e58   :  { %v13712_v0 = vadd.f32 %v13711_v29, %v13638_v39 }
0x1e59   :  { %v13785_v24 = vpop.f32.mrb[160].mxu1 }
0x1e5a   :  { %v13786_v55 = vadd.f32 %v13785_v24, %v13712_v0  ;;  %v19167_v60 = vpop.f32.mrb[161].mxu1 }
0x1e5c   :  { %v13860_v20 = vadd.f32 %v13859_v22, %v13786_v55 }
0x1e5d   :  { %v13931_v5 = vpop.f32.mrb[162].mxu1 }
0x1e5e   :  { %v13932_v58 = vadd.f32 %v13931_v5, %v13860_v20  ;;  %v19177_v10 = vpop.f32.mrb[163].mxu1 }
0x1e60   :  { %v13936_v2 = vadd.f32 %v13932_v58, %v20951_v28 }
0x1e62   :  { %v13939_v61 = vrot.slane %v13936_v2, 7 }
0x1e64   :  { %v13940_v26 = vsel %vm1343_vm11, %v13939_v61, %v13935_v43 }
0x1e65   :  { %v13942_v4 = vsel %vm2351_vm1, %v13940_v26, -inf }
0x1e66   :  { %13943 = vmax.xlane.f32.xlu0 %v13942_v4 }
0x1ef3   :  { %v13944_v19 = vpop.xlane.xlu0 %13943 }
0x1ef4   :  { %v13946_v1 = vrot.slane %v13944_v19, 1  ;;  %v13949_v29 = vsub.f32 %v13935_v43, %v13944_v19 }
0x1ef6   :  { %v13950_v21 = vsub.f32 %v13936_v2, %v13946_v1  ;;  %v13951_v36 = vmul.f32 1.442695, %v13949_v29 }
0x1ef8   :  { %v13953_v18 = vmul.f32 1.442695, %v13950_v21 }
0x1efa   :  { %20180 = vpow2.f32 %v13953_v18 }
0x1efb   :  { %20182 = vpow2.f32 %v13951_v36 }
0x1f04   :  { %v20181_v22 = vpop.eup %20180 }
0x1f05   :  { %v13957_v57 = vrot.slane %v20181_v22, 7  ;;  %v20183_v35 = vpop.eup %20182 }
0x1f07   :  { %v13958_v14 = vsel %vm1343_vm11, %v13957_v57, %v20183_v35 }
0x1f08   :  { %v13960_v27 = vsel %vm2351_vm1, %v13958_v14, 0.0 }
0x1f09   :  { %13961 = vadd.xlane.f32.xlu1 %v13960_v27 }
0x1f96   :  { %v13962_v46 = vpop.xlane.xlu1 %13961 }
0x1f97   :  { %v13964_v31 = vrot.slane %v13962_v46, 1  ;;  %20184 = vrcp.f32 %v13962_v46 }
0x1f99   :  { %20186 = vrcp.f32 %v13964_v31 }
0x1fa1   :  { %v20185_v48 = vpop.eup %20184 }
0x1fa2   :  { %v13968_v7 = vmul.f32 %v20185_v48, %v20183_v35 }
0x1fa3   :  { %v20187_v40 = vpop.eup %20186 }
0x1fa4   :  { %v13970_v50 = vmul.f32 %v20187_v40, %v20181_v22  ;;  %v13972_v33 = vsel %vm2381_vm2, %v13968_v7, 0  ;;  %v17068_v17 = vrot.slane %v13968_v7, 4 }
0x1fa5   :  { %v14040_v52 = vand.u32 4294901760, %v13972_v33 }
0x1fa6   :  { %v17069_v39 = vrot.slane %v13970_v50, 3  ;;  %v14421_v54 = vsel %vm2381_vm2, %v13970_v50, 0 }
0x1fa7   :  { %v14041_v0 = vsub.f32 %v13972_v33, %v14040_v52  ;;  %v14489_v24 = vand.u32 4294901760, %v14421_v54 }
0x1fa8   :  { %v17070_v55 = vsel %vm5290_vm13, %v17069_v39, %v17068_v17 }
0x1fa9   :  { %v14042_v60 = vand.u32 4294901760, %v14041_v0  ;;  %v14490_v20 = vsub.f32 %v14421_v54, %v14489_v24  ;;  %v21820_v5 = vsel %vm1038_vm5, %v21672_v9, %v17070_v55 }
0x1fab   :  { %v14043_v58 = vsub.f32 %v14041_v0, %v14042_v60  ;;  %v14491_v10 = vand.u32 4294901760, %v14490_v20 }
0x1fad   :  { %v14044_v2 = vand.u32 4294901760, %v14043_v58  ;;  %v14492_v43 = vsub.f32 %v14490_v20, %v14491_v10 }
0x1faf   :  { %19181 = vmatmul.mubr.f32.vlgmr.msra.gmra.mrb[64].mxu0 %v14044_v2  ;;  %v14493_v61 = vand.u32 4294901760, %v14492_v43 }
0x1fb0   :  { %19184 = vmatpush3.msra.mxu0 %v20897_v63  ;;  %19185 = vmatprep.mubr.msk.f32.mxu0 %vm20273_vm0, %v20274_v6 }
0x1fb1   :  { %19211 = vmatmul.mubr.f32.vlgmr.msra.gmra.mrb[164].mxu1 %v14493_v61  ;;  %19188 = vmatprep.subr.mxu0 %v20274_v6 }
0x1fb2   :  { %19214 = vmatpush3.msra.mxu1 %v20929_v47  ;;  %19215 = vmatprep.mubr.msk.f32.mxu1 %vm20273_vm0, %v20274_v6 }
0x1fb3   :  { %19218 = vmatprep.subr.mxu1 %v20274_v6 }
0x1fb7   :  { %19186 = vmatmul.mubr.f32.vlgmr.msra.gmra.mrb[64].mxu0 %v14040_v52 }
0x1fb8   :  { %19189 = vmatpush3.msra.mxu0 %v20881_v23  ;;  %19190 = vmatprep.mubr.msk.f32.mxu0 %vm20273_vm0, %v20274_v6 }
0x1fb9   :  { %19216 = vmatmul.mubr.f32.vlgmr.msra.gmra.mrb[164].mxu1 %v14489_v24  ;;  %19193 = vmatprep.subr.mxu0 %v20274_v6 }
0x1fba   :  { %19219 = vmatpush3.msra.mxu1 %v20848_v62  ;;  %19220 = vmatprep.mubr.msk.f32.mxu1 %vm20273_vm0, %v20274_v6 }
0x1fbb   :  { %19223 = vmatprep.subr.mxu1 %v20274_v6 }
0x1fbf   :  { %19191 = vmatmul.mubr.f32.vlgmr.msra.gmra.mrb[64].mxu0 %v14041_v0 }
0x1fc0   :  { %19194 = vmatpush3.msra.mxu0 %v20831_v44  ;;  %19195 = vmatprep.mubr.msk.f32.mxu0 %vm20273_vm0, %v20274_v6 }
0x1fc1   :  { %19221 = vmatmul.mubr.f32.vlgmr.msra.gmra.mrb[164].mxu1 %v14490_v20  ;;  %19198 = vmatprep.subr.mxu0 %v20274_v6 }
0x1fc2   :  { %19224 = vmatpush3.msra.mxu1 %v20844_v53  ;;  %19225 = vmatprep.mubr.msk.f32.mxu1 %vm20273_vm0, %v20274_v6 }
0x1fc3   :  { %19228 = vmatprep.subr.mxu1 %v20274_v6 }
0x1fc7   :  { %19196 = vmatmul.mubr.f32.vlgmr.msra.gmra.mrb[64].mxu0 %v14042_v60 }
0x1fc8   :  { %19199 = vmatpush3.msra.mxu0 %v20886_v34  ;;  %19200 = vmatprep.mubr.msk.f32.mxu0 %vm20273_vm0, %v20274_v6 }
0x1fc9   :  { %19226 = vmatmul.mubr.f32.vlgmr.msra.gmra.mrb[164].mxu1 %v14491_v10  ;;  %19203 = vmatprep.subr.mxu0 %v20274_v6 }
0x1fca   :  { %19229 = vmatpush3.msra.mxu1 %v20889_v25  ;;  %19230 = vmatprep.mubr.msk.f32.mxu1 %vm20273_vm0, %v20274_v6 }
0x1fcb   :  { %19233 = vmatprep.subr.mxu1 %v20274_v6 }
0x1fcf   :  { %19201 = vmatmul.mubr.f32.vlgmr.msra.gmra.mrb[64].mxu0 %v14040_v52 }
0x1fd0   :  { %19204 = vmatpush3.msra.mxu0 %v20831_v44  ;;  %19205 = vmatprep.mubr.msk.f32.mxu0 %vm20273_vm0, %v20274_v6 }
0x1fd1   :  { %19231 = vmatmul.mubr.f32.vlgmr.msra.gmra.mrb[164].mxu1 %v14489_v24  ;;  %19839 = vmatprep.subr.bf16.mxu0 %v20272_v3 }
0x1fd2   :  { %19234 = vmatpush3.msra.mxu1 %v20844_v53  ;;  %19235 = vmatprep.mubr.msk.f32.mxu1 %vm20273_vm0, %v20274_v6 }
0x1fd3   :  { %19273 = vmatprep.subr.mxu1 %v20274_v6 }
0x1fd7   :  { %19206 = vmatmul.mubr.f32.vlgmr.msra.gmra.mrb[64].mxu0 %v14040_v52 }
0x1fd8   :  { %19841 = vmatpush3.bf16.msra.mxu0 %v20722_v32  ;;  %19270 = vmatprep.mubr.msk.f32.mxu0 %vm20273_vm0, %v20274_v6  ;;  %v14870_v32 = vrot.slane %v21747_v11, 4 }
0x1fd9   :  { %19236 = vmatmul.mubr.f32.vlgmr.msra.gmra.mrb[164].mxu1 %v14489_v24  ;;  %19842 = vmatprep.subr.bf16.mxu0 %v20272_v3 }
0x1fda   :  { %19274 = vmatpush3.xpose.msra.mxu1 %v20831_v44  ;;  %19275 = vmatprep.mubr.msk.f32.mxu1 %vm20273_vm0, %v20274_v6 }
0x1fdb   :  { %19278 = vmatprep.subr.mxu1 %v20274_v6 }
0x1fdc   :  { %19844 = vmatpush3.bf16.msra.mxu0 %v20732_v37 }
0x1fdd   :  { %19845 = vmatprep.subr.bf16.mxu0 %v20272_v3 }
0x1fe0   :  { %19847 = vmatpush3.bf16.msra.mxu0 %v20748_v38 }
0x1fe1   :  { %19848 = vmatprep.subr.bf16.mxu0 %v20272_v3 }
0x1fe4   :  { %19850 = vmatpush3.bf16.msra.mxu0 %v20764_v42 }
0x1fe5   :  { %19851 = vmatprep.subr.bf16.mxu0 %v20272_v3 }
0x1fe8   :  { %19853 = vmatpush3.bf16.msra.mxu0 %v20774_v45 }
0x1fe9   :  { %19854 = vmatprep.subr.bf16.mxu0 %v20272_v3 }
0x1fec   :  { %19856 = vmatpush3.bf16.msra.mxu0 %v20785_v49 }
0x1fed   :  { %19857 = vmatprep.subr.bf16.mxu0 %v20272_v3 }
0x1ff0   :  { %19859 = vmatpush3.bf16.msra.mxu0 %v20803_v56 }
0x1ff1   :  { %19860 = vmatprep.subr.bf16.mxu0 %v20272_v3 }
0x1ff4   :  { %19862 = vmatpush3.bf16.msra.mxu0 %v20815_v59 }
0x1ff5   :  { %19313 = vmatprep.subr.mxu0 %v20274_v6 }
0x1ff7   :  { %19271 = vmatmul.mubr.f32.vlgmr.msra.gmra.mrb[66].mxu0 %v14870_v32 }
0x1ff8   :  { %19315 = vmatprep.mubr.msk.f32.mxu0 %vm20273_vm0, %v20274_v6 }
0x1ffd   :  { %19314 = vmatpush3.xpose.msra.mxu0 %v20848_v62 }
0x1ffe   :  { %19323 = vmatprep.subr.mxu0 %v20274_v6 }
0x20aa   :  { %v14416_v37 = vpop.f32.mrb[64].mxu0 }
0x20ab   :  { %v19207_v38 = vpop.f32.mrb[65].mxu0  ;;  %v16844_v45 = vrot.slane %v14416_v37, 4 }
0x20ac   :  { %v14865_v42 = vpop.f32.mrb[164].mxu1 }
0x20ad   :  { %v16845_v49 = vrot.slane %v14865_v42, 3  ;;  %v19237_v3 = vpop.f32.mrb[165].mxu1 }
0x20af   :  { %v16846_v56 = vsel %vm5290_vm13, %v16845_v49, %v16844_v45 }
0x20b0   :  { %v21892_v59 = vsel %vm1038_vm5, %v21744_v15, %v16846_v56 }
0x20ca   :  { %v14938_v9 = vpop.f32.mrb[66].mxu0 }
0x20cb   :  { %v14943_v11 = vrot.slane %v14938_v9, 2  ;;  %v19272_v26 = vpop.f32.mrb[67].mxu0 }
0x20cd   :  { %v14945_v4 = vadd.f32 %v14943_v11, %v20869_v13 }
0x20cf   :  { %20188 = vtanh.f32 %v14945_v4 }
0x20d9   :  { %v20189_v19 = vpop.eup %20188 }
0x20da   :  { %17084 = vst [vmem:[#allocation6 - $0x6] sm:$0xc0] %v20189_v19  ;;  %v14947_v1 = vadd.f32 %v20189_v19, %v20860_v8  ;;  %v21898_v29 = vsel %vm1044_vm9, %v21756_v41, %v20189_v19 }
0x20dc   :  { %v14949_v21 = vcombine.high %v14947_v1, %v14947_v1 }
0x20de   :  { %v14956_v36 = vrot.slane %v14949_v21, %v20527_v51 }
0x20e0   :  { %v14957_v18 = vcombine.high %v14956_v36, %v14956_v36  ;;  %v14964_v15 = vrot.slane %v14956_v36, %v20527_v51 }
0x20e2   :  { %v14971_v22 = vrot.slane %v14957_v18, %v20527_v51  ;;  %v14972_v57 = vcombine.high %v14964_v15, %v14964_v15 }
0x20e4   :  { %v14973_v35 = vcombine.high %v14971_v22, %v14971_v22  ;;  %v15042_v13 = vand.u32 4294901760, %v14972_v57 }
0x20e6   :  { %v15488_v14 = vand.u32 4294901760, %v14973_v35  ;;  %v15043_v27 = vsub.f32 %v14972_v57, %v15042_v13 }
0x20e8   :  { %v15489_v46 = vsub.f32 %v14973_v35, %v15488_v14  ;;  %v15044_v31 = vand.u32 4294901760, %v15043_v27 }
0x20ea   :  { %19316 = vmatmul.mubr.f32.vlgmr.msra.gmra.mrb[68].mxu0 %v15489_v46  ;;  %v15045_v8 = vsub.f32 %v15043_v27, %v15044_v31  ;;  %v15490_v51 = vand.u32 4294901760, %v15489_v46 }
0x20eb   :  { %19324 = vmatpush3.xpose.msra.mxu0 %v20889_v25  ;;  %19325 = vmatprep.mubr.msk.f32.mxu0 %vm20273_vm0, %v20274_v6 }
0x20ec   :  { %19333 = vmatprep.subr.mxu0 %v20274_v6  ;;  %v15046_v41 = vand.u32 4294901760, %v15045_v8  ;;  %v15491_v48 = vsub.f32 %v15489_v46, %v15490_v51 }
0x20ee   :  { %19276 = vmatmul.mubr.f32.vlgmr.msra.gmra.mrb[166].mxu1 %v15046_v41  ;;  %19326 = vmatmul.mubr.f32.vlgmr.msra.gmra.mrb[70].mxu0 %v15488_v14  ;;  %v15492_v7 = vand.u32 4294901760, %v15491_v48 }
0x20ef   :  { %19279 = vmatpush3.xpose.msra.mxu1 %v20897_v63  ;;  %19334 = vmatpush3.msra.mxu0 %v20831_v44 }
0x20f0   :  { %19280 = vmatprep.mubr.msk.f32.mxu1 %vm20273_vm0, %v20274_v6  ;;  %19283 = vmatprep.subr.mxu1 %v20274_v6 }
0x20f1   :  { %19335 = vmatprep.mubr.msk.f32.mxu0 %vm20273_vm0, %v20274_v6  ;;  %19338 = vmatprep.subr.mxu0 %v20274_v6 }
0x20f2   :  { %19281 = vmatmul.mubr.f32.vlgmr.msra.gmra.mrb[168].mxu1 %v15042_v13 }
0x20f3   :  { %19284 = vmatpush3.xpose.msra.mxu1 %v20881_v23  ;;  %19285 = vmatprep.mubr.msk.f32.mxu1 %vm20273_vm0, %v20274_v6 }
0x20f4   :  { %19288 = vmatprep.subr.mxu1 %v20274_v6 }
0x20f6   :  { %19286 = vmatmul.mubr.f32.vlgmr.msra.gmra.mrb[170].mxu1 %v15043_v27 }
0x20f7   :  { %19289 = vmatpush3.xpose.msra.mxu1 %v20831_v44  ;;  %19290 = vmatprep.mubr.msk.f32.mxu1 %vm20273_vm0, %v20274_v6 }
0x20f8   :  { %19293 = vmatprep.subr.mxu1 %v20274_v6 }
0x20fa   :  { %19291 = vmatmul.mubr.f32.vlgmr.msra.gmra.mrb[172].mxu1 %v15044_v31 }
0x20fb   :  { %19294 = vmatpush3.xpose.msra.mxu1 %v20886_v34  ;;  %19295 = vmatprep.mubr.msk.f32.mxu1 %vm20273_vm0, %v20274_v6 }
0x20fc   :  { %19298 = vmatprep.subr.mxu1 %v20274_v6 }
0x20fe   :  { %19296 = vmatmul.mubr.f32.vlgmr.msra.gmra.mrb[174].mxu1 %v15042_v13 }
0x20ff   :  { %19299 = vmatpush3.xpose.msra.mxu1 %v20831_v44  ;;  %19300 = vmatprep.mubr.msk.f32.mxu1 %vm20273_vm0, %v20274_v6 }
0x2100   :  { %19303 = vmatprep.subr.mxu1 %v20274_v6 }
0x2102   :  { %19301 = vmatmul.mubr.f32.vlgmr.msra.gmra.mrb[176].mxu1 %v15042_v13 }
0x2103   :  { %19304 = vmatpush3.xpose.msra.mxu1 %v20844_v53  ;;  %19305 = vmatprep.mubr.msk.f32.mxu1 %vm20273_vm0, %v20274_v6 }
0x2104   :  { %19308 = vmatprep.subr.mxu1 %v20274_v6 }
0x2106   :  { %19306 = vmatmul.mubr.f32.vlgmr.msra.gmra.mrb[178].mxu1 %v15492_v7 }
0x2107   :  { %19309 = vmatpush3.xpose.msra.mxu1 %v20929_v47  ;;  %19310 = vmatprep.mubr.msk.f32.mxu1 %vm20273_vm0, %v20274_v6 }
0x2108   :  { %19318 = vmatprep.subr.mxu1 %v20274_v6 }
0x210a   :  { %19311 = vmatmul.mubr.f32.vlgmr.msra.gmra.mrb[180].mxu1 %v15488_v14 }
0x210b   :  { %19319 = vmatpush3.xpose.msra.mxu1 %v20844_v53  ;;  %19320 = vmatprep.mubr.msk.f32.mxu1 %vm20273_vm0, %v20274_v6 }
0x210c   :  { %19328 = vmatprep.subr.mxu1 %v20274_v6 }
0x210e   :  { %19321 = vmatmul.mubr.f32.vlgmr.msra.gmra.mrb[182].mxu1 %v15490_v51 }
0x210f   :  { %19329 = vmatpush3.xpose.msra.mxu1 %v20844_v53  ;;  %19330 = vmatprep.mubr.msk.f32.mxu1 %vm20273_vm0, %v20274_v6 }
0x2110   :  { %19363 = vmatprep.subr.mxu1 %v20274_v6 }
0x2112   :  { %19331 = vmatmul.mubr.f32.vlgmr.msra.gmra.mrb[184].mxu1 %v15488_v14 }
0x2113   :  { %19364 = vmatpush3.msra.mxu1 %v20844_v53  ;;  %19365 = vmatprep.mubr.msk.f32.mxu1 %vm20273_vm0, %v20274_v6 }
0x2114   :  { %19368 = vmatprep.subr.mxu1 %v20274_v6 }
0x21bd   :  { %v15644_v40 = vpop.f32.mrb[68].mxu0 }
0x21be   :  { %v19317_v50 = vpop.f32.mrb[69].mxu0 }
0x21c1   :  { %v15048_v33 = vpop.f32.mrb[166].mxu1  ;;  %v15792_v52 = vpop.f32.mrb[70].mxu0 }
0x21c2   :  { %v19277_v17 = vpop.f32.mrb[167].mxu1  ;;  %v19327_v39 = vpop.f32.mrb[71].mxu0 }
0x21c5   :  { %v15124_v54 = vpop.f32.mrb[168].mxu1 }
0x21c6   :  { %v15125_v0 = vadd.f32 %v15124_v54, %v15048_v33  ;;  %v19282_v24 = vpop.f32.mrb[169].mxu1 }
0x21c9   :  { %v15198_v55 = vpop.f32.mrb[170].mxu1 }
0x21ca   :  { %v15199_v60 = vadd.f32 %v15198_v55, %v15125_v0  ;;  %v19287_v20 = vpop.f32.mrb[171].mxu1 }
0x21cd   :  { %v15272_v58 = vpop.f32.mrb[172].mxu1 }
0x21ce   :  { %v15273_v10 = vadd.f32 %v15272_v58, %v15199_v60  ;;  %v19292_v2 = vpop.f32.mrb[173].mxu1 }
0x21d1   :  { %v15346_v43 = vpop.f32.mrb[174].mxu1 }
0x21d2   :  { %v15347_v61 = vadd.f32 %v15346_v43, %v15273_v10  ;;  %v19297_v32 = vpop.f32.mrb[175].mxu1 }
0x21d5   :  { %v15418_v37 = vpop.f32.mrb[176].mxu1 }
0x21d6   :  { %v15419_v38 = vadd.f32 %v15418_v37, %v15347_v61  ;;  %v19302_v42 = vpop.f32.mrb[177].mxu1 }
0x21d8   :  { %v15868_v22 = vadd.f32 %v15419_v38, %v20948_v30 }
0x21d9   :  { %v15494_v45 = vpop.f32.mrb[178].mxu1 }
0x21da   :  { %v19307_v49 = vpop.f32.mrb[179].mxu1 }
0x21db   :  { %v16883_v49 = vld [vmem:[%s22156_s11 + $0x38] sm:$0xff] }
0x21dd   :  { %v15570_v3 = vpop.f32.mrb[180].mxu1 }
0x21de   :  { %v15571_v56 = vadd.f32 %v15570_v3, %v15494_v45  ;;  %v19312_v9 = vpop.f32.mrb[181].mxu1 }
0x21e0   :  { %v15645_v11 = vadd.f32 %v15644_v40, %v15571_v56  ;;  %v16884_v56 = vld [vmem:[%s22156_s11 + $0x40] sm:$0xff] }
0x21e1   :  { %v15718_v26 = vpop.f32.mrb[182].mxu1 }
0x21e2   :  { %v15719_v4 = vadd.f32 %v15718_v26, %v15645_v11  ;;  %v19322_v19 = vpop.f32.mrb[183].mxu1  ;;  %v16886_v11 = vld [vmem:[%s22156_s11 + $0x50] sm:$0xff]  ;;  %v16887_v26 = vld [vmem:[%s22156_s11 + $0x58] sm:$0xff] }
0x21e3   :  { %v16888_v19 = vld [vmem:[%s22156_s11 + $0x60] sm:$0xff] }
0x21e4   :  { %v15793_v1 = vadd.f32 %v15792_v52, %v15719_v4  ;;  %v19883_v4 = vpack.c.bf16 %v16887_v26, %v16886_v11 }
0x21e5   :  { %v15864_v21 = vpop.f32.mrb[184].mxu1 }
0x21e6   :  { %v15865_v36 = vadd.f32 %v15864_v21, %v15793_v1  ;;  %v19332_v18 = vpop.f32.mrb[185].mxu1  ;;  %v16889_v1 = vld [vmem:[%s22156_s11 + $0x68] sm:$0xff] }
0x21e7   :  { %v19887_v21 = vpack.c.bf16 %v16889_v1, %v16888_v19  ;;  %v16891_v18 = vld [vmem:[%s22156_s11 + $0x78] sm:$0xff] }
0x21e8   :  { %v15869_v15 = vadd.f32 %v15865_v36, %v20951_v28  ;;  %v16890_v36 = vld [vmem:[%s22156_s11 + $0x70] sm:$0xff] }
0x21ea   :  { %v15872_v57 = vrot.slane %v15869_v15, 7 }
0x21ec   :  { %v15873_v35 = vsel %vm1343_vm11, %v15872_v57, %v15868_v22  ;;  %v16861_v57 = vld [vmem:[%s22155_s10 + $0x8] sm:$0xff] }
0x21ed   :  { %v15875_v13 = vsel %vm2351_vm1, %v15873_v35, -inf }
0x21ee   :  { %15876 = vmax.xlane.f32.xlu0 %v15875_v13  ;;  %v16862_v13 = vld [vmem:[%s22155_s10 + $0x10] sm:$0xff] }
0x227b   :  { %v15877_v14 = vpop.xlane.xlu0 %15876 }
0x227c   :  { %v15879_v27 = vrot.slane %v15877_v14, 1  ;;  %v15882_v46 = vsub.f32 %v15868_v22, %v15877_v14  ;;  %v16860_v22 = vld [vmem:[%s22155_s10] sm:$0xff]  ;;  %v16863_v14 = vld [vmem:[%s22155_s10 + $0x18] sm:$0xff] }
0x227d   :  { %v19895_v35 = vpack.c.bf16 %v16861_v57, %v16860_v22 }
0x227e   :  { %v15883_v31 = vsub.f32 %v15869_v15, %v15879_v27  ;;  %v15884_v8 = vmul.f32 1.442695, %v15882_v46  ;;  %v19891_v15 = vpack.c.bf16 %v16891_v18, %v16890_v36  ;;  %v19899_v27 = vpack.c.bf16 %v16863_v14, %v16862_v13  ;;  %v16864_v46 = vld [vmem:[%s22155_s10 + $0x20] sm:$0xff] }
0x2280   :  { %v15886_v41 = vmul.f32 1.442695, %v15883_v31  ;;  %v16865_v31 = vld [vmem:[%s22155_s10 + $0x28] sm:$0xff] }
0x2282   :  { %20190 = vpow2.f32 %v15886_v41  ;;  %v16866_v41 = vld [vmem:[%s22155_s10 + $0x30] sm:$0xff] }
0x2283   :  { %20192 = vpow2.f32 %v15884_v8  ;;  %v19903_v8 = vpack.c.bf16 %v16865_v31, %v16864_v46 }
0x228c   :  { %v20191_v51 = vpop.eup %20190 }
0x228d   :  { %v15890_v48 = vrot.slane %v20191_v51, 7  ;;  %v20193_v7 = vpop.eup %20192 }
0x228f   :  { %v15891_v28 = vsel %vm1343_vm11, %v15890_v48, %v20193_v7 }
0x2290   :  { %v15893_v30 = vsel %vm2351_vm1, %v15891_v28, 0.0  ;;  %v16870_v28 = vld [vmem:[%s22155_s10 + $0x50] sm:$0xff] }
0x2291   :  { %15894 = vadd.xlane.f32.xlu1 %v15893_v30  ;;  %v16871_v30 = vld [vmem:[%s22155_s10 + $0x58] sm:$0xff] }
0x231e   :  { %v15895_v40 = vpop.xlane.xlu1 %15894 }
0x231f   :  { %v15897_v50 = vrot.slane %v15895_v40, 1  ;;  %20194 = vrcp.f32 %v15895_v40  ;;  %v19915_v40 = vpack.c.bf16 %v16871_v30, %v16870_v28 }
0x2321   :  { %20196 = vrcp.f32 %v15897_v50  ;;  %v16872_v50 = vld [vmem:[%s22155_s10 + $0x60] sm:$0xff] }
0x2329   :  { %v20195_v33 = vpop.eup %20194 }
0x232a   :  { %v15901_v52 = vmul.f32 %v20195_v33, %v20193_v7  ;;  %v16873_v33 = vld [vmem:[%s22155_s10 + $0x68] sm:$0xff] }
0x232b   :  { %v20197_v17 = vpop.eup %20196 }
0x232c   :  { %v15903_v39 = vmul.f32 %v20197_v17, %v20191_v51  ;;  %v15905_v54 = vsel %vm2381_vm2, %v15901_v52, 0  ;;  %v17072_v24 = vrot.slane %v15901_v52, 2  ;;  %v16867_v51 = vld [vmem:[%s22155_s10 + $0x38] sm:$0xff]  ;;  %v19919_v52 = vpack.c.bf16 %v16873_v33, %v16872_v50  ;;  %v16874_v17 = vld [vmem:[%s22155_s10 + $0x70] sm:$0xff] }
0x232d   :  { %v15973_v0 = vand.u32 4294901760, %v15905_v54  ;;  %v19907_v48 = vpack.c.bf16 %v16867_v51, %v16866_v41 }
0x232e   :  { %v17073_v55 = vrot.slane %v15903_v39, 1  ;;  %v16354_v60 = vsel %vm2381_vm2, %v15903_v39, 0  ;;  %v16875_v39 = vld [vmem:[%s22155_s10 + $0x78] sm:$0xff] }
0x232f   :  { %v15974_v20 = vsub.f32 %v15905_v54, %v15973_v0  ;;  %v16422_v58 = vand.u32 4294901760, %v16354_v60  ;;  %v19923_v54 = vpack.c.bf16 %v16875_v39, %v16874_v17 }
0x2330   :  { %v17074_v10 = vsel %vm7224_vm14, %v17073_v55, %v17072_v24 }
0x2331   :  { %v15975_v2 = vand.u32 4294901760, %v15974_v20  ;;  %v16423_v43 = vsub.f32 %v16354_v60, %v16422_v58  ;;  %v17081_v61 = vsel %vm1044_vm9, %v21820_v5, %v17074_v10  ;;  %v16882_v5 = vld [vmem:[%s22156_s11 + $0x30] sm:$0xff] }
0x2332   :  { %17083 = vst.msk [vmem:[#allocation4 + $0x8] sm:$0xff] %vm2381_vm2, %v17081_v61  ;;  %v19875_v3 = vpack.c.bf16 %v16883_v49, %v16882_v5 }
0x2333   :  { %v15976_v32 = vsub.f32 %v15974_v20, %v15975_v2  ;;  %v16424_v37 = vand.u32 4294901760, %v16423_v43 }
0x2335   :  { %v15977_v38 = vand.u32 4294901760, %v15976_v32  ;;  %v16425_v42 = vsub.f32 %v16423_v43, %v16424_v37 }
0x2337   :  { %19336 = vmatmul.mubr.f32.vlgmr.msra.gmra.mrb[72].mxu0 %v15977_v38  ;;  %v16426_v45 = vand.u32 4294901760, %v16425_v42 }
0x2338   :  { %19339 = vmatpush3.msra.mxu0 %v20897_v63  ;;  %19340 = vmatprep.mubr.msk.f32.mxu0 %vm20273_vm0, %v20274_v6  ;;  %v16879_v63 = vld [vmem:[%s22156_s11 + $0x18] sm:$0xff] }
0x2339   :  { %19366 = vmatmul.mubr.f32.vlgmr.msra.gmra.mrb[186].mxu1 %v16426_v45  ;;  %19343 = vmatprep.subr.mxu0 %v20274_v6 }
0x233a   :  { %19369 = vmatpush3.msra.mxu1 %v20929_v47  ;;  %19370 = vmatprep.mubr.msk.f32.mxu1 %vm20273_vm0, %v20274_v6 }
0x233b   :  { %19373 = vmatprep.subr.mxu1 %v20274_v6 }
0x233f   :  { %19341 = vmatmul.mubr.f32.vlgmr.msra.gmra.mrb[72].mxu0 %v15973_v0 }
0x2340   :  { %19344 = vmatpush3.msra.mxu0 %v20881_v23  ;;  %19345 = vmatprep.mubr.msk.f32.mxu0 %vm20273_vm0, %v20274_v6  ;;  %v16877_v23 = vld [vmem:[%s22156_s11 + $0x8] sm:$0xff] }
0x2341   :  { %19371 = vmatmul.mubr.f32.vlgmr.msra.gmra.mrb[186].mxu1 %v16422_v58  ;;  %19348 = vmatprep.subr.mxu0 %v20274_v6 }
0x2342   :  { %19374 = vmatpush3.msra.mxu1 %v20848_v62  ;;  %19375 = vmatprep.mubr.msk.f32.mxu1 %vm20273_vm0, %v20274_v6  ;;  %v16876_v62 = vld [vmem:[%s22156_s11] sm:$0xff] }
0x2343   :  { %19378 = vmatprep.subr.mxu1 %v20274_v6 }
0x2347   :  { %19346 = vmatmul.mubr.f32.vlgmr.msra.gmra.mrb[72].mxu0 %v15974_v20 }
0x2348   :  { %19349 = vmatpush3.msra.mxu0 %v20831_v44  ;;  %19350 = vmatprep.mubr.msk.f32.mxu0 %vm20273_vm0, %v20274_v6 }
0x2349   :  { %19376 = vmatmul.mubr.f32.vlgmr.msra.gmra.mrb[186].mxu1 %v16423_v43  ;;  %19353 = vmatprep.subr.mxu0 %v20274_v6 }
0x234a   :  { %19379 = vmatpush3.msra.mxu1 %v20844_v53  ;;  %19380 = vmatprep.mubr.msk.f32.mxu1 %vm20273_vm0, %v20274_v6 }
0x234b   :  { %19383 = vmatprep.subr.mxu1 %v20274_v6 }
0x234f   :  { %19351 = vmatmul.mubr.f32.vlgmr.msra.gmra.mrb[72].mxu0 %v15975_v2 }
0x2350   :  { %19354 = vmatpush3.msra.mxu0 %v20886_v34  ;;  %19355 = vmatprep.mubr.msk.f32.mxu0 %vm20273_vm0, %v20274_v6  ;;  %v19863_v34 = vpack.c.bf16 %v16877_v23, %v16876_v62 }
0x2351   :  { %19381 = vmatmul.mubr.f32.vlgmr.msra.gmra.mrb[186].mxu1 %v16424_v37  ;;  %19358 = vmatprep.subr.mxu0 %v20274_v6 }
0x2352   :  { %19384 = vmatpush3.msra.mxu1 %v20889_v25  ;;  %19385 = vmatprep.mubr.msk.f32.mxu1 %vm20273_vm0, %v20274_v6  ;;  %v16878_v25 = vld [vmem:[%s22156_s11 + $0x10] sm:$0xff] }
0x2353   :  { %19388 = vmatprep.subr.mxu1 %v20274_v6  ;;  %v19867_v47 = vpack.c.bf16 %v16879_v63, %v16878_v25 }
0x2357   :  { %19356 = vmatmul.mubr.f32.vlgmr.msra.gmra.mrb[72].mxu0 %v15973_v0 }
0x2358   :  { %19359 = vmatpush3.msra.mxu0 %v20831_v44  ;;  %19360 = vmatprep.mubr.msk.f32.mxu0 %vm20273_vm0, %v20274_v6  ;;  %v16880_v44 = vld [vmem:[%s22156_s11 + $0x20] sm:$0xff] }
0x2359   :  { %19386 = vmatmul.mubr.f32.vlgmr.msra.gmra.mrb[186].mxu1 %v16422_v58  ;;  %19864 = vmatprep.subr.bf16.mxu0 %v19863_v34 }
0x235a   :  { %19389 = vmatpush3.msra.mxu1 %v20844_v53  ;;  %19390 = vmatprep.mubr.msk.f32.mxu1 %vm20273_vm0, %v20274_v6  ;;  %v16881_v53 = vld [vmem:[%s22156_s11 + $0x28] sm:$0xff] }
0x235b   :  { %v19871_v6 = vpack.c.bf16 %v16881_v53, %v16880_v44 }
0x235f   :  { %19361 = vmatmul.mubr.f32.vlgmr.msra.gmra.mrb[72].mxu0 %v15973_v0 }
0x2360   :  { %19866 = vmatpush3.bf16.msra.mxu0 %v19863_v34  ;;  %19425 = vmatprep.mubr.f32.mxu0 %v21331_v16  ;;  %v16885_v16 = vld [vmem:[%s22156_s11 + $0x48] sm:$0xff]  ;;  %s20202_s11 = scalar_lea.vmem %s17103_s4, 256 }
0x2361   :  { %19391 = vmatmul.mubr.f32.vlgmr.msra.gmra.mrb[186].mxu1 %v16422_v58  ;;  %19868 = vmatprep.subr.bf16.mxu0 %v19867_v47  ;;  %v19879_v9 = vpack.c.bf16 %v16885_v16, %v16884_v56  ;;  %p20203_p0 = scmp.ne.s32.totalorder %s17103_s4, %s20202_s11  ;;  %p20208_p2 = scmp.lt.s32.totalorder %s20202_s11, %s20202_s11 }
0x2363   :  { %p20209_p3 = por %p20208_p2, %p20207_p1 }
0x2364   :  { %19870 = vmatpush3.bf16.msra.mxu0 %v19867_v47 }
0x2365   :  { %19872 = vmatprep.subr.bf16.mxu0 %v19871_v6  ;;  %p20210_p4 = pnand %p20209_p3, %p20203_p0 }
0x2368   :  { %19874 = vmatpush3.bf16.msra.mxu0 %v19871_v6 }
0x2369   :  { %19876 = vmatprep.subr.bf16.mxu0 %v19875_v3 }
0x236c   :  { %19878 = vmatpush3.bf16.msra.mxu0 %v19875_v3 }
0x236d   :  { %19880 = vmatprep.subr.bf16.mxu0 %v19879_v9 }
0x2370   :  { %19882 = vmatpush3.bf16.msra.mxu0 %v19879_v9 }
0x2371   :  { %19884 = vmatprep.subr.bf16.mxu0 %v19883_v4 }
0x2374   :  { %19886 = vmatpush3.bf16.msra.mxu0 %v19883_v4 }
0x2375   :  { %19888 = vmatprep.subr.bf16.mxu0 %v19887_v21 }
0x2378   :  { %19890 = vmatpush3.bf16.msra.mxu0 %v19887_v21 }
0x2379   :  { %19892 = vmatprep.subr.bf16.mxu0 %v19891_v15 }
0x237c   :  { %19894 = vmatpush3.bf16.msra.mxu0 %v19891_v15 }
0x237d   :  { %19896 = vmatprep.subr.bf16.mxu0 %v19895_v35 }
0x237f   :  { %19426 = vmatmul.mubr.f32.vlgmr.msra.gmra.mrb[74].mxu0 %v21898_v29  ;;  %v16868_v29 = vld [vmem:[%s22155_s10 + $0x40] sm:$0xff] }
0x2380   :  { %19460 = vmatprep.mubr.f32.mxu0 %v21466_v12  ;;  %19898 = vmatpush3.bf16.msra.mxu0 %v19895_v35  ;;  %v16869_v12 = vld [vmem:[%s22155_s10 + $0x48] sm:$0xff] }
0x2381   :  { %19900 = vmatprep.subr.bf16.mxu0 %v19899_v27  ;;  %v19911_v7 = vpack.c.bf16 %v16869_v12, %v16868_v29 }
0x2384   :  { %19902 = vmatpush3.bf16.msra.mxu0 %v19899_v27 }
0x2385   :  { %19904 = vmatprep.subr.bf16.mxu0 %v19903_v8 }
0x2388   :  { %19906 = vmatpush3.bf16.msra.mxu0 %v19903_v8 }
0x2389   :  { %19908 = vmatprep.subr.bf16.mxu0 %v19907_v48 }
0x238c   :  { %19910 = vmatpush3.bf16.msra.mxu0 %v19907_v48 }
0x238d   :  { %19912 = vmatprep.subr.bf16.mxu0 %v19911_v7 }
0x2390   :  { %19914 = vmatpush3.bf16.msra.mxu0 %v19911_v7 }
0x2391   :  { %19916 = vmatprep.subr.bf16.mxu0 %v19915_v40 }
0x2394   :  { %19918 = vmatpush3.bf16.msra.mxu0 %v19915_v40 }
0x2395   :  { %19920 = vmatprep.subr.bf16.mxu0 %v19919_v52 }
0x2398   :  { %19922 = vmatpush3.bf16.msra.mxu0 %v19919_v52 }
0x2399   :  { %19924 = vmatprep.subr.bf16.mxu0 %v19923_v54 }
0x239c   :  { %19926 = vmatpush3.bf16.msra.mxu0 %v19923_v54 }
0x2432   :  { %v16349_v0 = vpop.f32.mrb[72].mxu0 }
0x2433   :  { %v19362_v24 = vpop.f32.mrb[73].mxu0  ;;  %v16850_v60 = vrot.slane %v16349_v0, 2 }
0x2434   :  { %v16798_v55 = vpop.f32.mrb[186].mxu1 }
0x2435   :  { %v16851_v20 = vrot.slane %v16798_v55, 1  ;;  %v19392_v58 = vpop.f32.mrb[187].mxu1 }
0x2437   :  { %v16852_v10 = vsel %vm7224_vm14, %v16851_v20, %v16850_v60 }
0x2438   :  { %v16859_v2 = vsel %vm1044_vm9, %v21892_v59, %v16852_v10 }
0x2439   :  { %19461 = vmatmul.mubr.f32.vlgmr.msra.gmra.mrb[74].mxu0 %v16859_v2 }
0x243a   :  { %20213 = shalt.err (!%p20210_p4)
}
0x243b   :  { %s20214_s22 = scalar_lea.hbm %s22158_s13, 256 }
0x243c   :  { %p20215_p5 = scmp.ne.s32.totalorder %s22158_s13, %s20214_s22  ;;  %p20218_p6 = scmp.lt.u32.totalorder %s20214_s22, %s22158_s13 }
0x243e   :  { %p20220_p7 = pnand %p20218_p6, %p20215_p5 }
0x2440   :  { %20223 = shalt.err (!%p20220_p7)
}
0x2441   :  { %s20279_s25 = smov 128   ;;  %s20280_s1 = smov 8  }
0x2442   :  { %17108 = dma.vmem_to_hbm [thread:$0]  %s17103_s4, 256, %s22158_s13, [#allocation5], %s20279_s25, %s20279_s25, %s20280_s1  }
0x2443   :  { %s20281_s27 = smov [#allocation6]  }
0x2444   :  { %s17115_s8 = sshll.u32 %s20281_s27, 4  ;;  %s17116_s8 = int_to_ptr.vmem [resolvable:$true] %s17115_s8 }
0x2445   :  { %s20224_s2 = scalar_lea.vmem %s17116_s8, 32  ;;  %p20229_p9 = scmp.lt.s32.totalorder %s17116_s8, %s17116_s8 }
0x2446   :  { %p20225_p8 = scmp.ne.s32.totalorder %s17116_s8, %s20224_s2  ;;  %p20230_p10 = scmp.lt.s32.totalorder %s20224_s2, %s20224_s2 }
0x2448   :  { %p20231_p11 = por %p20230_p10, %p20229_p9 }
0x244a   :  { %p20232_p12 = pnand %p20231_p11, %p20225_p8 }
0x244c   :  { %20235 = shalt.err (!%p20232_p12)
}
0x244d   :  { %s20236_s3 = scalar_lea.hbm %s22159_s14, 32 }
0x244e   :  { %p20237_p13 = scmp.ne.s32.totalorder %s22159_s14, %s20236_s3  ;;  %p20240_p0 = scmp.lt.u32.totalorder %s20236_s3, %s22159_s14 }
0x2450   :  { %p20242_p1 = pnand %p20240_p0, %p20237_p13 }
0x2452   :  { %20245 = shalt.err (!%p20242_p1)
}
0x2453   :  { %17118 = dma.vmem_to_hbm [thread:$0]  %s17116_s8, 32, %s22159_s14, [#allocation5]  }
0x2454   :  { %s20282_s17 = smov [#allocation2]  }
0x2455   :  { %s17090_s18 = sshll.u32 %s20282_s17, 4  ;;  %s17091_s18 = int_to_ptr.vmem [resolvable:$true] %s17090_s18 }
0x2456   :  { %s20246_s19 = scalar_lea.vmem %s17091_s18, 256  ;;  %p20251_p3 = scmp.lt.s32.totalorder %s17091_s18, %s17091_s18 }
0x2457   :  { %p20247_p2 = scmp.ne.s32.totalorder %s17091_s18, %s20246_s19  ;;  %p20252_p4 = scmp.lt.s32.totalorder %s20246_s19, %s20246_s19 }
0x2459   :  { %p20253_p5 = por %p20252_p4, %p20251_p3 }
0x245b   :  { %p20254_p6 = pnand %p20253_p5, %p20247_p2 }
0x250c   :  { %v19462_v59 = vpop.f32.mrb[74].mxu0 }
0x250d   :  { %20198 = vtanh.f32 %v19462_v59  ;;  %v17033_v43 = vpop.f32.mrb[75].mxu0 }
0x250e   :  { %20200 = vtanh.f32 %v17033_v43 }
0x2517   :  { %v20199_v61 = vpop.eup %20198 }
0x2518   :  { %v20201_v32 = vpop.eup %20200  ;;  %17045 = vst [vmem:[#allocation2 + $0x8] sm:$0xff] %v20199_v61 }
0x2519   :  { %17044 = vst [vmem:[#allocation2] sm:$0xff] %v20201_v32 }
0x251a   :  { %20257 = shalt.err (!%p20254_p6)
}
0x251b   :  { %s20258_s4 = scalar_lea.hbm %s22157_s12, 256 }
0x251c   :  { %p20259_p7 = scmp.ne.s32.totalorder %s22157_s12, %s20258_s4  ;;  %p20262_p8 = scmp.lt.u32.totalorder %s20258_s4, %s22157_s12 }
0x251e   :  { %p20264_p9 = pnand %p20262_p8, %p20259_p7 }
0x2520   :  { %20267 = shalt.err (!%p20264_p9)
}
0x2521   :  { %17096 = dma.vmem_to_hbm [thread:$0]  %s17091_s18, 256, %s22157_s12, [#allocation3], %s20279_s25, %s20279_s25, %s20280_s1  }
0x2522   :  { %20268 = dma.done.wait [#allocation3], 256  }
0x2523   :  { %20269 = vsyncadd [#allocation3], 4294967040 }
0x2524   :  { %20270 = dma.done.wait [#allocation5], 288  }
0x2525   :  { %20271 = vsyncadd [#allocation5], 4294967008 }
0x2526   :  { %17128 = vsyncpa [#allocation3], 1 }
0x2527   :  { %17129 = vsyncpa [#allocation5], 1 }

</bundles_post_ra>
